<compile_context>
chip_gen: v7x
topology: tpu7x:2x2x1
jax: 0.10.0
libtpu: 0.0.40
codegen_flags: <defaults>
</compile_context>

<pallas_src>
import functools

import jax
import jax.numpy as jnp
from jax.experimental import pallas as pl
from jax.experimental.pallas import tpu as pltpu

LANE = 128


def _round_up(v, m):
    return ((v + m - 1) // m) * m


# --------------------------------------------------------------------------
# Kernel
# --------------------------------------------------------------------------
def _make_sage_kernel(finalize, tm, tk, f_in):
    """One SAGEConv layer. Grid = (row tiles i, source tiles k); k is a reduction."""

    def kernel(adj_ref, feat_ref, invdeg_ref, w_ref, b_ref, out_ref, acc_ref):
        i = pl.program_id(0)
        k = pl.program_id(1)

        @pl.when(k == 0)
        def _():
            acc_ref[...] = jnp.zeros_like(acc_ref)

        # Neighbor-sum over source tiles: acc += A_tile @ feat_tile.
        # Both operands are bf16 (native MXU pass); small integer edge counts are
        # exact in bf16; the accumulator is f32, so the aggregation stays exact.
        ks = pl.multiple_of(k * tk, tk)
        fs = feat_ref[pl.ds(ks, tk), :]                       # slice of resident slab
        acc_ref[...] += jnp.dot(adj_ref[...], fs, preferred_element_type=jnp.float32)

        @pl.when(k == pl.num_programs(1) - 1)
        def _():
            agg = acc_ref[...] * invdeg_ref[...]              # exact f32 mean aggregation
            rs = pl.multiple_of(i * tm, tm)
            x_root = feat_ref[pl.ds(rs, tm), :].astype(jnp.float32)
            # Fused root + neighbor transform as two dots against static slices of
            # the stacked [W_l ; W_r] ref -> no (tm, 2*f_in) concat temporary.
            z = (jnp.dot(agg, w_ref[:f_in, :], preferred_element_type=jnp.float32)
                 + jnp.dot(x_root, w_ref[f_in:, :], preferred_element_type=jnp.float32)
                 + b_ref[...])
            out_ref[...] = finalize(z).astype(out_ref.dtype)

    return kernel


def _sage_layer(adj, feat, inv_deg, w, b, finalize, out_dtype, *, tm, tk):
    n_pad = adj.shape[0]
    f_in = feat.shape[1]
    f_out = w.shape[1]
    grid = (n_pad // tm, n_pad // tk)
    return pl.pallas_call(
        _make_sage_kernel(finalize, tm, tk, f_in),
        out_shape=jax.ShapeDtypeStruct((n_pad, f_out), out_dtype),
        grid_spec=pltpu.PrefetchScalarGridSpec(
            num_scalar_prefetch=0,
            grid=grid,
            in_specs=[
                pl.BlockSpec((tm, tk), lambda i, k: (i, k)),            # adj (bf16, streamed)
                pl.BlockSpec((n_pad, f_in), lambda i, k: (0, 0)),       # features: VMEM-resident
                pl.BlockSpec((tm, 1), lambda i, k: (i, 0)),             # 1/deg (row tile)
                pl.BlockSpec((2 * f_in, f_out), lambda i, k: (0, 0)),   # [W_l;W_r] resident
                pl.BlockSpec((1, f_out), lambda i, k: (0, 0)),          # bias resident
            ],
            out_specs=pl.BlockSpec((tm, f_out), lambda i, k: (i, 0)),
            scratch_shapes=[pltpu.VMEM((tm, f_in), jnp.float32)],
        ),
        compiler_params=pltpu.CompilerParams(
            dimension_semantics=("parallel", "arbitrary"),
            # Budgeted against v7x's 64 MiB physical VMEM (resident feat slab +
            # double-buffered adj tiles + acc + out + weights stay well under it
            # at these shapes); v5e/v6e have 128 MiB so this is conservative there.
            vmem_limit_bytes=48 * 1024 * 1024,
        ),
    )(adj, feat, inv_deg, w, b)


def _masked_log_softmax(valid_channels):
    """log_softmax over the lane axis, ignoring padded channels (f32 only)."""

    def fin(z):
        lane = jax.lax.broadcasted_iota(jnp.int32, z.shape, 1)
        z = jnp.where(lane < valid_channels, z, -1e30)
        m = jnp.max(z, axis=-1, keepdims=True)
        s = z - m
        lse = jnp.log(jnp.sum(jnp.exp(s), axis=-1, keepdims=True))
        return s - lse

    return fin


# --------------------------------------------------------------------------
# Graph / parameter preprocessing (run once for a static graph)
# --------------------------------------------------------------------------
def build_graph(edge_index, num_nodes, *, pad_to=512):
    """Dense edge-count matrix (bf16, exact for counts <= 256) and f32 1/in-degree.

    pad_to=512 keeps n_pad a multiple of both tm=256 and tk=512, and keeps the
    number of row tiles even so both v7x TensorCores get work.
    """
    n_pad = _round_up(num_nodes, pad_to)
    src, dst = edge_index[0], edge_index[1]
    counts = jnp.zeros((n_pad, n_pad), jnp.float32).at[dst, src].add(1.0)
    # bf16 represents integers exactly only up to 256; guard multigraph inputs.
    assert int(jnp.max(counts)) <= 256, "edge multiplicity > 256 not exact in bf16"
    deg = jnp.sum(counts, axis=1, keepdims=True)
    inv_deg = jnp.where(deg > 0, 1.0 / jnp.where(deg > 0, deg, 1.0), 0.0)
    return counts.astype(jnp.bfloat16), inv_deg.astype(jnp.float32)


def init_params(key, in_channels, hidden_channels, out_channels):
    """Raw SAGEConv weights, pre-transposed to [in, out] (PyG: mean aggr,
    root_weight=True, bias on lin_l only)."""
    ks = jax.random.split(key, 6)
    s1 = 1.0 / jnp.sqrt(in_channels)
    s2 = 1.0 / jnp.sqrt(hidden_channels)
    return {
        "w1l": s1 * jax.random.normal(ks[0], (in_channels, hidden_channels), jnp.float32),
        "w1r": s1 * jax.random.normal(ks[1], (in_channels, hidden_channels), jnp.float32),
        "b1":  s1 * jax.random.normal(ks[2], (hidden_channels,), jnp.float32),
        "w2l": s2 * jax.random.normal(ks[3], (hidden_channels, out_channels), jnp.float32),
        "w2r": s2 * jax.random.normal(ks[4], (hidden_channels, out_channels), jnp.float32),
        "b2":  s2 * jax.random.normal(ks[5], (out_channels,), jnp.float32),
    }


def pack_params(raw):
    """Pad feature widths to 128 lanes and stack [W_l ; W_r] per layer (f32)."""
    in_ch, hid_ch = raw["w1l"].shape
    out_ch = raw["w2l"].shape[1]
    fin_p = _round_up(in_ch, LANE)
    hid_p = _round_up(hid_ch, LANE)
    out_p = _round_up(out_ch, LANE)

    def pad2(a, r, c):
        return jnp.pad(a, ((0, r - a.shape[0]), (0, c - a.shape[1])))

    w1 = jnp.concatenate([pad2(raw["w1l"], fin_p, hid_p),
                          pad2(raw["w1r"], fin_p, hid_p)], axis=0)   # [2*fin_p, hid_p]
    w2 = jnp.concatenate([pad2(raw["w2l"], hid_p, out_p),
                          pad2(raw["w2r"], hid_p, out_p)], axis=0)   # [2*hid_p, out_p]
    b1 = jnp.pad(raw["b1"], (0, hid_p - hid_ch)).reshape(1, hid_p)
    b2 = jnp.pad(raw["b2"], (0, out_p - out_ch)).reshape(1, out_p)
    return {"w1": w1, "b1": b1, "w2": w2, "b2": b2}


# --------------------------------------------------------------------------
# Forward
# --------------------------------------------------------------------------
@functools.partial(jax.jit, static_argnames=("num_nodes", "out_channels", "tm", "tk"))
def graphsage_forward(x, adj, inv_deg, packed, *, num_nodes, out_channels,
                      tm=256, tk=512):
    n_pad = adj.shape[0]
    tm = min(tm, n_pad)
    tk = min(tk, n_pad)
    fin_p = packed["w1"].shape[0] // 2
    # bf16 features: halves the streamed-operand traffic; accumulation stays f32.
    x_p = jnp.pad(x, ((0, n_pad - x.shape[0]),
                      (0, fin_p - x.shape[1]))).astype(jnp.bfloat16)

    # Layer 1: SAGEConv(in, hidden) + ReLU  -> h [n_pad, hid_p] bf16 (lane-dense)
    h = _sage_layer(adj, x_p, inv_deg, packed["w1"], packed["b1"],
                    lambda z: jnp.maximum(z, 0.0), jnp.bfloat16, tm=tm, tk=tk)
    # Layer 2: SAGEConv(hidden, out) + masked log_softmax over real channels (f32)
    y = _sage_layer(adj, h, inv_deg, packed["w2"], packed["b2"],
                    _masked_log_softmax(out_channels), jnp.float32, tm=tm, tk=tk)
    return y[:num_nodes, :out_channels]


# --------------------------------------------------------------------------
# Pure-JAX reference (matches the original un-tiled semantics)
# --------------------------------------------------------------------------
def reference_forward(x, edge_index, raw):
    n = x.shape[0]
    src, dst = edge_index[0], edge_index[1]
    adj = jnp.zeros((n, n), jnp.float32).at[dst, src].add(1.0)
    deg = jnp.sum(adj, axis=1, keepdims=True)
    adj = jnp.where(deg > 0, adj / jnp.where(deg > 0, deg, 1.0), 0.0)
    hp = jax.lax.Precision.HIGHEST
    dot = lambda a, b: jnp.dot(a, b, precision=hp)
    h = jax.nn.relu(dot(dot(adj, x), raw["w1l"]) + raw["b1"] + dot(x, raw["w1r"]))
    y = dot(dot(adj, h), raw["w2l"]) + raw["b2"] + dot(h, raw["w2r"])
    return jax.nn.log_softmax(y, axis=1)


if __name__ == "__main__":
    key = jax.random.PRNGKey(0)
    k_x, k_e, k_p = jax.random.split(key, 3)

    N, IN_CH, HID_CH, OUT_CH, E = 256, 8, 32, 4, 1024

    x = jax.random.normal(k_x, (N, IN_CH), jnp.float32)
    edge_index = jax.random.randint(k_e, (2, E), 0, N, dtype=jnp.int32)

    raw = init_params(k_p, IN_CH, HID_CH, OUT_CH)
    packed = pack_params(raw)
    adj, inv_deg = build_graph(edge_index, N)   # static graph: precomputed once

    out = graphsage_forward(x, adj, inv_deg, packed,
                            num_nodes=N, out_channels=OUT_CH)
    jax.block_until_ready(out)

    assert out.shape == (N, OUT_CH)
    # rows of log_softmax must exp-sum to 1
    assert bool(jnp.allclose(jnp.sum(jnp.exp(out), axis=-1), 1.0, atol=1e-3))
    # match the un-tiled dense f32 reference (bf16 operands -> looser tolerance)
    ref = reference_forward(x, edge_index, raw)
    assert bool(jnp.allclose(out, ref, atol=3e-2, rtol=3e-2)), \
        float(jnp.max(jnp.abs(out - ref)))
    print("KERNEL_OK")
</pallas_src>

<mosaic_0001>
module attributes {stable_mosaic.version = 11 : i64} {
  func.func @kernel(%arg0: i32, %arg1: i32, %arg2: memref<256x512xbf16, #tpu.memory_space<vmem>>, %arg3: memref<512x128xbf16, #tpu.memory_space<vmem>>, %arg4: memref<256x1xf32, #tpu.memory_space<vmem>>, %arg5: memref<256x128xf32, #tpu.memory_space<vmem>>, %arg6: memref<1x128xf32, #tpu.memory_space<vmem>>, %arg7: memref<256x128xbf16, #tpu.memory_space<vmem>>, %arg8: memref<256x128xf32, #tpu.memory_space<vmem>>) attributes {dimension_semantics = [#tpu.dimension_semantics<parallel>, #tpu.dimension_semantics<arbitrary>], iteration_bounds = array<i64: 2, 1>, scalar_prefetch = 0 : i64, scratch_operands = 1 : i64, tpu.core_type = #tpu.core_type<tc>, window_params = [{transform_indices = @transform_0, window_bounds = array<i64: 256, 512>}, {pipeline_mode = #tpu.pipeline_mode<synchronous>, transform_indices = @transform_1, window_bounds = array<i64: 512, 128>}, {transform_indices = @transform_2, window_bounds = array<i64: 256, 1>}, {pipeline_mode = #tpu.pipeline_mode<synchronous>, transform_indices = @transform_3, window_bounds = array<i64: 256, 128>}, {pipeline_mode = #tpu.pipeline_mode<synchronous>, transform_indices = @transform_4, window_bounds = array<i64: 1, 128>}, {transform_indices = @transform_5, window_bounds = array<i64: 256, 128>}]} {
    %c0_i32 = arith.constant 0 : i32
    %0 = arith.cmpi eq, %arg1, %c0_i32 : i32
    %1 = arith.extui %0 : i1 to i32
    %c0_i32_0 = arith.constant 0 : i32
    %2 = arith.cmpi ne, %1, %c0_i32_0 : i32
    scf.if %2 {
      %cst_9 = arith.constant 0.000000e+00 : f32
      %15 = vector.broadcast %cst_9 : f32 to vector<256x128xf32>
      %c0_10 = arith.constant 0 : index
      %c0_11 = arith.constant 0 : index
      %16 = vector.load %arg8[%c0_10, %c0_11] : memref<256x128xf32, #tpu.memory_space<vmem>>, vector<256x128xf32>
      tpu.vector_store %arg8[%c0_10, %c0_11], %15 {strides = array<i32>} : memref<256x128xf32, #tpu.memory_space<vmem>>, vector<256x128xf32>,
    } else {
    }
    %c512_i32 = arith.constant 512 : i32
    %3 = arith.muli %arg1, %c512_i32 : i32
    %4 = tpu.assume_multiple %3, 512 : i32
    %5 = arith.index_cast %4 : i32 to index
    %c0 = arith.constant 0 : index
    %6 = vector.load %arg3[%5, %c0] : memref<512x128xbf16, #tpu.memory_space<vmem>>, vector<512x128xbf16>
    %c0_1 = arith.constant 0 : index
    %c0_2 = arith.constant 0 : index
    %7 = vector.load %arg8[%c0_1, %c0_2] : memref<256x128xf32, #tpu.memory_space<vmem>>, vector<256x128xf32>
    %c0_3 = arith.constant 0 : index
    %c0_4 = arith.constant 0 : index
    %8 = vector.load %arg2[%c0_3, %c0_4] : memref<256x512xbf16, #tpu.memory_space<vmem>>, vector<256x512xbf16>
    %cst = arith.constant dense<0.000000e+00> : vector<256x128xf32>
    %9 = tpu.matmul %8, %6, %cst {dimension_numbers = #tpu.dot_dimension_numbers<[1], [0], [0], [1], [0, 0, 1, 1], [], []>} : vector<256x512xbf16>, vector<512x128xbf16>, vector<256x128xf32> -> vector<256x128xf32>
    %10 = arith.addf %7, %9 : vector<256x128xf32>
    %c0_5 = arith.constant 0 : index
    %c0_6 = arith.constant 0 : index
    %11 = vector.load %arg8[%c0_5, %c0_6] : memref<256x128xf32, #tpu.memory_space<vmem>>, vector<256x128xf32>
    tpu.vector_store %arg8[%c0_5, %c0_6], %10 {strides = array<i32>} : memref<256x128xf32, #tpu.memory_space<vmem>>, vector<256x128xf32>,
    %c0_i32_7 = arith.constant 0 : i32
    %12 = arith.cmpi eq, %arg1, %c0_i32_7 : i32
    %13 = arith.extui %12 : i1 to i32
    %c0_i32_8 = arith.constant 0 : i32
    %14 = arith.cmpi ne, %13, %c0_i32_8 : i32
    scf.if %14 {
      %c0_9 = arith.constant 0 : index
      %c0_10 = arith.constant 0 : index
      %15 = vector.load %arg8[%c0_9, %c0_10] : memref<256x128xf32, #tpu.memory_space<vmem>>, vector<256x128xf32>
      %c0_11 = arith.constant 0 : index
      %c0_12 = arith.constant 0 : index
      %16 = vector.load %arg4[%c0_11, %c0_12] : memref<256x1xf32, #tpu.memory_space<vmem>>, vector<256x1xf32>
      %17 = vector.broadcast %16 : vector<256x1xf32> to vector<256x128xf32>
      %18 = arith.mulf %15, %17 : vector<256x128xf32>
      %c256_i32 = arith.constant 256 : i32
      %19 = arith.muli %arg0, %c256_i32 : i32
      %20 = tpu.assume_multiple %19, 256 : i32
      %21 = arith.index_cast %20 : i32 to index
      %c0_13 = arith.constant 0 : index
      %22 = vector.load %arg3[%21, %c0_13] : memref<512x128xbf16, #tpu.memory_space<vmem>>, vector<256x128xbf16>
      %23 = arith.extf %22 : vector<256x128xbf16> to vector<256x128xf32>
      %c0_14 = arith.constant 0 : index
      %c0_15 = arith.constant 0 : index
      %24 = vector.load %arg5[%c0_14, %c0_15] : memref<256x128xf32, #tpu.memory_space<vmem>>, vector<128x128xf32>
      %cst_16 = arith.constant dense<0.000000e+00> : vector<256x128xf32>
      %25 = tpu.matmul %18, %24, %cst_16 {dimension_numbers = #tpu.dot_dimension_numbers<[1], [0], [0], [1], [0, 0, 1, 1], [], []>} : vector<256x128xf32>, vector<128x128xf32>, vector<256x128xf32> -> vector<256x128xf32>
      %c128 = arith.constant 128 : index
      %c0_17 = arith.constant 0 : index
      %26 = vector.load %arg5[%c128, %c0_17] : memref<256x128xf32, #tpu.memory_space<vmem>>, vector<128x128xf32>
      %cst_18 = arith.constant dense<0.000000e+00> : vector<256x128xf32>
      %27 = tpu.matmul %23, %26, %cst_18 {dimension_numbers = #tpu.dot_dimension_numbers<[1], [0], [0], [1], [0, 0, 1, 1], [], []>} : vector<256x128xf32>, vector<128x128xf32>, vector<256x128xf32> -> vector<256x128xf32>
      %28 = arith.addf %25, %27 : vector<256x128xf32>
      %c0_19 = arith.constant 0 : index
      %c0_20 = arith.constant 0 : index
      %29 = vector.load %arg6[%c0_19, %c0_20] : memref<1x128xf32, #tpu.memory_space<vmem>>, vector<1x128xf32>
      %30 = vector.broadcast %29 : vector<1x128xf32> to vector<256x128xf32>
      %31 = arith.addf %28, %30 : vector<256x128xf32>
      %cst_21 = arith.constant 0.000000e+00 : f32
      %32 = vector.broadcast %cst_21 : f32 to vector<256x128xf32>
      %33 = arith.maximumf %31, %32 : vector<256x128xf32>
      %34 = arith.truncf %33 : vector<256x128xf32> to vector<256x128xbf16>
      %c0_22 = arith.constant 0 : index
      %c0_23 = arith.constant 0 : index
      %35 = vector.load %arg7[%c0_22, %c0_23] : memref<256x128xbf16, #tpu.memory_space<vmem>>, vector<256x128xbf16>
      tpu.vector_store %arg7[%c0_22, %c0_23], %34 {strides = array<i32>} : memref<256x128xbf16, #tpu.memory_space<vmem>>, vector<256x128xbf16>,
    } else {
    }
    return
  }
  func.func @transform_0(%arg0: i32, %arg1: i32) -> (i32, i32) {
    %c0_i32 = arith.constant 0 : i32
    return %arg0, %arg1 : i32, i32
  }
  func.func @transform_1(%arg0: i32, %arg1: i32) -> (i32, i32) {
    %c0_i32 = arith.constant 0 : i32
    %c0_i32_0 = arith.constant 0 : i32
    %c0_i32_1 = arith.constant 0 : i32
    return %c0_i32, %c0_i32_0 : i32, i32
  }
  func.func @transform_2(%arg0: i32, %arg1: i32) -> (i32, i32) {
    %c0_i32 = arith.constant 0 : i32
    %c0_i32_0 = arith.constant 0 : i32
    return %arg0, %c0_i32 : i32, i32
  }
  func.func @transform_3(%arg0: i32, %arg1: i32) -> (i32, i32) {
    %c0_i32 = arith.constant 0 : i32
    %c0_i32_0 = arith.constant 0 : i32
    %c0_i32_1 = arith.constant 0 : i32
    return %c0_i32, %c0_i32_0 : i32, i32
  }
  func.func @transform_4(%arg0: i32, %arg1: i32) -> (i32, i32) {
    %c0_i32 = arith.constant 0 : i32
    %c0_i32_0 = arith.constant 0 : i32
    %c0_i32_1 = arith.constant 0 : i32
    return %c0_i32, %c0_i32_0 : i32, i32
  }
  func.func @transform_5(%arg0: i32, %arg1: i32) -> (i32, i32) {
    %c0_i32 = arith.constant 0 : i32
    %c0_i32_0 = arith.constant 0 : i32
    return %arg0, %c0_i32 : i32, i32
  }
}

module attributes {stable_mosaic.version = 11 : i64} {
  func.func @kernel(%arg0: i32, %arg1: i32, %arg2: memref<256x512xbf16, #tpu.memory_space<vmem>>, %arg3: memref<512x128xbf16, #tpu.memory_space<vmem>>, %arg4: memref<256x1xf32, #tpu.memory_space<vmem>>, %arg5: memref<256x128xf32, #tpu.memory_space<vmem>>, %arg6: memref<1x128xf32, #tpu.memory_space<vmem>>, %arg7: memref<256x128xf32, #tpu.memory_space<vmem>>, %arg8: memref<256x128xf32, #tpu.memory_space<vmem>>) attributes {dimension_semantics = [#tpu.dimension_semantics<parallel>, #tpu.dimension_semantics<arbitrary>], iteration_bounds = array<i64: 2, 1>, scalar_prefetch = 0 : i64, scratch_operands = 1 : i64, tpu.core_type = #tpu.core_type<tc>, window_params = [{transform_indices = @transform_0, window_bounds = array<i64: 256, 512>}, {pipeline_mode = #tpu.pipeline_mode<synchronous>, transform_indices = @transform_1, window_bounds = array<i64: 512, 128>}, {transform_indices = @transform_2, window_bounds = array<i64: 256, 1>}, {pipeline_mode = #tpu.pipeline_mode<synchronous>, transform_indices = @transform_3, window_bounds = array<i64: 256, 128>}, {pipeline_mode = #tpu.pipeline_mode<synchronous>, transform_indices = @transform_4, window_bounds = array<i64: 1, 128>}, {transform_indices = @transform_5, window_bounds = array<i64: 256, 128>}]} {
    %c0_i32 = arith.constant 0 : i32
    %0 = arith.cmpi eq, %arg1, %c0_i32 : i32
    %1 = arith.extui %0 : i1 to i32
    %c0_i32_0 = arith.constant 0 : i32
    %2 = arith.cmpi ne, %1, %c0_i32_0 : i32
    scf.if %2 {
      %cst_9 = arith.constant 0.000000e+00 : f32
      %15 = vector.broadcast %cst_9 : f32 to vector<256x128xf32>
      %c0_10 = arith.constant 0 : index
      %c0_11 = arith.constant 0 : index
      %16 = vector.load %arg8[%c0_10, %c0_11] : memref<256x128xf32, #tpu.memory_space<vmem>>, vector<256x128xf32>
      tpu.vector_store %arg8[%c0_10, %c0_11], %15 {strides = array<i32>} : memref<256x128xf32, #tpu.memory_space<vmem>>, vector<256x128xf32>,
    } else {
    }
    %c512_i32 = arith.constant 512 : i32
    %3 = arith.muli %arg1, %c512_i32 : i32
    %4 = tpu.assume_multiple %3, 512 : i32
    %5 = arith.index_cast %4 : i32 to index
    %c0 = arith.constant 0 : index
    %6 = vector.load %arg3[%5, %c0] : memref<512x128xbf16, #tpu.memory_space<vmem>>, vector<512x128xbf16>
    %c0_1 = arith.constant 0 : index
    %c0_2 = arith.constant 0 : index
    %7 = vector.load %arg8[%c0_1, %c0_2] : memref<256x128xf32, #tpu.memory_space<vmem>>, vector<256x128xf32>
    %c0_3 = arith.constant 0 : index
    %c0_4 = arith.constant 0 : index
    %8 = vector.load %arg2[%c0_3, %c0_4] : memref<256x512xbf16, #tpu.memory_space<vmem>>, vector<256x512xbf16>
    %cst = arith.constant dense<0.000000e+00> : vector<256x128xf32>
    %9 = tpu.matmul %8, %6, %cst {dimension_numbers = #tpu.dot_dimension_numbers<[1], [0], [0], [1], [0, 0, 1, 1], [], []>} : vector<256x512xbf16>, vector<512x128xbf16>, vector<256x128xf32> -> vector<256x128xf32>
    %10 = arith.addf %7, %9 : vector<256x128xf32>
    %c0_5 = arith.constant 0 : index
    %c0_6 = arith.constant 0 : index
    %11 = vector.load %arg8[%c0_5, %c0_6] : memref<256x128xf32, #tpu.memory_space<vmem>>, vector<256x128xf32>
    tpu.vector_store %arg8[%c0_5, %c0_6], %10 {strides = array<i32>} : memref<256x128xf32, #tpu.memory_space<vmem>>, vector<256x128xf32>,
    %c0_i32_7 = arith.constant 0 : i32
    %12 = arith.cmpi eq, %arg1, %c0_i32_7 : i32
    %13 = arith.extui %12 : i1 to i32
    %c0_i32_8 = arith.constant 0 : i32
    %14 = arith.cmpi ne, %13, %c0_i32_8 : i32
    scf.if %14 {
      %c0_9 = arith.constant 0 : index
      %c0_10 = arith.constant 0 : index
      %15 = vector.load %arg8[%c0_9, %c0_10] : memref<256x128xf32, #tpu.memory_space<vmem>>, vector<256x128xf32>
      %c0_11 = arith.constant 0 : index
      %c0_12 = arith.constant 0 : index
      %16 = vector.load %arg4[%c0_11, %c0_12] : memref<256x1xf32, #tpu.memory_space<vmem>>, vector<256x1xf32>
      %17 = vector.broadcast %16 : vector<256x1xf32> to vector<256x128xf32>
      %18 = arith.mulf %15, %17 : vector<256x128xf32>
      %c256_i32 = arith.constant 256 : i32
      %19 = arith.muli %arg0, %c256_i32 : i32
      %20 = tpu.assume_multiple %19, 256 : i32
      %21 = arith.index_cast %20 : i32 to index
      %c0_13 = arith.constant 0 : index
      %22 = vector.load %arg3[%21, %c0_13] : memref<512x128xbf16, #tpu.memory_space<vmem>>, vector<256x128xbf16>
      %23 = arith.extf %22 : vector<256x128xbf16> to vector<256x128xf32>
      %c0_14 = arith.constant 0 : index
      %c0_15 = arith.constant 0 : index
      %24 = vector.load %arg5[%c0_14, %c0_15] : memref<256x128xf32, #tpu.memory_space<vmem>>, vector<128x128xf32>
      %cst_16 = arith.constant dense<0.000000e+00> : vector<256x128xf32>
      %25 = tpu.matmul %18, %24, %cst_16 {dimension_numbers = #tpu.dot_dimension_numbers<[1], [0], [0], [1], [0, 0, 1, 1], [], []>} : vector<256x128xf32>, vector<128x128xf32>, vector<256x128xf32> -> vector<256x128xf32>
      %c128 = arith.constant 128 : index
      %c0_17 = arith.constant 0 : index
      %26 = vector.load %arg5[%c128, %c0_17] : memref<256x128xf32, #tpu.memory_space<vmem>>, vector<128x128xf32>
      %cst_18 = arith.constant dense<0.000000e+00> : vector<256x128xf32>
      %27 = tpu.matmul %23, %26, %cst_18 {dimension_numbers = #tpu.dot_dimension_numbers<[1], [0], [0], [1], [0, 0, 1, 1], [], []>} : vector<256x128xf32>, vector<128x128xf32>, vector<256x128xf32> -> vector<256x128xf32>
      %28 = arith.addf %25, %27 : vector<256x128xf32>
      %c0_19 = arith.constant 0 : index
      %c0_20 = arith.constant 0 : index
      %29 = vector.load %arg6[%c0_19, %c0_20] : memref<1x128xf32, #tpu.memory_space<vmem>>, vector<1x128xf32>
      %30 = vector.broadcast %29 : vector<1x128xf32> to vector<256x128xf32>
      %31 = arith.addf %28, %30 : vector<256x128xf32>
      %32 = tpu.iota {dimensions = array<i32: 1>} : vector<256x128xi32>
      %c4_i32 = arith.constant 4 : i32
      %33 = vector.broadcast %c4_i32 : i32 to vector<256x128xi32>
      %34 = arith.cmpi slt, %32, %33 : vector<256x128xi32>
      %cst_21 = arith.constant -1.000000e+30 : f32
      %35 = vector.broadcast %cst_21 : f32 to vector<256x128xf32>
      %36 = arith.select %34, %31, %35 : vector<256x128xi1>, vector<256x128xf32>
      %cst_22 = arith.constant dense<0xFF800000> : vector<256xf32>
      %37 = vector.multi_reduction <maximumf>, %36, %cst_22 [1] : vector<256x128xf32> to vector<256xf32>
      %38 = vector.shape_cast %37 : vector<256xf32> to vector<256x1xf32>
      %39 = vector.broadcast %38 : vector<256x1xf32> to vector<256x128xf32>
      %40 = arith.subf %36, %39 : vector<256x128xf32>
      %41 = math.exp %40 : vector<256x128xf32>
      %cst_23 = arith.constant dense<0.000000e+00> : vector<256xf32>
      %42 = vector.multi_reduction <add>, %41, %cst_23 [1] : vector<256x128xf32> to vector<256xf32>
      %43 = vector.shape_cast %42 : vector<256xf32> to vector<256x1xf32>
      %44 = math.log %43 : vector<256x1xf32>
      %45 = vector.broadcast %44 : vector<256x1xf32> to vector<256x128xf32>
      %46 = arith.subf %40, %45 : vector<256x128xf32>
      %c0_24 = arith.constant 0 : index
      %c0_25 = arith.constant 0 : index
      %47 = vector.load %arg7[%c0_24, %c0_25] : memref<256x128xf32, #tpu.memory_space<vmem>>, vector<256x128xf32>
      tpu.vector_store %arg7[%c0_24, %c0_25], %46 {strides = array<i32>} : memref<256x128xf32, #tpu.memory_space<vmem>>, vector<256x128xf32>,
    } else {
    }
    return
  }
  func.func @transform_0(%arg0: i32, %arg1: i32) -> (i32, i32) {
    %c0_i32 = arith.constant 0 : i32
    return %arg0, %arg1 : i32, i32
  }
  func.func @transform_1(%arg0: i32, %arg1: i32) -> (i32, i32) {
    %c0_i32 = arith.constant 0 : i32
    %c0_i32_0 = arith.constant 0 : i32
    %c0_i32_1 = arith.constant 0 : i32
    return %c0_i32, %c0_i32_0 : i32, i32
  }
  func.func @transform_2(%arg0: i32, %arg1: i32) -> (i32, i32) {
    %c0_i32 = arith.constant 0 : i32
    %c0_i32_0 = arith.constant 0 : i32
    return %arg0, %c0_i32 : i32, i32
  }
  func.func @transform_3(%arg0: i32, %arg1: i32) -> (i32, i32) {
    %c0_i32 = arith.constant 0 : i32
    %c0_i32_0 = arith.constant 0 : i32
    %c0_i32_1 = arith.constant 0 : i32
    return %c0_i32, %c0_i32_0 : i32, i32
  }
  func.func @transform_4(%arg0: i32, %arg1: i32) -> (i32, i32) {
    %c0_i32 = arith.constant 0 : i32
    %c0_i32_0 = arith.constant 0 : i32
    %c0_i32_1 = arith.constant 0 : i32
    return %c0_i32, %c0_i32_0 : i32, i32
  }
  func.func @transform_5(%arg0: i32, %arg1: i32) -> (i32, i32) {
    %c0_i32 = arith.constant 0 : i32
    %c0_i32_0 = arith.constant 0 : i32
    return %arg0, %c0_i32 : i32, i32
  }
}

</mosaic_0001>

<bundles_post_ra>
// kernel: graphsage_forward.2
= control target key start
LH: loop header
LB: loop body
LE: loop exit
PB: predicated region body
PF: predicated region fallthrough
CT: control target
= control target key end

     0   :  { %10 = vsyncpa [#allocation4], 0  ;;  %s3740_s18 = smov 0   ;;  %s3742_s19 = smov 0   ;;  %s4192_s0 = inlined_call_operand.vmem [shape: bf16[512,512], index: 0, kind: input, shape index: {}]   ;;  %s4193_s1 = inlined_call_operand.vmem [shape: bf16[512,128], index: 1, kind: input, shape index: {}]   ;;  %s4194_s2 = inlined_call_operand.vmem [shape: f32[512,1], index: 2, kind: input, shape index: {}]   ;;  %s4195_s3 = inlined_call_operand.hbm [shape: f32[256,128], index: 3, kind: input, shape index: {}]   ;;  %s4196_s4 = inlined_call_operand.vmem [shape: f32[1,128], index: 4, kind: input, shape index: {}]   ;;  %s4197_s5 = inlined_call_operand.vmem [shape: bf16[512,128], index: 5, kind: output, shape index: {}]  }
   0x1   :  { %s3744_s20 = smov 0  }
   0x2 LB: > { %s2536_s21 = sadd.s32 4294967295, %s3704_s20   ;;  %s28_s22 = sadd.s32 1, %s3700_s19  ;;  %s3704_s20 = sphi %s3744_s20, %s16_s20   ;;  %s3700_s19 = sphi %s3742_s19, %s4207_s19   ;;  %s3696_s18 = sphi %s3740_s18, %s4206_s18  }
   0x3   : > { %p30_p0 = scmp.ge.s32.totalorder %s28_s22, 2  ;;  %p2538_p1 = scmp.ge.s32.totalorder %s3704_s20, 1 }
   0x4   : > { %p176_p2 = scmp.lt.s32.totalorder %s3704_s20, 3  ;;  %p3765_p4 = scmp.eq.s32.totalorder %s2536_s21, 0 }
   0x5   : > { %s4209_s22 = smov (%p30_p0, %s28_s22), 0  ;;  %s3706_s25 = smov [#allocation3]  }
   0x6   : > { %p3761_p3 = pnand %p2538_p1, %p176_p2  ;;  %s191_s26 = sshll.u32 %s3706_s25, 4  ;;  %s192_s26 = int_to_ptr.vmem [resolvable:$true] %s191_s26 }
   0x7   : > { %s4202_s24 = scalar_select %p3765_p4, 1, 0 }
   0x8   : > { %s4201_s23 = scalar_select %p3761_p3, 1, 0 }
   0x9   : > { %p3486_p5 = pneg %p3761_p3  ;;  %s3650_s30 = scalar_lea.hbm %s4195_s3, 4096 }
   0xa   : > { %p3651_p7 = scmp.ne.s32.totalorder %s4195_s3, %s3650_s30  ;;  %p3657_p11 = scmp.lt.u32.totalorder %s3650_s30, %s4195_s3 }
   0xb   : > { %p3773_p6 = pnand %p3765_p4, %p3486_p5 }
   0xd   : > { %p3652_p8 = pneg %p3773_p6 }
   0xf   : > { %p3653_p9 = pnand %p3652_p8, %p3651_p7 }
  0x11   : > { %p3654_p10 = pneg %p3653_p9 }
  0x13   : > { %p3659_p12 = pnand %p3657_p11, %p3654_p10 }
  0x15   : > { %3662 = shalt.err (!%p3659_p12)
}
  0x16   : > { %s3663_s10 = scalar_lea.vmem %s192_s26, 4096  ;;  %p3671_p2 = scmp.lt.s32.totalorder %s192_s26, %s192_s26 }
  0x17   : > { %p3664_p13 = scmp.ne.s32.totalorder %s192_s26, %s3663_s10  ;;  %p3672_p5 = scmp.lt.s32.totalorder %s3663_s10, %s3663_s10 }
  0x19   : > { %p3666_p0 = pnand %p3664_p13, %p3652_p8  ;;  %p3673_p4 = por %p3672_p5, %p3671_p2 }
  0x1b   : > { %p3667_p1 = pneg %p3666_p0 }
  0x1d   : > { %p3674_p3 = pnand %p3673_p4, %p3667_p1 }
  0x1f   : > { %3677 = shalt.err (!%p3674_p3)
}
  0x20   : > { %s3707_s11 = smov 128   ;;  %s3708_s12 = smov 8  }
  0x21   : > { %3489 = dma.hbm_to_vmem [thread:$0]  (!%p3773_p6), %s4195_s3, 4096, %s192_s26, [#allocation4], %s3707_s11, %s3707_s11, %s3708_s12  }
  0x22   : > { %p4204_p7 = scmp.ne.s32.totalorder %s4201_s23, 0 }
  0x23   : > { %p4205_p9 = scmp.ne.s32.totalorder (!%p4204_p7), %s4202_s24, 0 }
  0x24   : > { %234 = sbr.rel (%p4204_p7) target bundleno = 702 (0x2be), region = 40 }
  0x2b   : > { %3691 = dma.done.wait (%p4205_p9), [#allocation4], 4096  }
  0x2c   : > { %3693 = vsyncadd (%p4205_p9), [#allocation4], 4294963200  ;;  %v3522_v0 = vld [vmem:[%s4193_s1 + $0x40] sm:$0xff]   ;;  %s2543_s17 = sshll.u32 %s3696_s18, 5  ;;  %v3524_v2 = vld [vmem:[%s4193_s1 + $0x48] sm:$0xff]   ;;  %v3709_v41 = vmov 0  }
  0x2d   : > { %v3523_v1 = vld [vmem:[%s4193_s1] sm:$0xff]   ;;  %3434 = vmatprep.subr.bf16.mxu1 %v3522_v0  ;;  %2890 = vmatprep.subr.bf16.mxu0 %v3522_v0  ;;  %v3525_v3 = vld [vmem:[%s4193_s1 + $0x8] sm:$0xff]   ;;  %p274_p3 = scmp.lt.s32.totalorder %s2543_s17, 63  ;;  %v3526_v4 = vld [vmem:[%s4193_s1 + $0x50] sm:$0xff]   ;;  %s2646_s9 = sshll.u32 %s3696_s18, 8 }
  0x2e   : > { %3442 = vmatpush3.bf16.msra.mxu1 %v3523_v1  ;;  %2891 = vmatpush3.bf16.msra.mxu0 %v3523_v1  ;;  %v3527_v5 = vld [vmem:[%s4193_s1 + $0x10] sm:$0xff]   ;;  %v3528_v6 = vld [vmem:[%s4193_s1 + $0x58] sm:$0xff]   ;;  %v3530_v8 = vld [vmem:[%s4193_s1 + $0x60] sm:$0xff]   ;;  %s1656_s10 = sshra.s32 %s2646_s9, 3 }
  0x2f   : > { %3435 = vmatprep.subr.bf16.mxu1 %v3524_v2  ;;  %2892 = vmatprep.subr.bf16.mxu0 %v3524_v2  ;;  %s4211_s17 = smov (!%p274_p3, %s2543_s17), 63  ;;  %v3529_v7 = vld [vmem:[%s4193_s1 + $0x18] sm:$0xff]   ;;  %v3531_v9 = vld [vmem:[%s4193_s1 + $0x20] sm:$0xff]   ;;  %v3532_v10 = vld [vmem:[%s4193_s1 + $0x68] sm:$0xff]  }
  0x30   : > { %s2683_s11 = sshll.u32 %s4211_s17, 4  ;;  %v3533_v12 = vld [vmem:[%s4193_s1 + $0x28] sm:$0xff]   ;;  %v3534_v13 = vld [vmem:[%s4193_s1 + $0x70] sm:$0xff]   ;;  %v3536_v15 = vld [vmem:[%s4193_s1 + $0x78] sm:$0xff]   ;;  %3520 = vset.pattern.permute.xlu0 %v3709_v41  ;;  %3521 = vset.pattern.permute.xlu1 %v3709_v41  ;;  %s2547_s30 = sshll.u32 %s4211_s17, 3 }
  0x31   : > { %s3833_s16 = scalar_lea.vmem %s4192_s0, %s2683_s11  ;;  %v3535_v14 = vld [vmem:[%s4193_s1 + $0x30] sm:$0xff]   ;;  %v3537_v16 = vld [vmem:[%s4193_s1 + $0x38] sm:$0xff]   ;;  %v3541_v17 = vld [vmem:[%s4193_s1 + $0xc0] sm:$0xff]   ;;  %s3926_s8 = scalar_lea.vmem %s4194_s2, %s2547_s30 }
  0x32   : > { %3443 = vmatpush3.bf16.msra.mxu1 %v3525_v3  ;;  %2893 = vmatpush3.bf16.msra.mxu0 %v3525_v3  ;;  %v3540_v11 = vld [vmem:[%s3833_s16 + $0x104] ss:$16 sps:$4 sm:$0xff]   ;;  %v3538_v18 = vld [vmem:[%s3833_s16 + $0x100] ss:$16 sps:$4 sm:$0xff]   ;;  %v3546_v21 = vld [vmem:[%s4193_s1 + $0xc8] sm:$0xff]   ;;  %s2647_s11 = sshll.u32 %s1656_s10, 2 }
  0x33   : > { %3436 = vmatprep.subr.bf16.mxu1 %v3526_v4  ;;  %2894 = vmatprep.subr.bf16.mxu0 %v3526_v4  ;;  %v3542_v19 = vld [vmem:[%s4193_s1 + $0x80] sm:$0xff]   ;;  %v3547_v22 = vld [vmem:[%s4193_s1 + $0x88] sm:$0xff]   ;;  %v3551_v23 = vld [vmem:[%s4193_s1 + $0xd0] sm:$0xff]   ;;  %s3984_s14 = scalar_lea.vmem %s4193_s1, %s2647_s11  ;;  %s2549_s15 = sshll.u32 %s4211_s17, 2 }
  0x34   : > { %1106 = vmatprep.mubr.bf16.mxu1 %v3540_v11  ;;  %v3543_v20 = vld [vmem:[%s3833_s16 + $0x124] ss:$16 sps:$4 sm:$0xff]   ;;  %v3545_v24 = vld [vmem:[%s3833_s16 + $0x120] ss:$16 sps:$4 sm:$0xff]   ;;  %v3556_v27 = vld [vmem:[%s4193_s1 + $0xd8] sm:$0xff]   ;;  %s4135_s26 = scalar_lea.vmem %s4197_s5, %s2549_s15 }
  0x35   : > { %v3548_v25 = vld [vmem:[%s3833_s16 + $0x144] ss:$16 sps:$4 sm:$0xff]   ;;  %v3557_v28 = vld [vmem:[%s4193_s1 + $0x98] sm:$0xff]   ;;  %v3578_v29 = vld [vmem:[%s3833_s16] ss:$16 sps:$4 sm:$0xff]  }
  0x36   : > { %3444 = vmatpush3.bf16.msra.mxu1 %v3527_v5  ;;  %2895 = vmatpush3.bf16.msra.mxu0 %v3527_v5  ;;  %v3552_v26 = vld [vmem:[%s4193_s1 + $0x90] sm:$0xff]   ;;  %v3561_v31 = vld [vmem:[%s4193_s1 + $0xe0] sm:$0xff]   ;;  %v3566_v36 = vld [vmem:[%s4193_s1 + $0xe8] sm:$0xff]  }
  0x37   : > { %3437 = vmatprep.subr.bf16.mxu1 %v3528_v6  ;;  %2896 = vmatprep.subr.bf16.mxu0 %v3528_v6  ;;  %v3580_v30 = vld [vmem:[%s3833_s16 + $0x4] ss:$16 sps:$4 sm:$0xff]   ;;  %v3550_v32 = vld [vmem:[%s3833_s16 + $0x140] ss:$16 sps:$4 sm:$0xff]   ;;  %v3567_v37 = vld [vmem:[%s4193_s1 + $0xa8] sm:$0xff]  }
  0x38   : > { %1042 = vmatprep.mubr.bf16.mxu0 %v3580_v30  ;;  %v3584_v33 = vld [vmem:[%s3833_s16 + $0x24] ss:$16 sps:$4 sm:$0xff]   ;;  %v3588_v38 = vld [vmem:[%s3833_s16 + $0x20] ss:$16 sps:$4 sm:$0xff]   ;;  %v3576_v45 = vld [vmem:[%s4193_s1 + $0xf8] sm:$0xff]  }
  0x39   : > { %v3553_v34 = vld [vmem:[%s3833_s16 + $0x164] ss:$16 sps:$4 sm:$0xff]   ;;  %v3555_v42 = vld [vmem:[%s3833_s16 + $0x160] ss:$16 sps:$4 sm:$0xff]   ;;  %v3577_v46 = vld [vmem:[%s4193_s1 + $0xb8] sm:$0xff]  }
  0x3a   : > { %3445 = vmatpush3.bf16.msra.mxu1 %v3529_v7  ;;  %2897 = vmatpush3.bf16.msra.mxu0 %v3529_v7  ;;  %v3562_v35 = vld [vmem:[%s4193_s1 + $0xa0] sm:$0xff]   ;;  %v3571_v40 = vld [vmem:[%s4193_s1 + $0xf0] sm:$0xff]   ;;  %v1432_v55 = vld [vmem:[%s3926_s8 + $0x8] sm:$0xff] }
  0x3b   : > { %3438 = vmatprep.subr.bf16.mxu1 %v3530_v8  ;;  %2898 = vmatprep.subr.bf16.mxu0 %v3530_v8  ;;  %v3590_v39 = vld [vmem:[%s3833_s16 + $0x44] ss:$16 sps:$4 sm:$0xff]   ;;  %v3594_v47 = vld [vmem:[%s3833_s16 + $0x40] ss:$16 sps:$4 sm:$0xff]   ;;  %v1434_v58 = vld [vmem:[%s3926_s8 + $0x18] sm:$0xff] }
  0x3c   : > { %v3558_v43 = vld [vmem:[%s3833_s16 + $0x184] ss:$16 sps:$4 sm:$0xff]   ;;  %v3560_v49 = vld [vmem:[%s3833_s16 + $0x180] ss:$16 sps:$4 sm:$0xff]   ;;  %v1436_v62 = vld [vmem:[%s3926_s8 + $0x28] sm:$0xff] }
  0x3d   : > { %v3572_v44 = vld [vmem:[%s4193_s1 + $0xb0] sm:$0xff]   ;;  %v1431_v53 = vld [vmem:[%s3926_s8] sm:$0xff]  ;;  %v1438_v2 = vld [vmem:[%s3926_s8 + $0x38] sm:$0xff] }
  0x3e   : > { %3446 = vmatpush3.bf16.msra.mxu1 %v3531_v9  ;;  %2899 = vmatpush3.bf16.msra.mxu0 %v3531_v9  ;;  %v3596_v48 = vld [vmem:[%s3833_s16 + $0x64] ss:$16 sps:$4 sm:$0xff]   ;;  %v3600_v51 = vld [vmem:[%s3833_s16 + $0x60] ss:$16 sps:$4 sm:$0xff]   ;;  %v1440_v6 = vld [vmem:[%s3926_s8 + $0x48] sm:$0xff] }
  0x3f   : > { %3439 = vmatprep.subr.bf16.mxu1 %v3532_v10  ;;  %2900 = vmatprep.subr.bf16.mxu0 %v3532_v10  ;;  %v3563_v50 = vld [vmem:[%s3833_s16 + $0x1a4] ss:$16 sps:$4 sm:$0xff]   ;;  %v3565_v54 = vld [vmem:[%s3833_s16 + $0x1a0] ss:$16 sps:$4 sm:$0xff]   ;;  %v3583_v9 = vld [vmem:[%s3833_s16 + $0xc] ss:$16 sps:$4 sm:$0xff]  }
  0x40   : > { %v3602_v52 = vld [vmem:[%s3833_s16 + $0x84] ss:$16 sps:$4 sm:$0xff]   ;;  %1465 = vperm.xlu0 %3520, %v1431_v53   ;;  %v3606_v59 = vld [vmem:[%s3833_s16 + $0x80] ss:$16 sps:$4 sm:$0xff]   ;;  %v1442_v10 = vld [vmem:[%s3926_s8 + $0x58] sm:$0xff] }
  0x41   : > { %v1433_v56 = vld [vmem:[%s3926_s8 + $0x10] sm:$0xff]  ;;  %v1435_v60 = vld [vmem:[%s3926_s8 + $0x20] sm:$0xff]  ;;  %v1753_v53 = vld [vmem:[#allocation3 + $0xe8] sm:$0xff] }
  0x42   : > { %3447 = vmatpush3.bf16.msra.mxu1 %v3533_v12  ;;  %2901 = vmatpush3.bf16.msra.mxu0 %v3533_v12  ;;  %v3568_v57 = vld [vmem:[%s3833_s16 + $0x1c4] ss:$16 sps:$4 sm:$0xff]   ;;  %v3570_v63 = vld [vmem:[%s3833_s16 + $0x1c0] ss:$16 sps:$4 sm:$0xff]  }
  0x43   : > { %3440 = vmatprep.subr.bf16.mxu1 %v3534_v13  ;;  %2902 = vmatprep.subr.bf16.mxu0 %v3534_v13  ;;  %v3608_v61 = vld [vmem:[%s3833_s16 + $0xa4] ss:$16 sps:$4 sm:$0xff]   ;;  %v3612_v3 = vld [vmem:[%s3833_s16 + $0xa0] ss:$16 sps:$4 sm:$0xff]  }
  0x44   : > { %1475 = vperm.xlu1 %3521, %v1433_v56   ;;  %1470 = vperm.xlu0 %3520, %v1432_v55   ;;  %v1437_v0 = vld [vmem:[%s3926_s8 + $0x30] sm:$0xff]  ;;  %v1439_v4 = vld [vmem:[%s3926_s8 + $0x40] sm:$0xff] }
  0x45   : > { %v3573_v1 = vld [vmem:[%s3833_s16 + $0x1e4] ss:$16 sps:$4 sm:$0xff]   ;;  %v3575_v7 = vld [vmem:[%s3833_s16 + $0x1e0] ss:$16 sps:$4 sm:$0xff]  }
  0x46   : > { %3448 = vmatpush3.bf16.msra.mxu1 %v3535_v14  ;;  %2903 = vmatpush3.bf16.msra.mxu0 %v3535_v14  ;;  %v3614_v5 = vld [vmem:[%s3833_s16 + $0xc4] ss:$16 sps:$4 sm:$0xff]   ;;  %v3618_v11 = vld [vmem:[%s3833_s16 + $0xc0] ss:$16 sps:$4 sm:$0xff]  }
  0x47   : > { %3441 = vmatprep.subr.bf16.mxu1 %v3536_v15  ;;  %2904 = vmatprep.subr.bf16.mxu0 %v3536_v15  ;;  %v1441_v8 = vld [vmem:[%s3926_s8 + $0x50] sm:$0xff]  ;;  %v1443_v12 = vld [vmem:[%s3926_s8 + $0x60] sm:$0xff]  ;;  %v1741_v15 = vld [vmem:[#allocation3 + $0x88] sm:$0xff] }
  0x48   : > { %1480 = vperm.xlu1 %3521, %v1434_v58   ;;  %1485 = vperm.xlu0 %3520, %v1435_v60   ;;  %v1740_v13 = vld [vmem:[#allocation3 + $0x80] sm:$0xff]  ;;  %v1746_v30 = vld [vmem:[#allocation3 + $0xb0] sm:$0xff]  ;;  %v1458_v58 = vld [vmem:[%s3926_s8 + $0xd8] sm:$0xff] }
  0x49   : > { %v3620_v14 = vld [vmem:[%s3833_s16 + $0xe4] ss:$16 sps:$4 sm:$0xff]   ;;  %v1755_v60 = vld [vmem:[#allocation3 + $0xf8] sm:$0xff] }
  0x4a   : > { %3449 = vmatpush3.bf16.msra.mxu1 %v3537_v16  ;;  %2905 = vmatpush3.bf16.msra.mxu0 %v3537_v16  ;;  %v1444_v16 = vld [vmem:[%s3926_s8 + $0x68] sm:$0xff]  ;;  %v1451_v41 = vld [vmem:[%s3926_s8 + $0xa0] sm:$0xff]  ;;  %v1457_v55 = vld [vmem:[%s3926_s8 + $0xd0] sm:$0xff] }
  0x4b   : > { %3002 = vmatprep.subr.bf16.mxu1 %v3541_v17  ;;  %v3370_v17 = vpack.c.bf16 %v1741_v15, %v1740_v13  ;;  %v3613_v13 = vld [vmem:[%s3833_s16 + $0xa8] ss:$16 sps:$4 sm:$0xff]  }
  0x4c   : > { %1490 = vperm.xlu1 %3521, %v1436_v62   ;;  %1495 = vperm.xlu0 %3520, %v1437_v0   ;;  %v1459_v62 = vld [vmem:[%s3926_s8 + $0xe0] sm:$0xff]  ;;  %v1460_v0 = vld [vmem:[%s3926_s8 + $0xe8] sm:$0xff]  ;;  %v2862_v15 = vld [vmem:[%s3984_s14 + $0x18] sm:$0xff]  }
  0x4d   : > { %1107 = vmatmul.mubr.bf16.vlgmr.msra.gmra.mrb[0].mxu1 %v3538_v18  ;;  %1043 = vmatmul.mubr.bf16.vlgmr.msra.gmra.mrb[0].mxu0 %v3578_v29  ;;  %v1742_v18 = vld [vmem:[#allocation3 + $0x90] sm:$0xff]  ;;  %v1447_v29 = vld [vmem:[%s3926_s8 + $0x80] sm:$0xff] }
  0x4e   : > { %3003 = vmatpush3.bf16.msra.mxu1 %v3542_v19  ;;  %1114 = vmatprep.mubr.bf16.mxu1 %v3543_v20  ;;  %v1743_v19 = vld [vmem:[#allocation3 + $0x98] sm:$0xff] }
  0x4f   : > { %3004 = vmatprep.subr.bf16.mxu1 %v3546_v21  ;;  %1050 = vmatprep.mubr.bf16.mxu0 %v3584_v33  ;;  %v3581_v20 = vld [vmem:[%s3833_s16 + $0x8] ss:$16 sps:$4 sm:$0xff]   ;;  %v3374_v21 = vpack.c.bf16 %v1743_v19, %v1742_v18  ;;  %v2863_v18 = vld [vmem:[%s3984_s14 + $0x20] sm:$0xff]  }
  0x50   : > { %1500 = vperm.xlu1 %3521, %v1438_v2   ;;  %1505 = vperm.xlu0 %3520, %v1439_v4   ;;  %v3589_v33 = vld [vmem:[%s3833_s16 + $0x28] ss:$16 sps:$4 sm:$0xff]   ;;  %v1461_v4 = vld [vmem:[%s3926_s8 + $0xf0] sm:$0xff]  ;;  %v2734_v19 = vunpack.c.l.bf16 %v2863_v18 }
  0x51   : > { %3371 = vmatprep.subr.bf16.mxu0 %v3370_v17 }
  0x52   : > { %3005 = vmatpush3.bf16.msra.mxu1 %v3547_v22  ;;  %v1445_v22 = vld [vmem:[%s3926_s8 + $0x70] sm:$0xff]  ;;  %3373 = vmatpush3.bf16.msra.mxu0 %v3370_v17  ;;  %v2731_v17 = vunpack.c.h.bf16 %v2862_v15 }
  0x53   : > { %3006 = vmatprep.subr.bf16.mxu1 %v3551_v23  ;;  %v1744_v23 = vld [vmem:[#allocation3 + $0xa0] sm:$0xff]  ;;  %3375 = vmatprep.subr.bf16.mxu0 %v3374_v21 }
  0x54   : > { %1510 = vperm.xlu1 %3521, %v1440_v6   ;;  %1515 = vperm.xlu0 %3520, %v1441_v8   ;;  %v2860_v6 = vld [vmem:[%s3984_s14 + $0x8] sm:$0xff]  }
  0x55   : > { %1115 = vmatmul.mubr.bf16.gmra.mrb[4].mxu1 %v3545_v24  ;;  %1051 = vmatmul.mubr.bf16.gmra.mrb[4].mxu0 %v3588_v38  ;;  %v1745_v24 = vld [vmem:[#allocation3 + $0xa8] sm:$0xff]  ;;  %v2722_v8 = vunpack.c.l.bf16 %v2860_v6 }
  0x56   : > { %1122 = vmatprep.mubr.bf16.mxu1 %v3548_v25  ;;  %3007 = vmatpush3.bf16.msra.mxu1 %v3552_v26  ;;  %v3586_v25 = vld [vmem:[%s3833_s16 + $0x2c] ss:$16 sps:$4 sm:$0xff]  }
  0x57   : > { %3008 = vmatprep.subr.bf16.mxu1 %v3556_v27  ;;  %1058 = vmatprep.mubr.bf16.mxu0 %v3590_v39  ;;  %v1446_v26 = vld [vmem:[%s3926_s8 + $0x78] sm:$0xff]  ;;  %v3624_v27 = vld [vmem:[%s3833_s16 + $0xe0] ss:$16 sps:$4 sm:$0xff]  }
  0x58   : > { %1520 = vperm.xlu1 %3521, %v1442_v10   ;;  %1525 = vperm.xlu0 %3520, %v1443_v12   ;;  %v3592_v38 = vld [vmem:[%s3833_s16 + $0x4c] ss:$16 sps:$4 sm:$0xff]   ;;  %v2861_v10 = vld [vmem:[%s3984_s14 + $0x10] sm:$0xff]  }
  0x59   : > { %3377 = vmatpush3.bf16.msra.mxu0 %v3374_v21  ;;  %v1450_v39 = vld [vmem:[%s3926_s8 + $0x98] sm:$0xff]  ;;  %v2727_v12 = vunpack.c.h.bf16 %v2861_v10 }
  0x5a   : > { %3009 = vmatpush3.bf16.msra.mxu1 %v3557_v28  ;;  %v3378_v28 = vpack.c.bf16 %v1745_v24, %v1744_v23  ;;  %v3619_v21 = vld [vmem:[%s3833_s16 + $0xc8] ss:$16 sps:$4 sm:$0xff]  }
  0x5b   : > { %3010 = vmatprep.subr.bf16.mxu1 %v3561_v31  ;;  %v1747_v31 = vld [vmem:[#allocation3 + $0xb8] sm:$0xff]  ;;  %v2864_v23 = vld [vmem:[%s3984_s14 + $0x28] sm:$0xff]  }
  0x5c   : > { %1530 = vperm.xlu1 %3521, %v1444_v16   ;;  %1535 = vperm.xlu0 %3520, %v1445_v22   ;;  %v2730_v16 = vunpack.c.l.bf16 %v2862_v15  ;;  %v3622_v22 = vld [vmem:[%s3833_s16 + $0xec] ss:$16 sps:$4 sm:$0xff]   ;;  %v2738_v24 = vunpack.c.l.bf16 %v2864_v23 }
  0x5d   : > { %1123 = vmatmul.mubr.bf16.gmra.mrb[8].mxu1 %v3550_v32  ;;  %1059 = vmatmul.mubr.bf16.gmra.mrb[8].mxu0 %v3594_v47  ;;  %v1448_v32 = vld [vmem:[%s3926_s8 + $0x88] sm:$0xff]  ;;  %v1453_v47 = vld [vmem:[%s3926_s8 + $0xb0] sm:$0xff] }
  0x5e   : > { %1130 = vmatprep.mubr.bf16.mxu1 %v3553_v34  ;;  %3011 = vmatpush3.bf16.msra.mxu1 %v3562_v35  ;;  %v3382_v34 = vpack.c.bf16 %v1747_v31, %v1746_v30  ;;  %v1449_v35 = vld [vmem:[%s3926_s8 + $0x90] sm:$0xff]  ;;  %v3626_v30 = vld [vmem:[%s3833_s16 + $0x10c] ss:$16 sps:$4 sm:$0xff]  }
  0x5f   : > { %3012 = vmatprep.subr.bf16.mxu1 %v3566_v36  ;;  %1066 = vmatprep.mubr.bf16.mxu0 %v3596_v48  ;;  %v1748_v36 = vld [vmem:[#allocation3 + $0xc0] sm:$0xff]  ;;  %v3598_v48 = vld [vmem:[%s3833_s16 + $0x6c] ss:$16 sps:$4 sm:$0xff]  }
  0x60   : > { %1540 = vperm.xlu1 %3521, %v1446_v26   ;;  %1545 = vperm.xlu0 %3520, %v1447_v29   ;;  %v2865_v26 = vld [vmem:[%s3984_s14 + $0x30] sm:$0xff]   ;;  %v3625_v29 = vld [vmem:[%s3833_s16 + $0xe8] ss:$16 sps:$4 sm:$0xff]  }
  0x61   : > { %3379 = vmatprep.subr.bf16.mxu0 %v3378_v28  ;;  %v2866_v31 = vld [vmem:[%s3984_s14 + $0x38] sm:$0xff]   ;;  %v1737_v15 = vld [vmem:[#allocation3 + $0x68] sm:$0xff] }
  0x62   : > { %3013 = vmatpush3.bf16.msra.mxu1 %v3567_v37  ;;  %v1749_v37 = vld [vmem:[#allocation3 + $0xc8] sm:$0xff]  ;;  %3381 = vmatpush3.bf16.msra.mxu0 %v3378_v28  ;;  %v2743_v28 = vunpack.c.h.bf16 %v2865_v26 }
  0x63   : > { %3014 = vmatprep.subr.bf16.mxu1 %v3571_v40  ;;  %3383 = vmatprep.subr.bf16.mxu0 %v3382_v34  ;;  %v3386_v40 = vpack.c.bf16 %v1749_v37, %v1748_v36  ;;  %v1724_v36 = vld [vmem:[#allocation3] sm:$0xff]  ;;  %v1725_v37 = vld [vmem:[#allocation3 + $0x8] sm:$0xff] }
  0x64   : > { %1550 = vperm.xlu1 %3521, %v1448_v32   ;;  %1555 = vperm.xlu0 %3520, %v1449_v35   ;;  %v2746_v32 = vunpack.c.l.bf16 %v2866_v31 }
  0x65   : > { %1131 = vmatmul.mubr.bf16.gmra.mrb[12].mxu1 %v3555_v42  ;;  %1067 = vmatmul.mubr.bf16.gmra.mrb[12].mxu0 %v3600_v51  ;;  %v1750_v42 = vld [vmem:[#allocation3 + $0xd0] sm:$0xff]  ;;  %v1456_v51 = vld [vmem:[%s3926_s8 + $0xc8] sm:$0xff] }
  0x66   : > { %1138 = vmatprep.mubr.bf16.mxu1 %v3558_v43  ;;  %3015 = vmatpush3.bf16.msra.mxu1 %v3572_v44  ;;  %v1751_v43 = vld [vmem:[#allocation3 + $0xd8] sm:$0xff]  ;;  %v1452_v44 = vld [vmem:[%s3926_s8 + $0xa8] sm:$0xff] }
  0x67   : > { %3016 = vmatprep.subr.bf16.mxu1 %v3576_v45  ;;  %1074 = vmatprep.mubr.bf16.mxu0 %v3602_v52  ;;  %v3390_v45 = vpack.c.bf16 %v1751_v43, %v1750_v42  ;;  %v1752_v52 = vld [vmem:[#allocation3 + $0xe0] sm:$0xff]  ;;  %v2868_v42 = vld [vmem:[%s3984_s14 + $0x48] sm:$0xff]  }
  0x68   : > { %1560 = vperm.xlu1 %3521, %v1450_v39   ;;  %3385 = vmatpush3.bf16.msra.mxu0 %v3382_v34  ;;  %v3394_v56 = vpack.c.bf16 %v1753_v53, %v1752_v52  ;;  %v2867_v34 = vld [vmem:[%s3984_s14 + $0x40] sm:$0xff]   ;;  %v3402_v39 = vpack.c.bf16 %v1725_v37, %v1724_v36  ;;  %v2754_v43 = vunpack.c.l.bf16 %v2868_v42 }
  0x69   : > { %1565 = vperm.xlu0 %3520, %v1451_v41   ;;  %3387 = vmatprep.subr.bf16.mxu0 %v3386_v40  ;;  %v2750_v35 = vunpack.c.l.bf16 %v2867_v34  ;;  %v3629_v41 = vld [vmem:[%s3833_s16 + $0x12c] ss:$16 sps:$4 sm:$0xff]  }
  0x6a   : > { %3017 = vmatpush3.bf16.msra.mxu1 %v3577_v46  ;;  %v3595_v46 = vld [vmem:[%s3833_s16 + $0x48] ss:$16 sps:$4 sm:$0xff]  }
  0x6c   : > { %1570 = vperm.xlu1 %3521, %v1452_v44   ;;  %3389 = vmatpush3.bf16.msra.mxu0 %v3386_v40  ;;  %v3628_v40 = vld [vmem:[%s3833_s16 + $0x108] ss:$16 sps:$4 sm:$0xff]   ;;  %v1726_v44 = vld [vmem:[#allocation3 + $0x10] sm:$0xff] }
  0x6d   : > { %1139 = vmatmul.mubr.bf16.gmra.mrb[16].mxu1 %v3560_v49  ;;  %1075 = vmatmul.mubr.bf16.gmra.mrb[16].mxu0 %v3606_v59  ;;  %v1454_v49 = vld [vmem:[%s3926_s8 + $0xb8] sm:$0xff]  ;;  %v1754_v59 = vld [vmem:[#allocation3 + $0xf0] sm:$0xff] }
  0x6e   : > { %1146 = vmatprep.mubr.bf16.mxu1 %v3563_v50  ;;  %1082 = vmatprep.mubr.bf16.mxu0 %v3608_v61  ;;  %v1455_v50 = vld [vmem:[%s3926_s8 + $0xc0] sm:$0xff]  ;;  %v3398_v61 = vpack.c.bf16 %v1755_v60, %v1754_v59  ;;  %v1731_v59 = vld [vmem:[#allocation3 + $0x38] sm:$0xff] }
  0x6f   : > { %1575 = vperm.xlu0 %3520, %v1453_v47   ;;  %3391 = vmatprep.subr.bf16.mxu0 %v3390_v45 }
  0x70   : > { %1580 = vperm.xlu1 %3521, %v1454_v49   ;;  %3393 = vmatpush3.bf16.msra.mxu0 %v3390_v45  ;;  %v1727_v45 = vld [vmem:[#allocation3 + $0x18] sm:$0xff] }
  0x71   : > { %3395 = vmatprep.subr.bf16.mxu0 %v3394_v56  ;;  %v3406_v47 = vpack.c.bf16 %v1727_v45, %v1726_v44 }
  0x73   : > { %1585 = vperm.xlu0 %3520, %v1455_v50   ;;  %v1728_v50 = vld [vmem:[#allocation3 + $0x20] sm:$0xff] }
  0x74   : > { %1590 = vperm.xlu1 %3521, %v1456_v51   ;;  %3397 = vmatpush3.bf16.msra.mxu0 %v3394_v56  ;;  %v1729_v51 = vld [vmem:[#allocation3 + $0x28] sm:$0xff]  ;;  %v2870_v56 = vld [vmem:[%s3984_s14 + $0x58] sm:$0xff]  }
  0x75   : > { %1147 = vmatmul.mubr.bf16.gmra.mrb[20].mxu1 %v3565_v54  ;;  %1083 = vmatmul.mubr.bf16.gmra.mrb[20].mxu0 %v3612_v3  ;;  %v3601_v54 = vld [vmem:[%s3833_s16 + $0x68] ss:$16 sps:$4 sm:$0xff]   ;;  %v3410_v53 = vpack.c.bf16 %v1729_v51, %v1728_v50  ;;  %v2763_v60 = vunpack.c.h.bf16 %v2870_v56 }
  0x76   : > { %1154 = vmatprep.mubr.bf16.mxu1 %v3568_v57  ;;  %1090 = vmatprep.mubr.bf16.mxu0 %v3614_v5  ;;  %v3604_v57 = vld [vmem:[%s3833_s16 + $0x8c] ss:$16 sps:$4 sm:$0xff]   ;;  %v3607_v3 = vld [vmem:[%s3833_s16 + $0x88] ss:$16 sps:$4 sm:$0xff]  }
  0x77   : > { %1595 = vperm.xlu0 %3520, %v1457_v55   ;;  %3399 = vmatprep.subr.bf16.mxu0 %v3398_v61  ;;  %v3610_v5 = vld [vmem:[%s3833_s16 + $0xac] ss:$16 sps:$4 sm:$0xff]  }
  0x78   : > { %1600 = vperm.xlu1 %3521, %v1458_v58   ;;  %3401 = vmatpush3.bf16.msra.mxu0 %v3398_v61  ;;  %v3632_v55 = vld [vmem:[%s3833_s16 + $0x14c] ss:$16 sps:$4 sm:$0xff]   ;;  %v1730_v58 = vld [vmem:[#allocation3 + $0x30] sm:$0xff] }
  0x79   : > { %3403 = vmatprep.subr.bf16.mxu0 %v3402_v39  ;;  %v3414_v61 = vpack.c.bf16 %v1731_v59, %v1730_v58 }
  0x7b   : > { %1605 = vperm.xlu0 %3520, %v1459_v62   ;;  %v2871_v62 = vld [vmem:[%s3984_s14 + $0x60] sm:$0xff]  }
  0x7c   : > { %1610 = vperm.xlu1 %3521, %v1460_v0   ;;  %v1732_v0 = vld [vmem:[#allocation3 + $0x40] sm:$0xff] }
  0x7d   : > { %1155 = vmatmul.mubr.bf16.gmra.mrb[24].mxu1 %v3570_v63  ;;  %1091 = vmatmul.mubr.bf16.gmra.mrb[24].mxu0 %v3618_v11  ;;  %v2717_v63 = vld [vmem:[%s3984_s14] sm:$0xff]   ;;  %v2726_v11 = vunpack.c.l.bf16 %v2861_v10 }
  0x7e   : > { %1162 = vmatprep.mubr.bf16.mxu1 %v3573_v1  ;;  %1098 = vmatprep.mubr.bf16.mxu0 %v3620_v14  ;;  %v2718_v1 = vunpack.c.l.bf16 %v2717_v63  ;;  %v2719_v2 = vunpack.c.h.bf16 %v2717_v63  ;;  %v3616_v14 = vld [vmem:[%s3833_s16 + $0xcc] ss:$16 sps:$4 sm:$0xff]   ;;  %v2766_v63 = vunpack.c.l.bf16 %v2871_v62 }
  0x7f   : > { %1615 = vperm.xlu0 %3520, %v1461_v4   ;;  %v3634_v4 = vld [vmem:[%s3833_s16 + $0x148] ss:$16 sps:$4 sm:$0xff]  }
  0x85   : > { %1163 = vmatmul.mubr.bf16.gmra.mrb[28].mxu1 %v3575_v7  ;;  %1099 = vmatmul.mubr.bf16.gmra.mrb[28].mxu0 %v3624_v27  ;;  %v1462_v7 = vld [vmem:[%s3926_s8 + $0xf8] sm:$0xff]  ;;  %v2742_v27 = vunpack.c.l.bf16 %v2865_v26 }
  0x86   : > { %1203 = vmatprep.mubr.bf16.mxu1 %v3583_v9  ;;  %3242 = vmatprep.mubr.f32.mxu0 %v2718_v1  ;;  %v2723_v9 = vunpack.c.h.bf16 %v2860_v6  ;;  %v1733_v1 = vld [vmem:[#allocation3 + $0x48] sm:$0xff] }
  0x87   : > { %1620 = vperm.xlu1 %3521, %v1462_v7   ;;  %v2872_v6 = vld [vmem:[%s3984_s14 + $0x68] sm:$0xff]  }
  0x88   : > { %v2770_v7 = vunpack.c.l.bf16 %v2872_v6  ;;  %v2771_v10 = vunpack.c.h.bf16 %v2872_v6  ;;  %v3640_v26 = vld [vmem:[%s3833_s16 + $0x188] ss:$16 sps:$4 sm:$0xff]  }
  0x8d   : > { %1204 = vmatmul.mubr.bf16.vlgmr.msra.gmra.mrb[32].mxu1 %v3581_v20  ;;  %3243 = vmatmul.mubr.f32.vlgmr.msra.gmra.mrb[32].mxu0 %v2719_v2  ;;  %v2735_v20 = vunpack.c.h.bf16 %v2863_v18  ;;  %v2767_v2 = vunpack.c.h.bf16 %v2871_v62  ;;  %v3637_v18 = vld [vmem:[%s3833_s16 + $0x168] ss:$16 sps:$4 sm:$0xff]  }
  0x8e   : > { %1211 = vmatprep.mubr.bf16.mxu1 %v3586_v25  ;;  %3245 = vmatprep.mubr.f32.mxu0 %v2722_v8  ;;  %v2739_v25 = vunpack.c.h.bf16 %v2864_v23  ;;  %v1734_v8 = vld [vmem:[#allocation3 + $0x50] sm:$0xff]  ;;  %v1739_v23 = vld [vmem:[#allocation3 + $0x78] sm:$0xff] }
  0x8f   : > { %3405 = vmatpush3.bf16.msra.mxu0 %v3402_v39 }
  0x90   : > { %3407 = vmatprep.subr.bf16.mxu0 %v3406_v47 }
  0x91   : > { %3246 = vmatmul.mubr.f32.gmra.mrb[34].mxu0 %v2723_v9  ;;  %v1735_v9 = vld [vmem:[#allocation3 + $0x58] sm:$0xff] }
  0x92   : > { %3248 = vmatprep.mubr.f32.mxu0 %v2726_v11  ;;  %v3422_v11 = vpack.c.bf16 %v1735_v9, %v1734_v8 }
  0x93   : > { %3409 = vmatpush3.bf16.msra.mxu0 %v3406_v47 }
  0x94   : > { %3411 = vmatprep.subr.bf16.mxu0 %v3410_v53 }
  0x95   : > { %1212 = vmatmul.mubr.bf16.gmra.mrb[36].mxu1 %v3589_v33  ;;  %3249 = vmatmul.mubr.f32.gmra.mrb[36].mxu0 %v2727_v12  ;;  %v2747_v33 = vunpack.c.h.bf16 %v2866_v31  ;;  %v2873_v12 = vld [vmem:[%s3984_s14 + $0x70] sm:$0xff]   ;;  %v3647_v31 = vld [vmem:[%s3833_s16 + $0x1ec] ss:$16 sps:$4 sm:$0xff]  }
  0x96   : > { %1219 = vmatprep.mubr.bf16.mxu1 %v3592_v38  ;;  %3251 = vmatprep.mubr.f32.mxu0 %v2730_v16  ;;  %v2751_v38 = vunpack.c.h.bf16 %v2867_v34  ;;  %v2775_v16 = vunpack.c.h.bf16 %v2873_v12 }
  0x97   : > { %3413 = vmatpush3.bf16.msra.mxu0 %v3410_v53 }
  0x98   : > { %3415 = vmatprep.subr.bf16.mxu0 %v3414_v61 }
  0x99   : > { %3252 = vmatmul.mubr.f32.gmra.mrb[38].mxu0 %v2731_v17 }
  0x9a   : > { %3254 = vmatprep.mubr.f32.mxu0 %v2734_v19  ;;  %v3638_v19 = vld [vmem:[%s3833_s16 + $0x18c] ss:$16 sps:$4 sm:$0xff]  }
  0x9b   : > { %3417 = vmatpush3.bf16.msra.mxu0 %v3414_v61 }
  0x9d   : > { %1220 = vmatmul.mubr.bf16.gmra.mrb[40].mxu1 %v3595_v46  ;;  %3255 = vmatmul.mubr.f32.gmra.mrb[40].mxu0 %v2735_v20  ;;  %v2755_v46 = vunpack.c.h.bf16 %v2868_v42  ;;  %v2874_v20 = vld [vmem:[%s3984_s14 + $0x78] sm:$0xff]  }
  0x9e   : > { %1227 = vmatprep.mubr.bf16.mxu1 %v3598_v48  ;;  %3257 = vmatprep.mubr.f32.mxu0 %v2738_v24  ;;  %v2869_v48 = vld [vmem:[%s3984_s14 + $0x50] sm:$0xff]   ;;  %v2779_v24 = vunpack.c.h.bf16 %v2874_v20 }
  0x9f   : > { %v2758_v49 = vunpack.c.l.bf16 %v2869_v48  ;;  %v2759_v52 = vunpack.c.h.bf16 %v2869_v48 }
  0xa1   : > { %3258 = vmatmul.mubr.f32.gmra.mrb[42].mxu0 %v2739_v25 }
  0xa2   : > { %3260 = vmatprep.mubr.f32.mxu0 %v2742_v27  ;;  %v3641_v27 = vld [vmem:[%s3833_s16 + $0x1ac] ss:$16 sps:$4 sm:$0xff]  }
  0xa5   : > { %1228 = vmatmul.mubr.bf16.gmra.mrb[44].mxu1 %v3601_v54  ;;  %3261 = vmatmul.mubr.f32.gmra.mrb[44].mxu0 %v2743_v28  ;;  %v3631_v54 = vld [vmem:[%s3833_s16 + $0x128] ss:$16 sps:$4 sm:$0xff]  }
  0xa6   : > { %1235 = vmatprep.mubr.bf16.mxu1 %v3604_v57  ;;  %3263 = vmatprep.mubr.f32.mxu0 %v2746_v32  ;;  %v2762_v57 = vunpack.c.l.bf16 %v2870_v56  ;;  %v3643_v28 = vld [vmem:[%s3833_s16 + $0x1a8] ss:$16 sps:$4 sm:$0xff]  }
  0xa7   : > { %v3649_v32 = vld [vmem:[%s3833_s16 + $0x1e8] ss:$16 sps:$4 sm:$0xff]  }
  0xa9   : > { %3264 = vmatmul.mubr.f32.gmra.mrb[46].mxu0 %v2747_v33 }
  0xaa   : > { %3266 = vmatprep.mubr.f32.mxu0 %v2750_v35 }
  0xad   : > { %1236 = vmatmul.mubr.bf16.gmra.mrb[48].mxu1 %v3607_v3  ;;  %3267 = vmatmul.mubr.f32.gmra.mrb[48].mxu0 %v2751_v38  ;;  %v3418_v3 = vpack.c.bf16 %v1733_v1, %v1732_v0 }
  0xae   : > { %1243 = vmatprep.mubr.bf16.mxu1 %v3610_v5  ;;  %3269 = vmatprep.mubr.f32.mxu0 %v2754_v43  ;;  %v3635_v5 = vld [vmem:[%s3833_s16 + $0x16c] ss:$16 sps:$4 sm:$0xff]  }
  0xaf   : > { %3419 = vmatprep.subr.bf16.mxu0 %v3418_v3 }
  0xb0   : > { %3421 = vmatpush3.bf16.msra.mxu0 %v3418_v3 }
  0xb1   : > { %3270 = vmatmul.mubr.f32.gmra.mrb[50].mxu0 %v2755_v46  ;;  %3423 = vmatprep.subr.bf16.mxu0 %v3422_v11 }
  0xb2   : > { %3272 = vmatprep.mubr.f32.mxu0 %v2758_v49 }
  0xb4   : > { %3425 = vmatpush3.bf16.msra.mxu0 %v3422_v11 }
  0xb5   : > { %1244 = vmatmul.mubr.bf16.gmra.mrb[52].mxu1 %v3613_v13  ;;  %3273 = vmatmul.mubr.f32.gmra.mrb[52].mxu0 %v2759_v52  ;;  %v2774_v13 = vunpack.c.l.bf16 %v2873_v12 }
  0xb6   : > { %1251 = vmatprep.mubr.bf16.mxu1 %v3616_v14  ;;  %3275 = vmatprep.mubr.f32.mxu0 %v2762_v57  ;;  %v1736_v14 = vld [vmem:[#allocation3 + $0x60] sm:$0xff] }
  0xb7   : > { %v3426_v17 = vpack.c.bf16 %v1737_v15, %v1736_v14 }
  0xb9   : > { %3276 = vmatmul.mubr.f32.gmra.mrb[54].mxu0 %v2763_v60  ;;  %3427 = vmatprep.subr.bf16.mxu0 %v3426_v17 }
  0xba   : > { %3278 = vmatprep.mubr.f32.mxu0 %v2766_v63  ;;  %3429 = vmatpush3.bf16.msra.mxu0 %v3426_v17 }
  0xbd   : > { %1252 = vmatmul.mubr.bf16.gmra.mrb[56].mxu1 %v3619_v21  ;;  %3279 = vmatmul.mubr.f32.gmra.mrb[56].mxu0 %v2767_v2  ;;  %v2778_v21 = vunpack.c.l.bf16 %v2874_v20 }
  0xbe   : > { %1259 = vmatprep.mubr.bf16.mxu1 %v3622_v22  ;;  %3281 = vmatprep.mubr.f32.mxu0 %v2770_v7  ;;  %v1738_v22 = vld [vmem:[#allocation3 + $0x70] sm:$0xff] }
  0xbf   : > { %v3430_v25 = vpack.c.bf16 %v1739_v23, %v1738_v22 }
  0xc1   : > { %3282 = vmatmul.mubr.f32.gmra.mrb[58].mxu0 %v2771_v10  ;;  %3431 = vmatprep.subr.bf16.mxu0 %v3430_v25 }
  0xc2   : > { %3284 = vmatprep.mubr.f32.mxu0 %v2774_v13  ;;  %3433 = vmatpush3.bf16.msra.mxu0 %v3430_v25 }
  0xc5   : > { %1260 = vmatmul.mubr.bf16.gmra.mrb[60].mxu1 %v3625_v29  ;;  %3285 = vmatmul.mubr.f32.gmra.mrb[60].mxu0 %v2775_v16  ;;  %v3644_v29 = vld [vmem:[%s3833_s16 + $0x1cc] ss:$16 sps:$4 sm:$0xff]  }
  0xc6   : > { %1267 = vmatprep.mubr.bf16.mxu1 %v3626_v30  ;;  %3287 = vmatprep.mubr.f32.mxu0 %v2778_v21  ;;  %v3646_v30 = vld [vmem:[%s3833_s16 + $0x1c8] ss:$16 sps:$4 sm:$0xff]  }
  0xc9   : > { %3288 = vmatmul.mubr.f32.gmra.mrb[62].mxu0 %v2779_v24 }
  0xcd   : > { %1268 = vmatmul.mubr.bf16.gmra.mrb[64].mxu1 %v3628_v40 }
  0xce   : > { %1275 = vmatprep.mubr.bf16.mxu1 %v3629_v41 }
  0xd5   : > { %1276 = vmatmul.mubr.bf16.gmra.mrb[68].mxu1 %v3631_v54 }
  0xd6   : > { %1283 = vmatprep.mubr.bf16.mxu1 %v3632_v55 }
  0xdd   : > { %1284 = vmatmul.mubr.bf16.gmra.mrb[72].mxu1 %v3634_v4 }
  0xde   : > { %1291 = vmatprep.mubr.bf16.mxu1 %v3635_v5 }
  0xe5   : > { %1292 = vmatmul.mubr.bf16.gmra.mrb[76].mxu1 %v3637_v18 }
  0xe6   : > { %1299 = vmatprep.mubr.bf16.mxu1 %v3638_v19 }
  0xed   : > { %1300 = vmatmul.mubr.bf16.gmra.mrb[80].mxu1 %v3640_v26 }
  0xee   : > { %1307 = vmatprep.mubr.bf16.mxu1 %v3641_v27 }
  0xf5   : > { %1308 = vmatmul.mubr.bf16.gmra.mrb[84].mxu1 %v3643_v28 }
  0xf6   : > { %1315 = vmatprep.mubr.bf16.mxu1 %v3644_v29 }
  0xfd   : > { %1316 = vmatmul.mubr.bf16.gmra.mrb[88].mxu1 %v3646_v30 }
  0xfe   : > { %1323 = vmatprep.mubr.bf16.mxu1 %v3647_v31 }
 0x105   : > { %1324 = vmatmul.mubr.bf16.gmra.mrb[92].mxu1 %v3649_v32 }
 0x120   : > { %v2954_v33 = vpop.f32.mrb[0].mxu1  ;;  %v2906_v45 = vpop.f32.mrb[0].mxu0 }
 0x121   : > { %v2955_v34 = vpop.f32.mrb[1].mxu1  ;;  %v2907_v46 = vpop.f32.mrb[1].mxu0 }
 0x122   : > { %v4028_v35 = vadd.f32 %v2955_v34, %v2954_v33  ;;  %v2957_v36 = vpop.f32.mrb[2].mxu1  ;;  %v4036_v47 = vadd.f32 %v2907_v46, %v2906_v45  ;;  %v2909_v48 = vpop.f32.mrb[2].mxu0 }
 0x123   : > { %v2958_v37 = vpop.f32.mrb[3].mxu1  ;;  %v2910_v49 = vpop.f32.mrb[3].mxu0 }
 0x124   : > { %v4030_v38 = vadd.f32 %v2958_v37, %v2957_v36  ;;  %v4038_v51 = vadd.f32 %v2910_v49, %v2909_v48 }
 0x128   : > { %v2960_v39 = vpop.f32.mrb[4].mxu1  ;;  %v2912_v57 = vpop.f32.mrb[4].mxu0 }
 0x129   : > { %v2961_v40 = vpop.f32.mrb[5].mxu1  ;;  %v2913_v58 = vpop.f32.mrb[5].mxu0 }
 0x12a   : > { %v4032_v41 = vadd.f32 %v2961_v40, %v2960_v39  ;;  %v2963_v42 = vpop.f32.mrb[6].mxu1  ;;  %v4044_v59 = vadd.f32 %v2913_v58, %v2912_v57  ;;  %v2915_v60 = vpop.f32.mrb[6].mxu0 }
 0x12b   : > { %v2964_v43 = vpop.f32.mrb[7].mxu1  ;;  %v2916_v61 = vpop.f32.mrb[7].mxu0 }
 0x12c   : > { %v4034_v44 = vadd.f32 %v2964_v43, %v2963_v42  ;;  %v4046_v63 = vadd.f32 %v2916_v61, %v2915_v60 }
 0x130   : > { %v2966_v50 = vpop.f32.mrb[8].mxu1  ;;  %v2918_v5 = vpop.f32.mrb[8].mxu0 }
 0x131   : > { %v2967_v52 = vpop.f32.mrb[9].mxu1  ;;  %v2919_v6 = vpop.f32.mrb[9].mxu0 }
 0x132   : > { %v4040_v53 = vadd.f32 %v2967_v52, %v2966_v50  ;;  %v2969_v54 = vpop.f32.mrb[10].mxu1  ;;  %v4052_v7 = vadd.f32 %v2919_v6, %v2918_v5  ;;  %v2921_v8 = vpop.f32.mrb[10].mxu0 }
 0x133   : > { %v2970_v55 = vpop.f32.mrb[11].mxu1  ;;  %v2922_v9 = vpop.f32.mrb[11].mxu0 }
 0x134   : > { %v4042_v56 = vadd.f32 %v2970_v55, %v2969_v54  ;;  %v4054_v11 = vadd.f32 %v2922_v9, %v2921_v8  ;;  %v1466_v5 = vpop.permute.xlu0 %1465 }
 0x138   : > { %v2972_v62 = vpop.f32.mrb[12].mxu1  ;;  %v2924_v17 = vpop.f32.mrb[12].mxu0 }
 0x139   : > { %v2973_v0 = vpop.f32.mrb[13].mxu1  ;;  %v2925_v18 = vpop.f32.mrb[13].mxu0 }
 0x13a   : > { %v4048_v1 = vadd.f32 %v2973_v0, %v2972_v62  ;;  %v2975_v2 = vpop.f32.mrb[14].mxu1  ;;  %v4060_v19 = vadd.f32 %v2925_v18, %v2924_v17  ;;  %v2927_v20 = vpop.f32.mrb[14].mxu0 }
 0x13b   : > { %v2976_v3 = vpop.f32.mrb[15].mxu1  ;;  %v2928_v21 = vpop.f32.mrb[15].mxu0 }
 0x13c   : > { %v4050_v4 = vadd.f32 %v2976_v3, %v2975_v2  ;;  %v4062_v23 = vadd.f32 %v2928_v21, %v2927_v20  ;;  %v1471_v21 = vpop.permute.xlu0 %1470 }
 0x140   : > { %v2978_v10 = vpop.f32.mrb[16].mxu1  ;;  %v2930_v29 = vpop.f32.mrb[16].mxu0 }
 0x141   : > { %v2979_v12 = vpop.f32.mrb[17].mxu1  ;;  %v2931_v30 = vpop.f32.mrb[17].mxu0 }
 0x142   : > { %v4056_v13 = vadd.f32 %v2979_v12, %v2978_v10  ;;  %v2981_v14 = vpop.f32.mrb[18].mxu1  ;;  %v4068_v31 = vadd.f32 %v2931_v30, %v2930_v29  ;;  %v2933_v32 = vpop.f32.mrb[18].mxu0 }
 0x143   : > { %v2982_v15 = vpop.f32.mrb[19].mxu1  ;;  %v2934_v33 = vpop.f32.mrb[19].mxu0 }
 0x144   : > { %v4058_v16 = vadd.f32 %v2982_v15, %v2981_v14  ;;  %v4070_v36 = vadd.f32 %v2934_v33, %v2933_v32 }
 0x148   : > { %v2984_v22 = vpop.f32.mrb[20].mxu1  ;;  %v2936_v45 = vpop.f32.mrb[20].mxu0 }
 0x149   : > { %v2985_v24 = vpop.f32.mrb[21].mxu1  ;;  %v2937_v46 = vpop.f32.mrb[21].mxu0 }
 0x14a   : > { %v4064_v25 = vadd.f32 %v2985_v24, %v2984_v22  ;;  %v2987_v26 = vpop.f32.mrb[22].mxu1  ;;  %v4076_v48 = vadd.f32 %v2937_v46, %v2936_v45  ;;  %v2939_v49 = vpop.f32.mrb[22].mxu0 }
 0x14b   : > { %v2988_v27 = vpop.f32.mrb[23].mxu1  ;;  %v2940_v50 = vpop.f32.mrb[23].mxu0 }
 0x14c   : > { %v4066_v28 = vadd.f32 %v2988_v27, %v2987_v26  ;;  %v4078_v54 = vadd.f32 %v2940_v50, %v2939_v49 }
 0x150   : > { %v2990_v34 = vpop.f32.mrb[24].mxu1  ;;  %v2942_v62 = vpop.f32.mrb[24].mxu0 }
 0x151   : > { %v2991_v37 = vpop.f32.mrb[25].mxu1  ;;  %v2943_v0 = vpop.f32.mrb[25].mxu0 }
 0x152   : > { %v4072_v39 = vadd.f32 %v2991_v37, %v2990_v34  ;;  %v2993_v40 = vpop.f32.mrb[26].mxu1  ;;  %v4084_v2 = vadd.f32 %v2943_v0, %v2942_v62  ;;  %v2945_v3 = vpop.f32.mrb[26].mxu0 }
 0x153   : > { %v2994_v42 = vpop.f32.mrb[27].mxu1  ;;  %v2946_v6 = vpop.f32.mrb[27].mxu0 }
 0x154   : > { %v4074_v43 = vadd.f32 %v2994_v42, %v2993_v40  ;;  %v4086_v9 = vadd.f32 %v2946_v6, %v2945_v3  ;;  %v1476_v37 = vpop.permute.xlu1 %1475 }
 0x158   : > { %v2996_v52 = vpop.f32.mrb[28].mxu1  ;;  %v2948_v20 = vpop.f32.mrb[28].mxu0 }
 0x159   : > { %v2997_v55 = vpop.f32.mrb[29].mxu1  ;;  %v2949_v22 = vpop.f32.mrb[29].mxu0 }
 0x15a   : > { %v4080_v57 = vadd.f32 %v2997_v55, %v2996_v52  ;;  %v2999_v58 = vpop.f32.mrb[30].mxu1  ;;  %v4090_v27 = vadd.f32 %v2949_v22, %v2948_v20  ;;  %v2951_v29 = vpop.f32.mrb[30].mxu0 }
 0x15b   : > { %v3000_v60 = vpop.f32.mrb[31].mxu1  ;;  %v2952_v30 = vpop.f32.mrb[31].mxu0 }
 0x15c   : > { %v4082_v61 = vadd.f32 %v3000_v60, %v2999_v58  ;;  %v4092_v34 = vadd.f32 %v2952_v30, %v2951_v29  ;;  %v1481_v52 = vpop.permute.xlu1 %1480 }
 0x160   : > { %v3018_v8 = vpop.f32.mrb[32].mxu1 }
 0x161   : > { %v3019_v10 = vpop.f32.mrb[33].mxu1 }
 0x162   : > { %v3020_v12 = vadd.f32 %v3019_v10, %v3018_v8  ;;  %v3021_v14 = vpop.f32.mrb[34].mxu1  ;;  %v1486_v8 = vpop.permute.xlu0 %1485 }
 0x163   : > { %v3022_v15 = vpop.f32.mrb[35].mxu1 }
 0x164   : > { %v1206_v17 = vadd.f32 %v3020_v12, %v4036_v47  ;;  %v3023_v18 = vadd.f32 %v3022_v15, %v3021_v14  ;;  %v1491_v12 = vpop.permute.xlu1 %1490 }
 0x166   : > { %v1623_v24 = vmul.f32 %v1466_v5, %v1206_v17  ;;  %v1209_v26 = vadd.f32 %v3023_v18, %v4038_v51 }
 0x168   : > { %v1624_v32 = vmul.f32 %v1471_v21, %v1209_v26  ;;  %v3024_v33 = vpop.f32.mrb[36].mxu1  ;;  %3322 = vmatprep.mubr.f32.mxu0 %v1623_v24  ;;  %v1496_v24 = vpop.permute.xlu0 %1495 }
 0x169   : > { %v3025_v40 = vpop.f32.mrb[37].mxu1  ;;  %v1501_v29 = vpop.permute.xlu1 %1500 }
 0x16a   : > { %v3026_v42 = vadd.f32 %v3025_v40, %v3024_v33  ;;  %v3027_v47 = vpop.f32.mrb[38].mxu1  ;;  %3323 = vmatmul.mubr.f32.vlgmr.msra.gmra.mrb[32].mxu0 %v1624_v32 }
 0x16b   : > { %v3028_v45 = vpop.f32.mrb[39].mxu1 }
 0x16c   : > { %v1214_v46 = vadd.f32 %v3026_v42, %v4044_v59  ;;  %v3029_v49 = vadd.f32 %v3028_v45, %v3027_v47  ;;  %v1506_v45 = vpop.permute.xlu0 %1505 }
 0x16e   : > { %v1217_v51 = vadd.f32 %v3029_v49, %v4046_v63  ;;  %v1625_v50 = vmul.f32 %v1476_v37, %v1214_v46  ;;  %v1511_v49 = vpop.permute.xlu1 %1510 }
 0x170   : > { %v1626_v55 = vmul.f32 %v1481_v52, %v1217_v51  ;;  %v3030_v58 = vpop.f32.mrb[40].mxu1  ;;  %3325 = vmatprep.mubr.f32.mxu0 %v1625_v50 }
 0x171   : > { %v3031_v60 = vpop.f32.mrb[41].mxu1 }
 0x172   : > { %v3032_v62 = vadd.f32 %v3031_v60, %v3030_v58  ;;  %v3033_v0 = vpop.f32.mrb[42].mxu1  ;;  %3326 = vmatmul.mubr.f32.gmra.mrb[34].mxu0 %v1626_v55 }
 0x173   : > { %v3034_v3 = vpop.f32.mrb[43].mxu1 }
 0x174   : > { %v1222_v5 = vadd.f32 %v3032_v62, %v4052_v7  ;;  %v3035_v6 = vadd.f32 %v3034_v3, %v3033_v0  ;;  %v1516_v0 = vpop.permute.xlu0 %1515 }
 0x176   : > { %v1225_v10 = vadd.f32 %v3035_v6, %v4054_v11  ;;  %v1627_v59 = vmul.f32 %v1486_v8, %v1222_v5  ;;  %v1521_v5 = vpop.permute.xlu1 %1520 }
 0x178   : > { %v3036_v14 = vpop.f32.mrb[44].mxu1  ;;  %3328 = vmatprep.mubr.f32.mxu0 %v1627_v59  ;;  %v1628_v63 = vmul.f32 %v1491_v12, %v1225_v10 }
 0x179   : > { %v3037_v15 = vpop.f32.mrb[45].mxu1 }
 0x17a   : > { %v3038_v17 = vadd.f32 %v3037_v15, %v3036_v14  ;;  %v3039_v18 = vpop.f32.mrb[46].mxu1  ;;  %3329 = vmatmul.mubr.f32.gmra.mrb[36].mxu0 %v1628_v63  ;;  %v1526_v15 = vpop.permute.xlu0 %1525 }
 0x17b   : > { %v3040_v20 = vpop.f32.mrb[47].mxu1 }
 0x17c   : > { %v1230_v21 = vadd.f32 %v3038_v17, %v4060_v19  ;;  %v3041_v22 = vadd.f32 %v3040_v20, %v3039_v18  ;;  %v1531_v18 = vpop.permute.xlu1 %1530 }
 0x17e   : > { %v1233_v7 = vadd.f32 %v3041_v22, %v4062_v23  ;;  %v1629_v26 = vmul.f32 %v1496_v24, %v1230_v21 }
 0x180   : > { %v3042_v30 = vpop.f32.mrb[48].mxu1  ;;  %3331 = vmatprep.mubr.f32.mxu0 %v1629_v26  ;;  %v1630_v11 = vmul.f32 %v1501_v29, %v1233_v7 }
 0x181   : > { %v3043_v32 = vpop.f32.mrb[49].mxu1 }
 0x182   : > { %v3044_v33 = vadd.f32 %v3043_v32, %v3042_v30  ;;  %v3045_v37 = vpop.f32.mrb[50].mxu1  ;;  %3332 = vmatmul.mubr.f32.gmra.mrb[38].mxu0 %v1630_v11  ;;  %v1536_v30 = vpop.permute.xlu0 %1535 }
 0x183   : > { %v3046_v40 = vpop.f32.mrb[51].mxu1  ;;  %v1541_v32 = vpop.permute.xlu1 %1540 }
 0x184   : > { %v1238_v42 = vadd.f32 %v3044_v33, %v4068_v31  ;;  %v3047_v47 = vadd.f32 %v3046_v40, %v3045_v37 }
 0x186   : > { %v1241_v19 = vadd.f32 %v3047_v47, %v4070_v36  ;;  %v1631_v46 = vmul.f32 %v1506_v45, %v1238_v42 }
 0x188   : > { %v3048_v51 = vpop.f32.mrb[52].mxu1  ;;  %3334 = vmatprep.mubr.f32.mxu0 %v1631_v46  ;;  %v1632_v23 = vmul.f32 %v1511_v49, %v1241_v19  ;;  %v1546_v46 = vpop.permute.xlu0 %1545 }
 0x189   : > { %v3049_v50 = vpop.f32.mrb[53].mxu1 }
 0x18a   : > { %v3050_v52 = vadd.f32 %v3049_v50, %v3048_v51  ;;  %v3051_v55 = vpop.f32.mrb[54].mxu1  ;;  %3335 = vmatmul.mubr.f32.gmra.mrb[40].mxu0 %v1632_v23  ;;  %v1551_v51 = vpop.permute.xlu1 %1550 }
 0x18b   : > { %v3052_v58 = vpop.f32.mrb[55].mxu1 }
 0x18c   : > { %v1246_v60 = vadd.f32 %v3050_v52, %v4076_v48  ;;  %v3053_v62 = vadd.f32 %v3052_v58, %v3051_v55 }
 0x18e   : > { %v1249_v31 = vadd.f32 %v3053_v62, %v4078_v54  ;;  %v1633_v3 = vmul.f32 %v1516_v0, %v1246_v60  ;;  %v1556_v0 = vpop.permute.xlu0 %1555 }
 0x190   : > { %v3054_v6 = vpop.f32.mrb[56].mxu1  ;;  %3337 = vmatprep.mubr.f32.mxu0 %v1633_v3  ;;  %v1634_v36 = vmul.f32 %v1521_v5, %v1249_v31  ;;  %v1561_v3 = vpop.permute.xlu1 %1560 }
 0x191   : > { %v3055_v8 = vpop.f32.mrb[57].mxu1 }
 0x192   : > { %v3056_v10 = vadd.f32 %v3055_v8, %v3054_v6  ;;  %v3057_v59 = vpop.f32.mrb[58].mxu1  ;;  %3338 = vmatmul.mubr.f32.gmra.mrb[42].mxu0 %v1634_v36 }
 0x193   : > { %v3058_v12 = vpop.f32.mrb[59].mxu1 }
 0x194   : > { %v1254_v14 = vadd.f32 %v3056_v10, %v4084_v2  ;;  %v3059_v63 = vadd.f32 %v3058_v12, %v3057_v59 }
 0x196   : > { %v1257_v48 = vadd.f32 %v3059_v63, %v4086_v9  ;;  %v1635_v17 = vmul.f32 %v1526_v15, %v1254_v14  ;;  %v1566_v14 = vpop.permute.xlu0 %1565  ;;  %v1571_v15 = vpop.permute.xlu1 %1570 }
 0x198   : > { %v3060_v20 = vpop.f32.mrb[60].mxu1  ;;  %3340 = vmatprep.mubr.f32.mxu0 %v1635_v17  ;;  %v1636_v54 = vmul.f32 %v1531_v18, %v1257_v48 }
 0x199   : > { %v3061_v21 = vpop.f32.mrb[61].mxu1 }
 0x19a   : > { %v3062_v22 = vadd.f32 %v3061_v21, %v3060_v20  ;;  %v3063_v24 = vpop.f32.mrb[62].mxu1  ;;  %3341 = vmatmul.mubr.f32.gmra.mrb[44].mxu0 %v1636_v54 }
 0x19b   : > { %v3064_v7 = vpop.f32.mrb[63].mxu1 }
 0x19c   : > { %v1262_v26 = vadd.f32 %v3062_v22, %v4090_v27  ;;  %v3065_v29 = vadd.f32 %v3064_v7, %v3063_v24  ;;  %v1576_v24 = vpop.permute.xlu0 %1575 }
 0x19e   : > { %v1265_v2 = vadd.f32 %v3065_v29, %v4092_v34  ;;  %v1637_v11 = vmul.f32 %v1536_v30, %v1262_v26  ;;  %v1581_v26 = vpop.permute.xlu1 %1580 }
 0x1a0   : > { %v3066_v33 = vpop.f32.mrb[64].mxu1  ;;  %3343 = vmatprep.mubr.f32.mxu0 %v1637_v11  ;;  %v1638_v9 = vmul.f32 %v1541_v32, %v1265_v2 }
 0x1a1   : > { %v3067_v37 = vpop.f32.mrb[65].mxu1 }
 0x1a2   : > { %v3068_v40 = vadd.f32 %v3067_v37, %v3066_v33  ;;  %v3069_v42 = vpop.f32.mrb[66].mxu1  ;;  %3344 = vmatmul.mubr.f32.gmra.mrb[46].mxu0 %v1638_v9  ;;  %v1586_v37 = vpop.permute.xlu0 %1585 }
 0x1a3   : > { %v3070_v47 = vpop.f32.mrb[67].mxu1 }
 0x1a4   : > { %v1270_v45 = vadd.f32 %v3068_v40, %v4028_v35  ;;  %v3071_v19 = vadd.f32 %v3070_v47, %v3069_v42  ;;  %v1591_v42 = vpop.permute.xlu1 %1590 }
 0x1a6   : > { %v1273_v27 = vadd.f32 %v3071_v19, %v4030_v38  ;;  %v1639_v49 = vmul.f32 %v1546_v46, %v1270_v45 }
 0x1a8   : > { %v3072_v23 = vpop.f32.mrb[68].mxu1  ;;  %3346 = vmatprep.mubr.f32.mxu0 %v1639_v49  ;;  %v1640_v34 = vmul.f32 %v1551_v51, %v1273_v27 }
 0x1a9   : > { %v3073_v50 = vpop.f32.mrb[69].mxu1 }
 0x1aa   : > { %v3074_v52 = vadd.f32 %v3073_v50, %v3072_v23  ;;  %v3075_v55 = vpop.f32.mrb[70].mxu1  ;;  %3347 = vmatmul.mubr.f32.gmra.mrb[48].mxu0 %v1640_v34  ;;  %v1596_v23 = vpop.permute.xlu0 %1595 }
 0x1ab   : > { %v3076_v58 = vpop.f32.mrb[71].mxu1  ;;  %v1601_v50 = vpop.permute.xlu1 %1600 }
 0x1ac   : > { %v1278_v60 = vadd.f32 %v3074_v52, %v4032_v41  ;;  %v3077_v62 = vadd.f32 %v3076_v58, %v3075_v55 }
 0x1ae   : > { %v1281_v35 = vadd.f32 %v3077_v62, %v4034_v44  ;;  %v1641_v31 = vmul.f32 %v1556_v0, %v1278_v60 }
 0x1b0   : > { %v3078_v5 = vpop.f32.mrb[72].mxu1  ;;  %3349 = vmatprep.mubr.f32.mxu0 %v1641_v31  ;;  %v1642_v38 = vmul.f32 %v1561_v3, %v1281_v35  ;;  %v1606_v31 = vpop.permute.xlu0 %1605 }
 0x1b1   : > { %v3079_v6 = vpop.f32.mrb[73].mxu1 }
 0x1b2   : > { %v3080_v36 = vadd.f32 %v3079_v6, %v3078_v5  ;;  %v3081_v8 = vpop.f32.mrb[74].mxu1  ;;  %3350 = vmatmul.mubr.f32.gmra.mrb[50].mxu0 %v1642_v38  ;;  %v1611_v5 = vpop.permute.xlu1 %1610 }
 0x1b3   : > { %v3082_v10 = vpop.f32.mrb[75].mxu1 }
 0x1b4   : > { %v1286_v59 = vadd.f32 %v3080_v36, %v4040_v53  ;;  %v3083_v12 = vadd.f32 %v3082_v10, %v3081_v8 }
 0x1b6   : > { %v1289_v41 = vadd.f32 %v3083_v12, %v4042_v56  ;;  %v1643_v63 = vmul.f32 %v1566_v14, %v1286_v59  ;;  %v1616_v14 = vpop.permute.xlu0 %1615 }
 0x1b8   : > { %v3084_v48 = vpop.f32.mrb[76].mxu1  ;;  %3352 = vmatprep.mubr.f32.mxu0 %v1643_v63  ;;  %v1644_v44 = vmul.f32 %v1571_v15, %v1289_v41  ;;  %v1621_v63 = vpop.permute.xlu1 %1620  ;;  %v4127_v15 = vld [vmem:[%s4196_s4] ss:$0 sm:$0xff] }
 0x1b9   : > { %v3085_v17 = vpop.f32.mrb[77].mxu1 }
 0x1ba   : > { %v3086_v18 = vadd.f32 %v3085_v17, %v3084_v48  ;;  %v3087_v20 = vpop.f32.mrb[78].mxu1  ;;  %3353 = vmatmul.mubr.f32.gmra.mrb[52].mxu0 %v1644_v44 }
 0x1bb   : > { %v3088_v54 = vpop.f32.mrb[79].mxu1 }
 0x1bc   : > { %v1294_v21 = vadd.f32 %v3086_v18, %v4048_v1  ;;  %v3089_v22 = vadd.f32 %v3088_v54, %v3087_v20 }
 0x1be   : > { %v1297_v53 = vadd.f32 %v3089_v22, %v4050_v4  ;;  %v1645_v7 = vmul.f32 %v1576_v24, %v1294_v21 }
 0x1c0   : > { %v3090_v29 = vpop.f32.mrb[80].mxu1  ;;  %3355 = vmatprep.mubr.f32.mxu0 %v1645_v7  ;;  %v1646_v56 = vmul.f32 %v1581_v26, %v1297_v53 }
 0x1c1   : > { %v3091_v30 = vpop.f32.mrb[81].mxu1 }
 0x1c2   : > { %v3092_v2 = vadd.f32 %v3091_v30, %v3090_v29  ;;  %v3093_v11 = vpop.f32.mrb[82].mxu1  ;;  %3356 = vmatmul.mubr.f32.gmra.mrb[54].mxu0 %v1646_v56 }
 0x1c3   : > { %v3094_v32 = vpop.f32.mrb[83].mxu1 }
 0x1c4   : > { %v1302_v33 = vadd.f32 %v3092_v2, %v4056_v13  ;;  %v3095_v9 = vadd.f32 %v3094_v32, %v3093_v11 }
 0x1c6   : > { %v1305_v1 = vadd.f32 %v3095_v9, %v4058_v16  ;;  %v1647_v40 = vmul.f32 %v1586_v37, %v1302_v33 }
 0x1c8   : > { %v3096_v47 = vpop.f32.mrb[84].mxu1  ;;  %3358 = vmatprep.mubr.f32.mxu0 %v1647_v40  ;;  %v1648_v4 = vmul.f32 %v1591_v42, %v1305_v1 }
 0x1c9   : > { %v3097_v45 = vpop.f32.mrb[85].mxu1 }
 0x1ca   : > { %v3098_v19 = vadd.f32 %v3097_v45, %v3096_v47  ;;  %v3099_v46 = vpop.f32.mrb[86].mxu1  ;;  %3359 = vmatmul.mubr.f32.gmra.mrb[56].mxu0 %v1648_v4 }
 0x1cb   : > { %v3100_v27 = vpop.f32.mrb[87].mxu1 }
 0x1cc   : > { %v1310_v49 = vadd.f32 %v3098_v19, %v4064_v25  ;;  %v3101_v51 = vadd.f32 %v3100_v27, %v3099_v46 }
 0x1ce   : > { %v1313_v13 = vadd.f32 %v3101_v51, %v4066_v28  ;;  %v1649_v34 = vmul.f32 %v1596_v23, %v1310_v49 }
 0x1d0   : > { %v3102_v52 = vpop.f32.mrb[88].mxu1  ;;  %3361 = vmatprep.mubr.f32.mxu0 %v1649_v34  ;;  %v1650_v16 = vmul.f32 %v1601_v50, %v1313_v13 }
 0x1d1   : > { %v3103_v55 = vpop.f32.mrb[89].mxu1 }
 0x1d2   : > { %v3104_v58 = vadd.f32 %v3103_v55, %v3102_v52  ;;  %v3105_v60 = vpop.f32.mrb[90].mxu1  ;;  %3362 = vmatmul.mubr.f32.gmra.mrb[58].mxu0 %v1650_v16 }
 0x1d3   : > { %v3106_v62 = vpop.f32.mrb[91].mxu1 }
 0x1d4   : > { %v1318_v0 = vadd.f32 %v3104_v58, %v4072_v39  ;;  %v3107_v35 = vadd.f32 %v3106_v62, %v3105_v60 }
 0x1d6   : > { %v1321_v25 = vadd.f32 %v3107_v35, %v4074_v43  ;;  %v1651_v3 = vmul.f32 %v1606_v31, %v1318_v0 }
 0x1d8   : > { %v3108_v38 = vpop.f32.mrb[92].mxu1  ;;  %3364 = vmatprep.mubr.f32.mxu0 %v1651_v3  ;;  %v1652_v28 = vmul.f32 %v1611_v5, %v1321_v25 }
 0x1d9   : > { %v3109_v6 = vpop.f32.mrb[93].mxu1 }
 0x1da   : > { %v3110_v36 = vadd.f32 %v3109_v6, %v3108_v38  ;;  %v3111_v8 = vpop.f32.mrb[94].mxu1  ;;  %3365 = vmatmul.mubr.f32.gmra.mrb[60].mxu0 %v1652_v28 }
 0x1db   : > { %v3112_v10 = vpop.f32.mrb[95].mxu1 }
 0x1dc   : > { %v1326_v59 = vadd.f32 %v3110_v36, %v4080_v57  ;;  %v3113_v12 = vadd.f32 %v3112_v10, %v3111_v8 }
 0x1de   : > { %v1329_v39 = vadd.f32 %v3113_v12, %v4082_v61  ;;  %v1653_v41 = vmul.f32 %v1616_v14, %v1326_v59 }
 0x1e0   : > { %3367 = vmatprep.mubr.f32.mxu0 %v1653_v41  ;;  %v1654_v43 = vmul.f32 %v1621_v63, %v1329_v39 }
 0x1e2   : > { %3368 = vmatmul.mubr.f32.gmra.mrb[62].mxu0 %v1654_v43 }
 0x23d   : > { %v3324_v48 = vpop.f32.mrb[32].mxu0 }
 0x23e   : > { %v2214_v44 = vadd.f32 %v3324_v48, %v4127_v15  ;;  %v2047_v17 = vpop.f32.mrb[33].mxu0 }
 0x23f   : > { %v2213_v57 = vadd.f32 %v4127_v15, %v2047_v17 }
 0x240   : > { %v2246_v18 = vmax.f32 %v2214_v44, 0.0 }
 0x241   : > { %v2245_v20 = vmax.f32 %v2213_v57, 0.0 }
 0x243   : > { %v2783_v61 = vpack.c.bf16 %v2246_v18, %v2245_v20 }
 0x245   : > { %2784 = vst [vmem:[%s4135_s26] sm:$0xff] %v2783_v61   ;;  %v3327_v54 = vpop.f32.mrb[34].mxu0 }
 0x246   : > { %v2216_v21 = vadd.f32 %v3327_v54, %v4127_v15  ;;  %v2057_v22 = vpop.f32.mrb[35].mxu0 }
 0x247   : > { %v2215_v24 = vadd.f32 %v4127_v15, %v2057_v22 }
 0x248   : > { %v2248_v53 = vmax.f32 %v2216_v21, 0.0 }
 0x249   : > { %v2247_v7 = vmax.f32 %v2215_v24, 0.0 }
 0x24b   : > { %v2788_v26 = vpack.c.bf16 %v2248_v53, %v2247_v7 }
 0x24d   : > { %2875 = vst [vmem:[%s4135_s26 + $0x8] sm:$0xff] %v2788_v26   ;;  %v3330_v29 = vpop.f32.mrb[36].mxu0 }
 0x24e   : > { %v2218_v56 = vadd.f32 %v3330_v29, %v4127_v15  ;;  %v2067_v30 = vpop.f32.mrb[37].mxu0 }
 0x24f   : > { %v2217_v2 = vadd.f32 %v4127_v15, %v2067_v30 }
 0x250   : > { %v2250_v11 = vmax.f32 %v2218_v56, 0.0 }
 0x251   : > { %v2249_v32 = vmax.f32 %v2217_v2, 0.0 }
 0x253   : > { %v2793_v33 = vpack.c.bf16 %v2250_v11, %v2249_v32 }
 0x255   : > { %2876 = vst [vmem:[%s4135_s26 + $0x10] sm:$0xff] %v2793_v33   ;;  %v3333_v9 = vpop.f32.mrb[38].mxu0 }
 0x256   : > { %v2220_v37 = vadd.f32 %v3333_v9, %v4127_v15  ;;  %v2077_v1 = vpop.f32.mrb[39].mxu0 }
 0x257   : > { %v2219_v40 = vadd.f32 %v4127_v15, %v2077_v1 }
 0x258   : > { %v2252_v42 = vmax.f32 %v2220_v37, 0.0 }
 0x259   : > { %v2251_v47 = vmax.f32 %v2219_v40, 0.0 }
 0x25b   : > { %v2798_v4 = vpack.c.bf16 %v2252_v42, %v2251_v47 }
 0x25d   : > { %2877 = vst [vmem:[%s4135_s26 + $0x18] sm:$0xff] %v2798_v4   ;;  %v3336_v45 = vpop.f32.mrb[40].mxu0 }
 0x25e   : > { %v2222_v19 = vadd.f32 %v3336_v45, %v4127_v15  ;;  %v2087_v46 = vpop.f32.mrb[41].mxu0 }
 0x25f   : > { %v2221_v27 = vadd.f32 %v4127_v15, %v2087_v46 }
 0x260   : > { %v2254_v49 = vmax.f32 %v2222_v19, 0.0 }
 0x261   : > { %v2253_v51 = vmax.f32 %v2221_v27, 0.0 }
 0x263   : > { %v2803_v23 = vpack.c.bf16 %v2254_v49, %v2253_v51 }
 0x265   : > { %2878 = vst [vmem:[%s4135_s26 + $0x20] sm:$0xff] %v2803_v23   ;;  %v3339_v13 = vpop.f32.mrb[42].mxu0 }
 0x266   : > { %v2224_v34 = vadd.f32 %v3339_v13, %v4127_v15  ;;  %v2097_v50 = vpop.f32.mrb[43].mxu0 }
 0x267   : > { %v2223_v52 = vadd.f32 %v4127_v15, %v2097_v50 }
 0x268   : > { %v2256_v16 = vmax.f32 %v2224_v34, 0.0 }
 0x269   : > { %v2255_v55 = vmax.f32 %v2223_v52, 0.0 }
 0x26b   : > { %v2808_v58 = vpack.c.bf16 %v2256_v16, %v2255_v55 }
 0x26d   : > { %2879 = vst [vmem:[%s4135_s26 + $0x28] sm:$0xff] %v2808_v58   ;;  %v3342_v60 = vpop.f32.mrb[44].mxu0 }
 0x26e   : > { %v2226_v62 = vadd.f32 %v3342_v60, %v4127_v15  ;;  %v2107_v0 = vpop.f32.mrb[45].mxu0 }
 0x26f   : > { %v2225_v35 = vadd.f32 %v4127_v15, %v2107_v0 }
 0x270   : > { %v2258_v31 = vmax.f32 %v2226_v62, 0.0 }
 0x271   : > { %v2257_v25 = vmax.f32 %v2225_v35, 0.0 }
 0x273   : > { %v2813_v3 = vpack.c.bf16 %v2258_v31, %v2257_v25 }
 0x275   : > { %2880 = vst [vmem:[%s4135_s26 + $0x30] sm:$0xff] %v2813_v3   ;;  %v3345_v5 = vpop.f32.mrb[46].mxu0 }
 0x276   : > { %v2228_v38 = vadd.f32 %v3345_v5, %v4127_v15  ;;  %v2117_v28 = vpop.f32.mrb[47].mxu0 }
 0x277   : > { %v2227_v6 = vadd.f32 %v4127_v15, %v2117_v28 }
 0x278   : > { %v2260_v36 = vmax.f32 %v2228_v38, 0.0 }
 0x279   : > { %v2259_v8 = vmax.f32 %v2227_v6, 0.0 }
 0x27b   : > { %v2818_v10 = vpack.c.bf16 %v2260_v36, %v2259_v8 }
 0x27d   : > { %2881 = vst [vmem:[%s4135_s26 + $0x38] sm:$0xff] %v2818_v10   ;;  %v3348_v59 = vpop.f32.mrb[48].mxu0 }
 0x27e   : > { %v2230_v12 = vadd.f32 %v3348_v59, %v4127_v15  ;;  %v2127_v14 = vpop.f32.mrb[49].mxu0 }
 0x27f   : > { %v2229_v39 = vadd.f32 %v4127_v15, %v2127_v14 }
 0x280   : > { %v2262_v41 = vmax.f32 %v2230_v12, 0.0 }
 0x281   : > { %v2261_v63 = vmax.f32 %v2229_v39, 0.0 }
 0x283   : > { %v2823_v43 = vpack.c.bf16 %v2262_v41, %v2261_v63 }
 0x285   : > { %2882 = vst [vmem:[%s4135_s26 + $0x40] sm:$0xff] %v2823_v43   ;;  %v3351_v48 = vpop.f32.mrb[50].mxu0 }
 0x286   : > { %v2232_v44 = vadd.f32 %v3351_v48, %v4127_v15  ;;  %v2137_v17 = vpop.f32.mrb[51].mxu0 }
 0x287   : > { %v2231_v57 = vadd.f32 %v4127_v15, %v2137_v17 }
 0x288   : > { %v2264_v18 = vmax.f32 %v2232_v44, 0.0 }
 0x289   : > { %v2263_v20 = vmax.f32 %v2231_v57, 0.0 }
 0x28b   : > { %v2828_v61 = vpack.c.bf16 %v2264_v18, %v2263_v20 }
 0x28d   : > { %2883 = vst [vmem:[%s4135_s26 + $0x48] sm:$0xff] %v2828_v61   ;;  %v3354_v54 = vpop.f32.mrb[52].mxu0 }
 0x28e   : > { %v2234_v21 = vadd.f32 %v3354_v54, %v4127_v15  ;;  %v2147_v22 = vpop.f32.mrb[53].mxu0 }
 0x28f   : > { %v2233_v24 = vadd.f32 %v4127_v15, %v2147_v22 }
 0x290   : > { %v2266_v53 = vmax.f32 %v2234_v21, 0.0 }
 0x291   : > { %v2265_v7 = vmax.f32 %v2233_v24, 0.0 }
 0x293   : > { %v2833_v26 = vpack.c.bf16 %v2266_v53, %v2265_v7 }
 0x295   : > { %2884 = vst [vmem:[%s4135_s26 + $0x50] sm:$0xff] %v2833_v26   ;;  %v3357_v29 = vpop.f32.mrb[54].mxu0 }
 0x296   : > { %v2236_v56 = vadd.f32 %v3357_v29, %v4127_v15  ;;  %v2157_v30 = vpop.f32.mrb[55].mxu0 }
 0x297   : > { %v2235_v2 = vadd.f32 %v4127_v15, %v2157_v30 }
 0x298   : > { %v2268_v11 = vmax.f32 %v2236_v56, 0.0 }
 0x299   : > { %v2267_v32 = vmax.f32 %v2235_v2, 0.0 }
 0x29b   : > { %v2838_v33 = vpack.c.bf16 %v2268_v11, %v2267_v32 }
 0x29d   : > { %2885 = vst [vmem:[%s4135_s26 + $0x58] sm:$0xff] %v2838_v33   ;;  %v3360_v9 = vpop.f32.mrb[56].mxu0 }
 0x29e   : > { %v2238_v37 = vadd.f32 %v3360_v9, %v4127_v15  ;;  %v2167_v1 = vpop.f32.mrb[57].mxu0 }
 0x29f   : > { %v2237_v40 = vadd.f32 %v4127_v15, %v2167_v1 }
 0x2a0   : > { %v2270_v42 = vmax.f32 %v2238_v37, 0.0 }
 0x2a1   : > { %v2269_v47 = vmax.f32 %v2237_v40, 0.0 }
 0x2a3   : > { %v2843_v4 = vpack.c.bf16 %v2270_v42, %v2269_v47 }
 0x2a5   : > { %2886 = vst [vmem:[%s4135_s26 + $0x60] sm:$0xff] %v2843_v4   ;;  %v3363_v45 = vpop.f32.mrb[58].mxu0 }
 0x2a6   : > { %v2240_v19 = vadd.f32 %v3363_v45, %v4127_v15  ;;  %v2177_v46 = vpop.f32.mrb[59].mxu0 }
 0x2a7   : > { %v2239_v27 = vadd.f32 %v4127_v15, %v2177_v46 }
 0x2a8   : > { %v2272_v49 = vmax.f32 %v2240_v19, 0.0 }
 0x2a9   : > { %v2271_v51 = vmax.f32 %v2239_v27, 0.0 }
 0x2ab   : > { %v2848_v23 = vpack.c.bf16 %v2272_v49, %v2271_v51 }
 0x2ad   : > { %2887 = vst [vmem:[%s4135_s26 + $0x68] sm:$0xff] %v2848_v23   ;;  %v3366_v13 = vpop.f32.mrb[60].mxu0 }
 0x2ae   : > { %v2242_v34 = vadd.f32 %v3366_v13, %v4127_v15  ;;  %v2187_v50 = vpop.f32.mrb[61].mxu0 }
 0x2af   : > { %v2241_v52 = vadd.f32 %v4127_v15, %v2187_v50 }
 0x2b0   : > { %v2274_v16 = vmax.f32 %v2242_v34, 0.0 }
 0x2b1   : > { %v2273_v55 = vmax.f32 %v2241_v52, 0.0 }
 0x2b3   : > { %v2853_v58 = vpack.c.bf16 %v2274_v16, %v2273_v55 }
 0x2b5   : > { %2888 = vst [vmem:[%s4135_s26 + $0x70] sm:$0xff] %v2853_v58   ;;  %v3369_v60 = vpop.f32.mrb[62].mxu0 }
 0x2b6   : > { %v2244_v62 = vadd.f32 %v3369_v60, %v4127_v15  ;;  %v2197_v0 = vpop.f32.mrb[63].mxu0 }
 0x2b7   : > { %v2243_v35 = vadd.f32 %v4127_v15, %v2197_v0 }
 0x2b8   : > { %v2276_v31 = vmax.f32 %v2244_v62, 0.0 }
 0x2b9   : > { %v2275_v25 = vmax.f32 %v2243_v35, 0.0 }
 0x2bb   : > { %v2858_v3 = vpack.c.bf16 %v2276_v31, %v2275_v25 }
 0x2bd   : > { %2889 = vst [vmem:[%s4135_s26 + $0x78] sm:$0xff] %v2858_v3  }
 0x2be PF: > { %s16_s20 = sadd.s32 1, %s3704_s20   ;;  %s4206_s18 = smov %s3700_s19 }
 0x2bf   : > { %p13_p4 = scmp.ge.s32.totalorder %s16_s20, 4   ;;  %s4207_s19 = smov %s4209_s22 }
 0x2c1   :  { %15 = sbr.rel (!%p13_p4) target bundleno = 2 (0x2), region = 88 }
 0x2c8   :  { %2459 = vsyncpa [#allocation4], 1 }
 0x2c9   :  { %2461 = vsyncpa [#allocation4 + $0x1], 1 }

// kernel: graphsage_forward.3
= control target key start
LH: loop header
LB: loop body
LE: loop exit
PB: predicated region body
PF: predicated region fallthrough
CT: control target
= control target key end

     0   :  { %s3827_s18 = smov 0   ;;  %s3829_s19 = smov 0   ;;  %s4678_s0 = inlined_call_operand.vmem [shape: bf16[512,512], index: 0, kind: input, shape index: {}]   ;;  %s4679_s1 = inlined_call_operand.vmem [shape: bf16[512,128], index: 1, kind: input, shape index: {}]   ;;  %s4680_s2 = inlined_call_operand.vmem [shape: f32[512,1], index: 2, kind: input, shape index: {}]   ;;  %s4681_s3 = inlined_call_operand.vmem [shape: f32[256,128], index: 3, kind: input, shape index: {}]   ;;  %s4682_s4 = inlined_call_operand.vmem [shape: f32[1,128], index: 4, kind: input, shape index: {}]   ;;  %s4683_s5 = inlined_call_operand.vmem [shape: f32[512,128], index: 5, kind: output, shape index: {}]  }
   0x1   :  { %s3831_s20 = smov 0  }
   0x2 LB: > { %s27_s21 = sadd.s32 1, %s3790_s19  ;;  %p2708_p0 = scmp.ge.s32.totalorder %s3794_s20, 1  ;;  %s3794_s20 = sphi %s3831_s20, %s15_s20   ;;  %s3790_s19 = sphi %s3829_s19, %s4685_s19   ;;  %s3786_s18 = sphi %s3827_s18, %s4684_s18  }
   0x3   : > { %p29_p1 = scmp.ge.s32.totalorder %s27_s21, 2  ;;  %p219_p2 = scmp.lt.s32.totalorder %s3794_s20, 3 }
   0x5   : > { %s4687_s21 = smov (%p29_p1, %s27_s21), 0  ;;  %p220_p3 = pnand %p2708_p0, %p219_p2 }
   0x6   : > { %v3516_v0 = vld [vmem:[%s4679_s1 + $0x40] sm:$0xff] (!%p220_p3)   ;;  %s2709_s24 = sshll.u32 (!%p220_p3), %s3786_s18, 5  ;;  %v3518_v2 = vld [vmem:[%s4679_s1 + $0x48] sm:$0xff] (!%p220_p3)   ;;  %v3520_v4 = vld [vmem:[%s4679_s1 + $0x50] sm:$0xff] (!%p220_p3)   ;;  %v3796_v41 = vmov (!%p220_p3), 0   ;;  %s2812_s29 = sshll.u32 (!%p220_p3), %s3786_s18, 8 }
   0x7   : > { %223 = sbr.rel (%p220_p3) target bundleno = 975 (0x3cf), region = 40  ;;  %v3517_v1 = vld [vmem:[%s4679_s1] sm:$0xff] (!%p220_p3)   ;;  %3441 = vmatprep.subr.bf16.mxu1 (!%p220_p3), %v3516_v0  ;;  %2897 = vmatprep.subr.bf16.mxu0 (!%p220_p3), %v3516_v0  ;;  %v3519_v3 = vld [vmem:[%s4679_s1 + $0x8] sm:$0xff] (!%p220_p3)   ;;  %p259_p4 = scmp.lt.s32.totalorder (!%p220_p3), %s2709_s24, 63  ;;  %v3521_v5 = vld [vmem:[%s4679_s1 + $0x10] sm:$0xff] (!%p220_p3)  }
   0x8   : > { %3449 = vmatpush3.bf16.msra.mxu1 (!%p220_p3), %v3517_v1  ;;  %2898 = vmatpush3.bf16.msra.mxu0 (!%p220_p3), %v3517_v1  ;;  %v3522_v6 = vld [vmem:[%s4679_s1 + $0x58] sm:$0xff] (!%p220_p3)   ;;  %v3524_v8 = vld [vmem:[%s4679_s1 + $0x60] sm:$0xff] (!%p220_p3)   ;;  %v3526_v10 = vld [vmem:[%s4679_s1 + $0x68] sm:$0xff] (!%p220_p3)   ;;  %s1641_s10 = sshra.s32 (!%p220_p3), %s2812_s29, 3 }
   0x9   : > { %3442 = vmatprep.subr.bf16.mxu1 (!%p220_p3), %v3518_v2  ;;  %2899 = vmatprep.subr.bf16.mxu0 (!%p220_p3), %v3518_v2  ;;  %v3523_v7 = vld [vmem:[%s4679_s1 + $0x18] sm:$0xff] (!%p220_p3)   ;;  %v3525_v9 = vld [vmem:[%s4679_s1 + $0x20] sm:$0xff] (!%p220_p3)   ;;  %v3527_v12 = vld [vmem:[%s4679_s1 + $0x28] sm:$0xff] (!%p220_p3)   ;;  %s2813_s12 = sshll.u32 (!%p220_p3), %s1641_s10, 2 }
   0xa   : > { %v3528_v13 = vld [vmem:[%s4679_s1 + $0x70] sm:$0xff] (!%p220_p3)   ;;  %v3530_v15 = vld [vmem:[%s4679_s1 + $0x78] sm:$0xff] (!%p220_p3)   ;;  %v3535_v17 = vld [vmem:[%s4679_s1 + $0xc0] sm:$0xff] (!%p220_p3)   ;;  %3514 = vset.pattern.permute.xlu0 (!%p220_p3), %v3796_v41  ;;  %3515 = vset.pattern.permute.xlu1 (!%p220_p3), %v3796_v41 }
   0xb   : > { %v3529_v14 = vld [vmem:[%s4679_s1 + $0x30] sm:$0xff] (!%p220_p3)   ;;  %v3531_v16 = vld [vmem:[%s4679_s1 + $0x38] sm:$0xff] (!%p220_p3)   ;;  %v3536_v19 = vld [vmem:[%s4679_s1 + $0x80] sm:$0xff] (!%p220_p3)  }
   0xc   : > { %3450 = vmatpush3.bf16.msra.mxu1 (!%p220_p3), %v3519_v3  ;;  %2900 = vmatpush3.bf16.msra.mxu0 (!%p220_p3), %v3519_v3  ;;  %v3540_v21 = vld [vmem:[%s4679_s1 + $0xc8] sm:$0xff] (!%p220_p3)   ;;  %v3545_v23 = vld [vmem:[%s4679_s1 + $0xd0] sm:$0xff] (!%p220_p3)   ;;  %v3550_v27 = vld [vmem:[%s4679_s1 + $0xd8] sm:$0xff] (!%p220_p3)  }
   0xd   : > { %3443 = vmatprep.subr.bf16.mxu1 (!%p220_p3), %v3520_v4  ;;  %2901 = vmatprep.subr.bf16.mxu0 (!%p220_p3), %v3520_v4  ;;  %v3541_v22 = vld [vmem:[%s4679_s1 + $0x88] sm:$0xff] (!%p220_p3)   ;;  %v3546_v26 = vld [vmem:[%s4679_s1 + $0x90] sm:$0xff] (!%p220_p3)   ;;  %v3551_v28 = vld [vmem:[%s4679_s1 + $0x98] sm:$0xff] (!%p220_p3)  }
   0xe   : > { %s4689_s24 = smov (!%p259_p4, %s2709_s24), 63  ;;  %v3555_v31 = vld [vmem:[%s4679_s1 + $0xe0] sm:$0xff]   ;;  %v3560_v36 = vld [vmem:[%s4679_s1 + $0xe8] sm:$0xff]   ;;  %v3565_v40 = vld [vmem:[%s4679_s1 + $0xf0] sm:$0xff]  }
   0xf   : > { %s2817_s14 = sshll.u32 %s4689_s24, 4  ;;  %v3556_v35 = vld [vmem:[%s4679_s1 + $0xa0] sm:$0xff]   ;;  %v3561_v37 = vld [vmem:[%s4679_s1 + $0xa8] sm:$0xff]   ;;  %v3566_v44 = vld [vmem:[%s4679_s1 + $0xb0] sm:$0xff]   ;;  %s2713_s8 = sshll.u32 %s4689_s24, 3 }
  0x10   : > { %3451 = vmatpush3.bf16.msra.mxu1 %v3521_v5  ;;  %2902 = vmatpush3.bf16.msra.mxu0 %v3521_v5  ;;  %s3881_s23 = scalar_lea.vmem %s4678_s0, %s2817_s14  ;;  %v3570_v45 = vld [vmem:[%s4679_s1 + $0xf8] sm:$0xff]   ;;  %s3976_s11 = scalar_lea.vmem %s4680_s2, %s2713_s8 }
  0x11   : > { %3444 = vmatprep.subr.bf16.mxu1 %v3522_v6  ;;  %2903 = vmatprep.subr.bf16.mxu0 %v3522_v6  ;;  %v3534_v11 = vld [vmem:[%s3881_s23 + $0x104] ss:$16 sps:$4 sm:$0xff]   ;;  %v3532_v18 = vld [vmem:[%s3881_s23 + $0x100] ss:$16 sps:$4 sm:$0xff]   ;;  %v3571_v46 = vld [vmem:[%s4679_s1 + $0xb8] sm:$0xff]   ;;  %s4082_s14 = scalar_lea.vmem %s4679_s1, %s2813_s12  ;;  %s4603_s18 = scalar_lea.vmem %s4683_s5, %s2713_s8 }
  0x12   : > { %1091 = vmatprep.mubr.bf16.mxu1 %v3534_v11  ;;  %v3537_v20 = vld [vmem:[%s3881_s23 + $0x124] ss:$16 sps:$4 sm:$0xff]   ;;  %v3539_v24 = vld [vmem:[%s3881_s23 + $0x120] ss:$16 sps:$4 sm:$0xff]   ;;  %v1417_v55 = vld [vmem:[%s3976_s11 + $0x8] sm:$0xff] }
  0x13   : > { %v3542_v25 = vld [vmem:[%s3881_s23 + $0x144] ss:$16 sps:$4 sm:$0xff]   ;;  %v3572_v29 = vld [vmem:[%s3881_s23] ss:$16 sps:$4 sm:$0xff]   ;;  %v1419_v58 = vld [vmem:[%s3976_s11 + $0x18] sm:$0xff] }
  0x14   : > { %3452 = vmatpush3.bf16.msra.mxu1 %v3523_v7  ;;  %2904 = vmatpush3.bf16.msra.mxu0 %v3523_v7  ;;  %v3574_v30 = vld [vmem:[%s3881_s23 + $0x4] ss:$16 sps:$4 sm:$0xff]   ;;  %v3544_v32 = vld [vmem:[%s3881_s23 + $0x140] ss:$16 sps:$4 sm:$0xff]   ;;  %v1421_v62 = vld [vmem:[%s3976_s11 + $0x28] sm:$0xff] }
  0x15   : > { %3445 = vmatprep.subr.bf16.mxu1 %v3524_v8  ;;  %2905 = vmatprep.subr.bf16.mxu0 %v3524_v8  ;;  %v3578_v33 = vld [vmem:[%s3881_s23 + $0x24] ss:$16 sps:$4 sm:$0xff]   ;;  %v3582_v38 = vld [vmem:[%s3881_s23 + $0x20] ss:$16 sps:$4 sm:$0xff]   ;;  %v1423_v2 = vld [vmem:[%s3976_s11 + $0x38] sm:$0xff] }
  0x16   : > { %1027 = vmatprep.mubr.bf16.mxu0 %v3574_v30  ;;  %v3547_v34 = vld [vmem:[%s3881_s23 + $0x164] ss:$16 sps:$4 sm:$0xff]   ;;  %v3549_v42 = vld [vmem:[%s3881_s23 + $0x160] ss:$16 sps:$4 sm:$0xff]   ;;  %v1425_v6 = vld [vmem:[%s3976_s11 + $0x48] sm:$0xff] }
  0x17   : > { %v3584_v39 = vld [vmem:[%s3881_s23 + $0x44] ss:$16 sps:$4 sm:$0xff]   ;;  %v3588_v47 = vld [vmem:[%s3881_s23 + $0x40] ss:$16 sps:$4 sm:$0xff]  }
  0x18   : > { %3453 = vmatpush3.bf16.msra.mxu1 %v3525_v9  ;;  %2906 = vmatpush3.bf16.msra.mxu0 %v3525_v9  ;;  %v3552_v43 = vld [vmem:[%s3881_s23 + $0x184] ss:$16 sps:$4 sm:$0xff]   ;;  %v3554_v49 = vld [vmem:[%s3881_s23 + $0x180] ss:$16 sps:$4 sm:$0xff]   ;;  %v3577_v9 = vld [vmem:[%s3881_s23 + $0xc] ss:$16 sps:$4 sm:$0xff]  }
  0x19   : > { %3446 = vmatprep.subr.bf16.mxu1 %v3526_v10  ;;  %2907 = vmatprep.subr.bf16.mxu0 %v3526_v10  ;;  %v3590_v48 = vld [vmem:[%s3881_s23 + $0x64] ss:$16 sps:$4 sm:$0xff]   ;;  %v3594_v51 = vld [vmem:[%s3881_s23 + $0x60] ss:$16 sps:$4 sm:$0xff]   ;;  %v1427_v10 = vld [vmem:[%s3976_s11 + $0x58] sm:$0xff] }
  0x1a   : > { %v3557_v50 = vld [vmem:[%s3881_s23 + $0x1a4] ss:$16 sps:$4 sm:$0xff]   ;;  %v3559_v54 = vld [vmem:[%s3881_s23 + $0x1a0] ss:$16 sps:$4 sm:$0xff]  }
  0x1b   : > { %v3596_v52 = vld [vmem:[%s3881_s23 + $0x84] ss:$16 sps:$4 sm:$0xff]   ;;  %v3600_v59 = vld [vmem:[%s3881_s23 + $0x80] ss:$16 sps:$4 sm:$0xff]  }
  0x1c   : > { %3454 = vmatpush3.bf16.msra.mxu1 %v3527_v12  ;;  %2908 = vmatpush3.bf16.msra.mxu0 %v3527_v12  ;;  %v1416_v53 = vld [vmem:[%s3976_s11] sm:$0xff]  ;;  %v1418_v56 = vld [vmem:[%s3976_s11 + $0x10] sm:$0xff] }
  0x1d   : > { %3447 = vmatprep.subr.bf16.mxu1 %v3528_v13  ;;  %2909 = vmatprep.subr.bf16.mxu0 %v3528_v13  ;;  %v3562_v57 = vld [vmem:[%s3881_s23 + $0x1c4] ss:$16 sps:$4 sm:$0xff]   ;;  %v3564_v63 = vld [vmem:[%s3881_s23 + $0x1c0] ss:$16 sps:$4 sm:$0xff]  }
  0x1e   : > { %1450 = vperm.xlu0 %3514, %v1416_v53   ;;  %1460 = vperm.xlu1 %3515, %v1418_v56   ;;  %v1420_v60 = vld [vmem:[%s3976_s11 + $0x20] sm:$0xff]  ;;  %v1422_v0 = vld [vmem:[%s3976_s11 + $0x30] sm:$0xff]  ;;  %v1738_v53 = vld [vmem:[%s4681_s3 + $0xe8] sm:$0xff] }
  0x1f   : > { %v3602_v61 = vld [vmem:[%s3881_s23 + $0xa4] ss:$16 sps:$4 sm:$0xff]   ;;  %v3606_v3 = vld [vmem:[%s3881_s23 + $0xa0] ss:$16 sps:$4 sm:$0xff]  }
  0x20   : > { %3455 = vmatpush3.bf16.msra.mxu1 %v3529_v14  ;;  %2910 = vmatpush3.bf16.msra.mxu0 %v3529_v14  ;;  %v3567_v1 = vld [vmem:[%s3881_s23 + $0x1e4] ss:$16 sps:$4 sm:$0xff]   ;;  %v3569_v7 = vld [vmem:[%s3881_s23 + $0x1e0] ss:$16 sps:$4 sm:$0xff]   ;;  %v1726_v14 = vld [vmem:[%s4681_s3 + $0x88] sm:$0xff] }
  0x21   : > { %3448 = vmatprep.subr.bf16.mxu1 %v3530_v15  ;;  %2911 = vmatprep.subr.bf16.mxu0 %v3530_v15  ;;  %v1424_v4 = vld [vmem:[%s3976_s11 + $0x40] sm:$0xff]  ;;  %v1426_v8 = vld [vmem:[%s3976_s11 + $0x50] sm:$0xff] }
  0x22   : > { %1455 = vperm.xlu0 %3514, %v1417_v55   ;;  %1465 = vperm.xlu1 %3515, %v1419_v58   ;;  %v3608_v5 = vld [vmem:[%s3881_s23 + $0xc4] ss:$16 sps:$4 sm:$0xff]   ;;  %v3612_v11 = vld [vmem:[%s3881_s23 + $0xc0] ss:$16 sps:$4 sm:$0xff]   ;;  %v3595_v55 = vld [vmem:[%s3881_s23 + $0x68] ss:$16 sps:$4 sm:$0xff]  }
  0x23   : > { %v1428_v12 = vld [vmem:[%s3976_s11 + $0x60] sm:$0xff]  ;;  %v1731_v30 = vld [vmem:[%s4681_s3 + $0xb0] sm:$0xff]  ;;  %v1443_v58 = vld [vmem:[%s3976_s11 + $0xd8] sm:$0xff] }
  0x24   : > { %3456 = vmatpush3.bf16.msra.mxu1 %v3531_v16  ;;  %2912 = vmatpush3.bf16.msra.mxu0 %v3531_v16  ;;  %v1725_v13 = vld [vmem:[%s4681_s3 + $0x80] sm:$0xff]  ;;  %v1442_v56 = vld [vmem:[%s3976_s11 + $0xd0] sm:$0xff] }
  0x25   : > { %3009 = vmatprep.subr.bf16.mxu1 %v3535_v17  ;;  %v3614_v15 = vld [vmem:[%s3881_s23 + $0xe4] ss:$16 sps:$4 sm:$0xff]   ;;  %v3377_v16 = vpack.c.bf16 %v1726_v14, %v1725_v13  ;;  %v1429_v17 = vld [vmem:[%s3976_s11 + $0x68] sm:$0xff] }
  0x26   : > { %1470 = vperm.xlu0 %3514, %v1420_v60   ;;  %1475 = vperm.xlu1 %3515, %v1421_v62   ;;  %v1436_v41 = vld [vmem:[%s3976_s11 + $0xa0] sm:$0xff]  ;;  %v1740_v60 = vld [vmem:[%s4681_s3 + $0xf8] sm:$0xff] }
  0x27   : > { %1092 = vmatmul.mubr.bf16.vlgmr.msra.gmra.mrb[0].mxu1 %v3532_v18  ;;  %1028 = vmatmul.mubr.bf16.vlgmr.msra.gmra.mrb[0].mxu0 %v3572_v29  ;;  %v1727_v18 = vld [vmem:[%s4681_s3 + $0x90] sm:$0xff]  ;;  %v1432_v29 = vld [vmem:[%s3976_s11 + $0x80] sm:$0xff]  ;;  %v3607_v13 = vld [vmem:[%s3881_s23 + $0xa8] ss:$16 sps:$4 sm:$0xff]  }
  0x28   : > { %3010 = vmatpush3.bf16.msra.mxu1 %v3536_v19  ;;  %1099 = vmatprep.mubr.bf16.mxu1 %v3537_v20  ;;  %v1728_v19 = vld [vmem:[%s4681_s3 + $0x98] sm:$0xff]  ;;  %v1444_v62 = vld [vmem:[%s3976_s11 + $0xe0] sm:$0xff] }
  0x29   : > { %3011 = vmatprep.subr.bf16.mxu1 %v3540_v21  ;;  %1035 = vmatprep.mubr.bf16.mxu0 %v3578_v33  ;;  %v3575_v20 = vld [vmem:[%s3881_s23 + $0x8] ss:$16 sps:$4 sm:$0xff]   ;;  %v3381_v21 = vpack.c.bf16 %v1728_v19, %v1727_v18  ;;  %v3610_v14 = vld [vmem:[%s3881_s23 + $0xcc] ss:$16 sps:$4 sm:$0xff]   ;;  %v2885_v18 = vld [vmem:[%s4082_s14 + $0x20] sm:$0xff]  }
  0x2a   : > { %1480 = vperm.xlu0 %3514, %v1422_v0   ;;  %1485 = vperm.xlu1 %3515, %v1423_v2   ;;  %v3583_v33 = vld [vmem:[%s3881_s23 + $0x28] ss:$16 sps:$4 sm:$0xff]   ;;  %v2836_v19 = vunpack.c.l.bf16 %v2885_v18 }
  0x2b   : > { %3378 = vmatprep.subr.bf16.mxu0 %v3377_v16  ;;  %v1445_v0 = vld [vmem:[%s3976_s11 + $0xe8] sm:$0xff] }
  0x2c   : > { %3012 = vmatpush3.bf16.msra.mxu1 %v3541_v22  ;;  %v1430_v22 = vld [vmem:[%s3976_s11 + $0x70] sm:$0xff]  ;;  %3380 = vmatpush3.bf16.msra.mxu0 %v3377_v16 }
  0x2d   : > { %3013 = vmatprep.subr.bf16.mxu1 %v3545_v23  ;;  %v1729_v23 = vld [vmem:[%s4681_s3 + $0xa0] sm:$0xff]  ;;  %3382 = vmatprep.subr.bf16.mxu0 %v3381_v21 }
  0x2e   : > { %1490 = vperm.xlu0 %3514, %v1424_v4   ;;  %1495 = vperm.xlu1 %3515, %v1425_v6   ;;  %v1446_v4 = vld [vmem:[%s3976_s11 + $0xf0] sm:$0xff]  ;;  %v2882_v6 = vld [vmem:[%s4082_s14 + $0x8] sm:$0xff]  }
  0x2f   : > { %1100 = vmatmul.mubr.bf16.gmra.mrb[4].mxu1 %v3539_v24  ;;  %1036 = vmatmul.mubr.bf16.gmra.mrb[4].mxu0 %v3582_v38  ;;  %v1730_v24 = vld [vmem:[%s4681_s3 + $0xa8] sm:$0xff] }
  0x30   : > { %1107 = vmatprep.mubr.bf16.mxu1 %v3542_v25  ;;  %3014 = vmatpush3.bf16.msra.mxu1 %v3546_v26  ;;  %v3580_v25 = vld [vmem:[%s3881_s23 + $0x2c] ss:$16 sps:$4 sm:$0xff]  }
  0x31   : > { %3015 = vmatprep.subr.bf16.mxu1 %v3550_v27  ;;  %1043 = vmatprep.mubr.bf16.mxu0 %v3584_v39  ;;  %v1431_v26 = vld [vmem:[%s3976_s11 + $0x78] sm:$0xff]  ;;  %v3618_v27 = vld [vmem:[%s3881_s23 + $0xe0] ss:$16 sps:$4 sm:$0xff]  }
  0x32   : > { %1500 = vperm.xlu0 %3514, %v1426_v8   ;;  %1505 = vperm.xlu1 %3515, %v1427_v10   ;;  %v3586_v38 = vld [vmem:[%s3881_s23 + $0x4c] ss:$16 sps:$4 sm:$0xff]   ;;  %v2824_v8 = vunpack.c.l.bf16 %v2882_v6  ;;  %v2883_v10 = vld [vmem:[%s4082_s14 + $0x10] sm:$0xff]  }
  0x33   : > { %3384 = vmatpush3.bf16.msra.mxu0 %v3381_v21  ;;  %v1435_v39 = vld [vmem:[%s3976_s11 + $0x98] sm:$0xff] }
  0x34   : > { %3016 = vmatpush3.bf16.msra.mxu1 %v3551_v28  ;;  %v3385_v28 = vpack.c.bf16 %v1730_v24, %v1729_v23  ;;  %v3613_v21 = vld [vmem:[%s3881_s23 + $0xc8] ss:$16 sps:$4 sm:$0xff]  }
  0x35   : > { %3017 = vmatprep.subr.bf16.mxu1 %v3555_v31  ;;  %v1732_v31 = vld [vmem:[%s4681_s3 + $0xb8] sm:$0xff]  ;;  %v2886_v23 = vld [vmem:[%s4082_s14 + $0x28] sm:$0xff]  }
  0x36   : > { %1510 = vperm.xlu0 %3514, %v1428_v12   ;;  %1515 = vperm.xlu1 %3515, %v1429_v17   ;;  %v2829_v12 = vunpack.c.h.bf16 %v2883_v10  ;;  %v2840_v24 = vunpack.c.l.bf16 %v2886_v23 }
  0x37   : > { %1108 = vmatmul.mubr.bf16.gmra.mrb[8].mxu1 %v3544_v32  ;;  %1044 = vmatmul.mubr.bf16.gmra.mrb[8].mxu0 %v3588_v47  ;;  %v1433_v32 = vld [vmem:[%s3976_s11 + $0x88] sm:$0xff]  ;;  %v1438_v47 = vld [vmem:[%s3976_s11 + $0xb0] sm:$0xff] }
  0x38   : > { %1115 = vmatprep.mubr.bf16.mxu1 %v3547_v34  ;;  %3018 = vmatpush3.bf16.msra.mxu1 %v3556_v35  ;;  %v3389_v34 = vpack.c.bf16 %v1732_v31, %v1731_v30  ;;  %v1434_v35 = vld [vmem:[%s3976_s11 + $0x90] sm:$0xff]  ;;  %v3620_v30 = vld [vmem:[%s3881_s23 + $0x10c] ss:$16 sps:$4 sm:$0xff]  }
  0x39   : > { %3019 = vmatprep.subr.bf16.mxu1 %v3560_v36  ;;  %1051 = vmatprep.mubr.bf16.mxu0 %v3590_v48  ;;  %v1733_v36 = vld [vmem:[%s4681_s3 + $0xc0] sm:$0xff]  ;;  %v3592_v48 = vld [vmem:[%s3881_s23 + $0x6c] ss:$16 sps:$4 sm:$0xff]  }
  0x3a   : > { %1520 = vperm.xlu0 %3514, %v1430_v22   ;;  %1525 = vperm.xlu1 %3515, %v1431_v26   ;;  %v3616_v22 = vld [vmem:[%s3881_s23 + $0xec] ss:$16 sps:$4 sm:$0xff]   ;;  %v2887_v26 = vld [vmem:[%s4082_s14 + $0x30] sm:$0xff]  }
  0x3b   : > { %3386 = vmatprep.subr.bf16.mxu0 %v3385_v28  ;;  %v2888_v31 = vld [vmem:[%s4082_s14 + $0x38] sm:$0xff]  }
  0x3c   : > { %3020 = vmatpush3.bf16.msra.mxu1 %v3561_v37  ;;  %v1734_v37 = vld [vmem:[%s4681_s3 + $0xc8] sm:$0xff]  ;;  %3388 = vmatpush3.bf16.msra.mxu0 %v3385_v28  ;;  %v2845_v28 = vunpack.c.h.bf16 %v2887_v26 }
  0x3d   : > { %3021 = vmatprep.subr.bf16.mxu1 %v3565_v40  ;;  %3390 = vmatprep.subr.bf16.mxu0 %v3389_v34  ;;  %v3393_v40 = vpack.c.bf16 %v1734_v37, %v1733_v36  ;;  %v1709_v36 = vld [vmem:[%s4681_s3] sm:$0xff]  ;;  %v1710_v37 = vld [vmem:[%s4681_s3 + $0x8] sm:$0xff] }
  0x3e   : > { %1530 = vperm.xlu0 %3514, %v1432_v29   ;;  %1535 = vperm.xlu1 %3515, %v1433_v32   ;;  %v3619_v29 = vld [vmem:[%s3881_s23 + $0xe8] ss:$16 sps:$4 sm:$0xff]   ;;  %v2848_v32 = vunpack.c.l.bf16 %v2888_v31 }
  0x3f   : > { %1116 = vmatmul.mubr.bf16.gmra.mrb[12].mxu1 %v3549_v42  ;;  %1052 = vmatmul.mubr.bf16.gmra.mrb[12].mxu0 %v3594_v51  ;;  %v1735_v42 = vld [vmem:[%s4681_s3 + $0xd0] sm:$0xff]  ;;  %v1441_v51 = vld [vmem:[%s3976_s11 + $0xc8] sm:$0xff] }
  0x40   : > { %1123 = vmatprep.mubr.bf16.mxu1 %v3552_v43  ;;  %3022 = vmatpush3.bf16.msra.mxu1 %v3566_v44  ;;  %v1736_v43 = vld [vmem:[%s4681_s3 + $0xd8] sm:$0xff]  ;;  %v1437_v44 = vld [vmem:[%s3976_s11 + $0xa8] sm:$0xff] }
  0x41   : > { %3023 = vmatprep.subr.bf16.mxu1 %v3570_v45  ;;  %1059 = vmatprep.mubr.bf16.mxu0 %v3596_v52  ;;  %v3397_v45 = vpack.c.bf16 %v1736_v43, %v1735_v42  ;;  %v1737_v52 = vld [vmem:[%s4681_s3 + $0xe0] sm:$0xff]  ;;  %v2890_v42 = vld [vmem:[%s4082_s14 + $0x48] sm:$0xff]  }
  0x42   : > { %1540 = vperm.xlu0 %3514, %v1434_v35   ;;  %1545 = vperm.xlu1 %3515, %v1435_v39   ;;  %v3409_v39 = vpack.c.bf16 %v1710_v37, %v1709_v36  ;;  %v2856_v43 = vunpack.c.l.bf16 %v2890_v42 }
  0x43   : > { %3392 = vmatpush3.bf16.msra.mxu0 %v3389_v34  ;;  %v2889_v34 = vld [vmem:[%s4082_s14 + $0x40] sm:$0xff]  }
  0x44   : > { %3024 = vmatpush3.bf16.msra.mxu1 %v3571_v46  ;;  %3394 = vmatprep.subr.bf16.mxu0 %v3393_v40  ;;  %v3589_v46 = vld [vmem:[%s3881_s23 + $0x48] ss:$16 sps:$4 sm:$0xff]   ;;  %v2852_v35 = vunpack.c.l.bf16 %v2889_v34 }
  0x46   : > { %1550 = vperm.xlu0 %3514, %v1436_v41   ;;  %1555 = vperm.xlu1 %3515, %v1437_v44   ;;  %v3623_v41 = vld [vmem:[%s3881_s23 + $0x12c] ss:$16 sps:$4 sm:$0xff]   ;;  %v1711_v44 = vld [vmem:[%s4681_s3 + $0x10] sm:$0xff] }
  0x47   : > { %1124 = vmatmul.mubr.bf16.gmra.mrb[16].mxu1 %v3554_v49  ;;  %1060 = vmatmul.mubr.bf16.gmra.mrb[16].mxu0 %v3600_v59  ;;  %v1439_v49 = vld [vmem:[%s3976_s11 + $0xb8] sm:$0xff]  ;;  %v1739_v59 = vld [vmem:[%s4681_s3 + $0xf0] sm:$0xff] }
  0x48   : > { %1131 = vmatprep.mubr.bf16.mxu1 %v3557_v50  ;;  %1067 = vmatprep.mubr.bf16.mxu0 %v3602_v61  ;;  %v1440_v50 = vld [vmem:[%s3976_s11 + $0xc0] sm:$0xff]  ;;  %v3405_v61 = vpack.c.bf16 %v1740_v60, %v1739_v59  ;;  %v1716_v59 = vld [vmem:[%s4681_s3 + $0x38] sm:$0xff] }
  0x49   : > { %3396 = vmatpush3.bf16.msra.mxu0 %v3393_v40  ;;  %v3622_v40 = vld [vmem:[%s3881_s23 + $0x108] ss:$16 sps:$4 sm:$0xff]  }
  0x4a   : > { %1560 = vperm.xlu0 %3514, %v1438_v47   ;;  %3398 = vmatprep.subr.bf16.mxu0 %v3397_v45 }
  0x4b   : > { %1565 = vperm.xlu1 %3515, %v1439_v49  }
  0x4d   : > { %3400 = vmatpush3.bf16.msra.mxu0 %v3397_v45  ;;  %v1712_v45 = vld [vmem:[%s4681_s3 + $0x18] sm:$0xff] }
  0x4e   : > { %1570 = vperm.xlu0 %3514, %v1440_v50   ;;  %v3413_v47 = vpack.c.bf16 %v1712_v45, %v1711_v44  ;;  %v1713_v50 = vld [vmem:[%s4681_s3 + $0x20] sm:$0xff] }
  0x4f   : > { %1132 = vmatmul.mubr.bf16.gmra.mrb[20].mxu1 %v3559_v54  ;;  %1068 = vmatmul.mubr.bf16.gmra.mrb[20].mxu0 %v3606_v3  ;;  %v3401_v54 = vpack.c.bf16 %v1738_v53, %v1737_v52  ;;  %v3601_v3 = vld [vmem:[%s3881_s23 + $0x88] ss:$16 sps:$4 sm:$0xff]  }
  0x50   : > { %1139 = vmatprep.mubr.bf16.mxu1 %v3562_v57  ;;  %1075 = vmatprep.mubr.bf16.mxu0 %v3608_v5  ;;  %v3598_v57 = vld [vmem:[%s3881_s23 + $0x8c] ss:$16 sps:$4 sm:$0xff]  }
  0x51   : > { %1575 = vperm.xlu1 %3515, %v1441_v51   ;;  %3402 = vmatprep.subr.bf16.mxu0 %v3401_v54  ;;  %v3604_v5 = vld [vmem:[%s3881_s23 + $0xac] ss:$16 sps:$4 sm:$0xff]  }
  0x52   : > { %3404 = vmatpush3.bf16.msra.mxu0 %v3401_v54  ;;  %1580 = vperm.xlu0 %3514, %v1442_v56   ;;  %v1714_v51 = vld [vmem:[%s4681_s3 + $0x28] sm:$0xff]  ;;  %v2892_v56 = vld [vmem:[%s4082_s14 + $0x58] sm:$0xff]  }
  0x53   : > { %3406 = vmatprep.subr.bf16.mxu0 %v3405_v61  ;;  %v3417_v53 = vpack.c.bf16 %v1714_v51, %v1713_v50  ;;  %v3625_v54 = vld [vmem:[%s3881_s23 + $0x128] ss:$16 sps:$4 sm:$0xff]   ;;  %v2865_v60 = vunpack.c.h.bf16 %v2892_v56 }
  0x55   : > { %1585 = vperm.xlu1 %3515, %v1443_v58   ;;  %v1715_v58 = vld [vmem:[%s4681_s3 + $0x30] sm:$0xff] }
  0x56   : > { %1590 = vperm.xlu0 %3514, %v1444_v62   ;;  %3408 = vmatpush3.bf16.msra.mxu0 %v3405_v61  ;;  %v3421_v61 = vpack.c.bf16 %v1716_v59, %v1715_v58  ;;  %v2893_v62 = vld [vmem:[%s4082_s14 + $0x60] sm:$0xff]  }
  0x57   : > { %1140 = vmatmul.mubr.bf16.gmra.mrb[24].mxu1 %v3564_v63  ;;  %1076 = vmatmul.mubr.bf16.gmra.mrb[24].mxu0 %v3612_v11  ;;  %v2819_v63 = vld [vmem:[%s4082_s14] sm:$0xff]   ;;  %v2828_v11 = vunpack.c.l.bf16 %v2883_v10 }
  0x58   : > { %1147 = vmatprep.mubr.bf16.mxu1 %v3567_v1  ;;  %1083 = vmatprep.mubr.bf16.mxu0 %v3614_v15  ;;  %v2820_v1 = vunpack.c.l.bf16 %v2819_v63  ;;  %v2821_v2 = vunpack.c.h.bf16 %v2819_v63  ;;  %v2884_v15 = vld [vmem:[%s4082_s14 + $0x18] sm:$0xff]   ;;  %v2868_v63 = vunpack.c.l.bf16 %v2893_v62 }
  0x59   : > { %1595 = vperm.xlu1 %3515, %v1445_v0   ;;  %v2832_v16 = vunpack.c.l.bf16 %v2884_v15  ;;  %v2833_v17 = vunpack.c.h.bf16 %v2884_v15  ;;  %3410 = vmatprep.subr.bf16.mxu0 %v3409_v39  ;;  %v1717_v0 = vld [vmem:[%s4681_s3 + $0x40] sm:$0xff]  ;;  %v1722_v15 = vld [vmem:[%s4681_s3 + $0x68] sm:$0xff] }
  0x5a   : > { %1600 = vperm.xlu0 %3514, %v1446_v4   ;;  %v3628_v4 = vld [vmem:[%s3881_s23 + $0x148] ss:$16 sps:$4 sm:$0xff]  }
  0x5f   : > { %1148 = vmatmul.mubr.bf16.gmra.mrb[28].mxu1 %v3569_v7  ;;  %1084 = vmatmul.mubr.bf16.gmra.mrb[28].mxu0 %v3618_v27  ;;  %v1447_v7 = vld [vmem:[%s3976_s11 + $0xf8] sm:$0xff]  ;;  %v2844_v27 = vunpack.c.l.bf16 %v2887_v26 }
  0x60   : > { %1188 = vmatprep.mubr.bf16.mxu1 %v3577_v9  ;;  %3249 = vmatprep.mubr.f32.mxu0 %v2820_v1  ;;  %v2825_v9 = vunpack.c.h.bf16 %v2882_v6  ;;  %v1718_v1 = vld [vmem:[%s4681_s3 + $0x48] sm:$0xff] }
  0x61   : > { %1605 = vperm.xlu1 %3515, %v1447_v7   ;;  %v2894_v6 = vld [vmem:[%s4082_s14 + $0x68] sm:$0xff]  }
  0x62   : > { %v2872_v7 = vunpack.c.l.bf16 %v2894_v6  ;;  %v2873_v10 = vunpack.c.h.bf16 %v2894_v6  ;;  %v3634_v26 = vld [vmem:[%s3881_s23 + $0x188] ss:$16 sps:$4 sm:$0xff]  }
  0x67   : > { %1189 = vmatmul.mubr.bf16.vlgmr.msra.gmra.mrb[32].mxu1 %v3575_v20  ;;  %3250 = vmatmul.mubr.f32.vlgmr.msra.gmra.mrb[32].mxu0 %v2821_v2  ;;  %v2837_v20 = vunpack.c.h.bf16 %v2885_v18  ;;  %v2869_v2 = vunpack.c.h.bf16 %v2893_v62  ;;  %v3631_v18 = vld [vmem:[%s3881_s23 + $0x168] ss:$16 sps:$4 sm:$0xff]  }
  0x68   : > { %1196 = vmatprep.mubr.bf16.mxu1 %v3580_v25  ;;  %3252 = vmatprep.mubr.f32.mxu0 %v2824_v8  ;;  %v2841_v25 = vunpack.c.h.bf16 %v2886_v23  ;;  %v1719_v8 = vld [vmem:[%s4681_s3 + $0x50] sm:$0xff]  ;;  %v1724_v23 = vld [vmem:[%s4681_s3 + $0x78] sm:$0xff] }
  0x69   : > { %3412 = vmatpush3.bf16.msra.mxu0 %v3409_v39 }
  0x6a   : > { %3414 = vmatprep.subr.bf16.mxu0 %v3413_v47 }
  0x6b   : > { %3253 = vmatmul.mubr.f32.gmra.mrb[34].mxu0 %v2825_v9  ;;  %v1720_v9 = vld [vmem:[%s4681_s3 + $0x58] sm:$0xff] }
  0x6c   : > { %3255 = vmatprep.mubr.f32.mxu0 %v2828_v11  ;;  %v3429_v11 = vpack.c.bf16 %v1720_v9, %v1719_v8 }
  0x6d   : > { %3416 = vmatpush3.bf16.msra.mxu0 %v3413_v47 }
  0x6e   : > { %3418 = vmatprep.subr.bf16.mxu0 %v3417_v53 }
  0x6f   : > { %1197 = vmatmul.mubr.bf16.gmra.mrb[36].mxu1 %v3583_v33  ;;  %3256 = vmatmul.mubr.f32.gmra.mrb[36].mxu0 %v2829_v12  ;;  %v2849_v33 = vunpack.c.h.bf16 %v2888_v31  ;;  %v2895_v12 = vld [vmem:[%s4082_s14 + $0x70] sm:$0xff]   ;;  %v3641_v31 = vld [vmem:[%s3881_s23 + $0x1ec] ss:$16 sps:$4 sm:$0xff]  }
  0x70   : > { %1204 = vmatprep.mubr.bf16.mxu1 %v3586_v38  ;;  %3258 = vmatprep.mubr.f32.mxu0 %v2832_v16  ;;  %v2853_v38 = vunpack.c.h.bf16 %v2889_v34  ;;  %v2877_v16 = vunpack.c.h.bf16 %v2895_v12 }
  0x71   : > { %3420 = vmatpush3.bf16.msra.mxu0 %v3417_v53 }
  0x72   : > { %3422 = vmatprep.subr.bf16.mxu0 %v3421_v61 }
  0x73   : > { %3259 = vmatmul.mubr.f32.gmra.mrb[38].mxu0 %v2833_v17 }
  0x74   : > { %3261 = vmatprep.mubr.f32.mxu0 %v2836_v19  ;;  %v3632_v19 = vld [vmem:[%s3881_s23 + $0x18c] ss:$16 sps:$4 sm:$0xff]  }
  0x75   : > { %3424 = vmatpush3.bf16.msra.mxu0 %v3421_v61 }
  0x77   : > { %1205 = vmatmul.mubr.bf16.gmra.mrb[40].mxu1 %v3589_v46  ;;  %3262 = vmatmul.mubr.f32.gmra.mrb[40].mxu0 %v2837_v20  ;;  %v2857_v46 = vunpack.c.h.bf16 %v2890_v42  ;;  %v2896_v20 = vld [vmem:[%s4082_s14 + $0x78] sm:$0xff]  }
  0x78   : > { %1212 = vmatprep.mubr.bf16.mxu1 %v3592_v48  ;;  %3264 = vmatprep.mubr.f32.mxu0 %v2840_v24  ;;  %v2891_v48 = vld [vmem:[%s4082_s14 + $0x50] sm:$0xff]   ;;  %v2881_v24 = vunpack.c.h.bf16 %v2896_v20 }
  0x79   : > { %v2860_v49 = vunpack.c.l.bf16 %v2891_v48  ;;  %v2861_v52 = vunpack.c.h.bf16 %v2891_v48 }
  0x7b   : > { %3265 = vmatmul.mubr.f32.gmra.mrb[42].mxu0 %v2841_v25 }
  0x7c   : > { %3267 = vmatprep.mubr.f32.mxu0 %v2844_v27  ;;  %v3635_v27 = vld [vmem:[%s3881_s23 + $0x1ac] ss:$16 sps:$4 sm:$0xff]  }
  0x7f   : > { %1213 = vmatmul.mubr.bf16.gmra.mrb[44].mxu1 %v3595_v55  ;;  %3268 = vmatmul.mubr.f32.gmra.mrb[44].mxu0 %v2845_v28  ;;  %v3626_v55 = vld [vmem:[%s3881_s23 + $0x14c] ss:$16 sps:$4 sm:$0xff]   ;;  %v3637_v28 = vld [vmem:[%s3881_s23 + $0x1a8] ss:$16 sps:$4 sm:$0xff]  }
  0x80   : > { %1220 = vmatprep.mubr.bf16.mxu1 %v3598_v57  ;;  %3270 = vmatprep.mubr.f32.mxu0 %v2848_v32  ;;  %v2864_v57 = vunpack.c.l.bf16 %v2892_v56  ;;  %v3643_v32 = vld [vmem:[%s3881_s23 + $0x1e8] ss:$16 sps:$4 sm:$0xff]  }
  0x83   : > { %3271 = vmatmul.mubr.f32.gmra.mrb[46].mxu0 %v2849_v33 }
  0x84   : > { %3273 = vmatprep.mubr.f32.mxu0 %v2852_v35 }
  0x87   : > { %1221 = vmatmul.mubr.bf16.gmra.mrb[48].mxu1 %v3601_v3  ;;  %3274 = vmatmul.mubr.f32.gmra.mrb[48].mxu0 %v2853_v38  ;;  %v3425_v3 = vpack.c.bf16 %v1718_v1, %v1717_v0 }
  0x88   : > { %1228 = vmatprep.mubr.bf16.mxu1 %v3604_v5  ;;  %3276 = vmatprep.mubr.f32.mxu0 %v2856_v43  ;;  %v3629_v5 = vld [vmem:[%s3881_s23 + $0x16c] ss:$16 sps:$4 sm:$0xff]  }
  0x89   : > { %3426 = vmatprep.subr.bf16.mxu0 %v3425_v3 }
  0x8a   : > { %3428 = vmatpush3.bf16.msra.mxu0 %v3425_v3 }
  0x8b   : > { %3277 = vmatmul.mubr.f32.gmra.mrb[50].mxu0 %v2857_v46  ;;  %3430 = vmatprep.subr.bf16.mxu0 %v3429_v11 }
  0x8c   : > { %3279 = vmatprep.mubr.f32.mxu0 %v2860_v49 }
  0x8e   : > { %3432 = vmatpush3.bf16.msra.mxu0 %v3429_v11 }
  0x8f   : > { %1229 = vmatmul.mubr.bf16.gmra.mrb[52].mxu1 %v3607_v13  ;;  %3280 = vmatmul.mubr.f32.gmra.mrb[52].mxu0 %v2861_v52  ;;  %v2876_v13 = vunpack.c.l.bf16 %v2895_v12 }
  0x90   : > { %1236 = vmatprep.mubr.bf16.mxu1 %v3610_v14  ;;  %3282 = vmatprep.mubr.f32.mxu0 %v2864_v57  ;;  %v1721_v14 = vld [vmem:[%s4681_s3 + $0x60] sm:$0xff] }
  0x91   : > { %v3433_v17 = vpack.c.bf16 %v1722_v15, %v1721_v14 }
  0x93   : > { %3283 = vmatmul.mubr.f32.gmra.mrb[54].mxu0 %v2865_v60  ;;  %3434 = vmatprep.subr.bf16.mxu0 %v3433_v17 }
  0x94   : > { %3285 = vmatprep.mubr.f32.mxu0 %v2868_v63  ;;  %3436 = vmatpush3.bf16.msra.mxu0 %v3433_v17 }
  0x97   : > { %1237 = vmatmul.mubr.bf16.gmra.mrb[56].mxu1 %v3613_v21  ;;  %3286 = vmatmul.mubr.f32.gmra.mrb[56].mxu0 %v2869_v2  ;;  %v2880_v21 = vunpack.c.l.bf16 %v2896_v20 }
  0x98   : > { %1244 = vmatprep.mubr.bf16.mxu1 %v3616_v22  ;;  %3288 = vmatprep.mubr.f32.mxu0 %v2872_v7  ;;  %v1723_v22 = vld [vmem:[%s4681_s3 + $0x70] sm:$0xff] }
  0x99   : > { %v3437_v25 = vpack.c.bf16 %v1724_v23, %v1723_v22 }
  0x9b   : > { %3289 = vmatmul.mubr.f32.gmra.mrb[58].mxu0 %v2873_v10  ;;  %3438 = vmatprep.subr.bf16.mxu0 %v3437_v25 }
  0x9c   : > { %3291 = vmatprep.mubr.f32.mxu0 %v2876_v13  ;;  %3440 = vmatpush3.bf16.msra.mxu0 %v3437_v25 }
  0x9f   : > { %1245 = vmatmul.mubr.bf16.gmra.mrb[60].mxu1 %v3619_v29  ;;  %3292 = vmatmul.mubr.f32.gmra.mrb[60].mxu0 %v2877_v16  ;;  %v3638_v29 = vld [vmem:[%s3881_s23 + $0x1cc] ss:$16 sps:$4 sm:$0xff]  }
  0xa0   : > { %1252 = vmatprep.mubr.bf16.mxu1 %v3620_v30  ;;  %3294 = vmatprep.mubr.f32.mxu0 %v2880_v21  ;;  %v3640_v30 = vld [vmem:[%s3881_s23 + $0x1c8] ss:$16 sps:$4 sm:$0xff]  }
  0xa3   : > { %3295 = vmatmul.mubr.f32.gmra.mrb[62].mxu0 %v2881_v24 }
  0xa7   : > { %1253 = vmatmul.mubr.bf16.gmra.mrb[64].mxu1 %v3622_v40 }
  0xa8   : > { %1260 = vmatprep.mubr.bf16.mxu1 %v3623_v41 }
  0xaf   : > { %1261 = vmatmul.mubr.bf16.gmra.mrb[68].mxu1 %v3625_v54 }
  0xb0   : > { %1268 = vmatprep.mubr.bf16.mxu1 %v3626_v55 }
  0xb7   : > { %1269 = vmatmul.mubr.bf16.gmra.mrb[72].mxu1 %v3628_v4 }
  0xb8   : > { %1276 = vmatprep.mubr.bf16.mxu1 %v3629_v5 }
  0xbf   : > { %1277 = vmatmul.mubr.bf16.gmra.mrb[76].mxu1 %v3631_v18 }
  0xc0   : > { %1284 = vmatprep.mubr.bf16.mxu1 %v3632_v19 }
  0xc7   : > { %1285 = vmatmul.mubr.bf16.gmra.mrb[80].mxu1 %v3634_v26 }
  0xc8   : > { %1292 = vmatprep.mubr.bf16.mxu1 %v3635_v27 }
  0xcf   : > { %1293 = vmatmul.mubr.bf16.gmra.mrb[84].mxu1 %v3637_v28 }
  0xd0   : > { %1300 = vmatprep.mubr.bf16.mxu1 %v3638_v29 }
  0xd7   : > { %1301 = vmatmul.mubr.bf16.gmra.mrb[88].mxu1 %v3640_v30 }
  0xd8   : > { %1308 = vmatprep.mubr.bf16.mxu1 %v3641_v31 }
  0xdf   : > { %1309 = vmatmul.mubr.bf16.gmra.mrb[92].mxu1 %v3643_v32 }
  0xfa   : > { %v2961_v33 = vpop.f32.mrb[0].mxu1  ;;  %v2913_v45 = vpop.f32.mrb[0].mxu0 }
  0xfb   : > { %v2962_v34 = vpop.f32.mrb[1].mxu1  ;;  %v2914_v46 = vpop.f32.mrb[1].mxu0 }
  0xfc   : > { %v4174_v35 = vadd.f32 %v2962_v34, %v2961_v33  ;;  %v2964_v36 = vpop.f32.mrb[2].mxu1  ;;  %v4182_v47 = vadd.f32 %v2914_v46, %v2913_v45  ;;  %v2916_v48 = vpop.f32.mrb[2].mxu0 }
  0xfd   : > { %v2965_v37 = vpop.f32.mrb[3].mxu1  ;;  %v2917_v49 = vpop.f32.mrb[3].mxu0 }
  0xfe   : > { %v4176_v38 = vadd.f32 %v2965_v37, %v2964_v36  ;;  %v4184_v51 = vadd.f32 %v2917_v49, %v2916_v48 }
 0x102   : > { %v2967_v39 = vpop.f32.mrb[4].mxu1  ;;  %v2919_v57 = vpop.f32.mrb[4].mxu0 }
 0x103   : > { %v2968_v40 = vpop.f32.mrb[5].mxu1  ;;  %v2920_v58 = vpop.f32.mrb[5].mxu0 }
 0x104   : > { %v4178_v41 = vadd.f32 %v2968_v40, %v2967_v39  ;;  %v2970_v42 = vpop.f32.mrb[6].mxu1  ;;  %v4190_v59 = vadd.f32 %v2920_v58, %v2919_v57  ;;  %v2922_v60 = vpop.f32.mrb[6].mxu0 }
 0x105   : > { %v2971_v43 = vpop.f32.mrb[7].mxu1  ;;  %v2923_v61 = vpop.f32.mrb[7].mxu0 }
 0x106   : > { %v4180_v44 = vadd.f32 %v2971_v43, %v2970_v42  ;;  %v4192_v63 = vadd.f32 %v2923_v61, %v2922_v60 }
 0x10a   : > { %v2973_v50 = vpop.f32.mrb[8].mxu1  ;;  %v2925_v5 = vpop.f32.mrb[8].mxu0 }
 0x10b   : > { %v2974_v52 = vpop.f32.mrb[9].mxu1  ;;  %v2926_v6 = vpop.f32.mrb[9].mxu0 }
 0x10c   : > { %v4186_v53 = vadd.f32 %v2974_v52, %v2973_v50  ;;  %v2976_v54 = vpop.f32.mrb[10].mxu1  ;;  %v4198_v7 = vadd.f32 %v2926_v6, %v2925_v5  ;;  %v2928_v8 = vpop.f32.mrb[10].mxu0 }
 0x10d   : > { %v2977_v55 = vpop.f32.mrb[11].mxu1  ;;  %v2929_v9 = vpop.f32.mrb[11].mxu0 }
 0x10e   : > { %v4188_v56 = vadd.f32 %v2977_v55, %v2976_v54  ;;  %v4200_v11 = vadd.f32 %v2929_v9, %v2928_v8  ;;  %v1451_v9 = vpop.permute.xlu0 %1450 }
 0x112   : > { %v2979_v62 = vpop.f32.mrb[12].mxu1  ;;  %v2931_v17 = vpop.f32.mrb[12].mxu0 }
 0x113   : > { %v2980_v0 = vpop.f32.mrb[13].mxu1  ;;  %v2932_v18 = vpop.f32.mrb[13].mxu0 }
 0x114   : > { %v4194_v1 = vadd.f32 %v2980_v0, %v2979_v62  ;;  %v2982_v2 = vpop.f32.mrb[14].mxu1  ;;  %v4206_v19 = vadd.f32 %v2932_v18, %v2931_v17  ;;  %v2934_v20 = vpop.f32.mrb[14].mxu0 }
 0x115   : > { %v2983_v3 = vpop.f32.mrb[15].mxu1  ;;  %v2935_v21 = vpop.f32.mrb[15].mxu0 }
 0x116   : > { %v4196_v4 = vadd.f32 %v2983_v3, %v2982_v2  ;;  %v4208_v23 = vadd.f32 %v2935_v21, %v2934_v20 }
 0x11a   : > { %v2985_v10 = vpop.f32.mrb[16].mxu1  ;;  %v2937_v29 = vpop.f32.mrb[16].mxu0 }
 0x11b   : > { %v2986_v12 = vpop.f32.mrb[17].mxu1  ;;  %v2938_v30 = vpop.f32.mrb[17].mxu0 }
 0x11c   : > { %v4202_v13 = vadd.f32 %v2986_v12, %v2985_v10  ;;  %v2988_v14 = vpop.f32.mrb[18].mxu1  ;;  %v4214_v31 = vadd.f32 %v2938_v30, %v2937_v29  ;;  %v2940_v32 = vpop.f32.mrb[18].mxu0 }
 0x11d   : > { %v2989_v15 = vpop.f32.mrb[19].mxu1  ;;  %v2941_v33 = vpop.f32.mrb[19].mxu0 }
 0x11e   : > { %v4204_v16 = vadd.f32 %v2989_v15, %v2988_v14  ;;  %v4216_v36 = vadd.f32 %v2941_v33, %v2940_v32  ;;  %v1456_v29 = vpop.permute.xlu0 %1455 }
 0x122   : > { %v2991_v22 = vpop.f32.mrb[20].mxu1  ;;  %v2943_v45 = vpop.f32.mrb[20].mxu0 }
 0x123   : > { %v2992_v24 = vpop.f32.mrb[21].mxu1  ;;  %v2944_v46 = vpop.f32.mrb[21].mxu0 }
 0x124   : > { %v4210_v25 = vadd.f32 %v2992_v24, %v2991_v22  ;;  %v2994_v26 = vpop.f32.mrb[22].mxu1  ;;  %v4222_v48 = vadd.f32 %v2944_v46, %v2943_v45  ;;  %v2946_v49 = vpop.f32.mrb[22].mxu0 }
 0x125   : > { %v2995_v27 = vpop.f32.mrb[23].mxu1  ;;  %v2947_v50 = vpop.f32.mrb[23].mxu0 }
 0x126   : > { %v4212_v28 = vadd.f32 %v2995_v27, %v2994_v26  ;;  %v4224_v54 = vadd.f32 %v2947_v50, %v2946_v49 }
 0x12a   : > { %v2997_v34 = vpop.f32.mrb[24].mxu1  ;;  %v2949_v62 = vpop.f32.mrb[24].mxu0 }
 0x12b   : > { %v2998_v37 = vpop.f32.mrb[25].mxu1  ;;  %v2950_v0 = vpop.f32.mrb[25].mxu0 }
 0x12c   : > { %v4218_v39 = vadd.f32 %v2998_v37, %v2997_v34  ;;  %v3000_v40 = vpop.f32.mrb[26].mxu1  ;;  %v4230_v2 = vadd.f32 %v2950_v0, %v2949_v62  ;;  %v2952_v3 = vpop.f32.mrb[26].mxu0 }
 0x12d   : > { %v3001_v42 = vpop.f32.mrb[27].mxu1  ;;  %v2953_v5 = vpop.f32.mrb[27].mxu0 }
 0x12e   : > { %v4220_v43 = vadd.f32 %v3001_v42, %v3000_v40  ;;  %v4232_v8 = vadd.f32 %v2953_v5, %v2952_v3  ;;  %v1461_v37 = vpop.permute.xlu1 %1460 }
 0x132   : > { %v3003_v52 = vpop.f32.mrb[28].mxu1  ;;  %v2955_v20 = vpop.f32.mrb[28].mxu0 }
 0x133   : > { %v3004_v55 = vpop.f32.mrb[29].mxu1  ;;  %v2956_v21 = vpop.f32.mrb[29].mxu0 }
 0x134   : > { %v4226_v57 = vadd.f32 %v3004_v55, %v3003_v52  ;;  %v3006_v58 = vpop.f32.mrb[30].mxu1  ;;  %v4236_v26 = vadd.f32 %v2956_v21, %v2955_v20  ;;  %v2958_v27 = vpop.f32.mrb[30].mxu0 }
 0x135   : > { %v3007_v60 = vpop.f32.mrb[31].mxu1  ;;  %v2959_v30 = vpop.f32.mrb[31].mxu0 }
 0x136   : > { %v4228_v61 = vadd.f32 %v3007_v60, %v3006_v58  ;;  %v4238_v34 = vadd.f32 %v2959_v30, %v2958_v27  ;;  %v1466_v52 = vpop.permute.xlu1 %1465 }
 0x13a   : > { %v3025_v6 = vpop.f32.mrb[32].mxu1 }
 0x13b   : > { %v3026_v10 = vpop.f32.mrb[33].mxu1 }
 0x13c   : > { %v3027_v12 = vadd.f32 %v3026_v10, %v3025_v6  ;;  %v3028_v14 = vpop.f32.mrb[34].mxu1 }
 0x13d   : > { %v3029_v15 = vpop.f32.mrb[35].mxu1 }
 0x13e   : > { %v1191_v17 = vadd.f32 %v3027_v12, %v4182_v47  ;;  %v3030_v18 = vadd.f32 %v3029_v15, %v3028_v14  ;;  %v1476_v12 = vpop.permute.xlu1 %1475 }
 0x140   : > { %v1194_v22 = vadd.f32 %v3030_v18, %v4184_v51  ;;  %v1608_v24 = vmul.f32 %v1451_v9, %v1191_v17  ;;  %v1471_v9 = vpop.permute.xlu0 %1470 }
 0x142   : > { %v1609_v32 = vmul.f32 %v1456_v29, %v1194_v22  ;;  %v3031_v33 = vpop.f32.mrb[36].mxu1  ;;  %3329 = vmatprep.mubr.f32.mxu0 %v1608_v24  ;;  %v1486_v29 = vpop.permute.xlu1 %1485 }
 0x143   : > { %v3032_v40 = vpop.f32.mrb[37].mxu1 }
 0x144   : > { %v3033_v42 = vadd.f32 %v3032_v40, %v3031_v33  ;;  %v3034_v47 = vpop.f32.mrb[38].mxu1  ;;  %3330 = vmatmul.mubr.f32.vlgmr.msra.gmra.mrb[32].mxu0 %v1609_v32  ;;  %v1481_v24 = vpop.permute.xlu0 %1480 }
 0x145   : > { %v3035_v45 = vpop.f32.mrb[39].mxu1 }
 0x146   : > { %v1199_v46 = vadd.f32 %v3033_v42, %v4190_v59  ;;  %v3036_v51 = vadd.f32 %v3035_v45, %v3034_v47 }
 0x148   : > { %v1202_v49 = vadd.f32 %v3036_v51, %v4192_v63  ;;  %v1610_v50 = vmul.f32 %v1461_v37, %v1199_v46  ;;  %v1491_v45 = vpop.permute.xlu0 %1490  ;;  %v1496_v51 = vpop.permute.xlu1 %1495 }
 0x14a   : > { %v3037_v55 = vpop.f32.mrb[40].mxu1  ;;  %3332 = vmatprep.mubr.f32.mxu0 %v1610_v50  ;;  %v1611_v58 = vmul.f32 %v1466_v52, %v1202_v49 }
 0x14b   : > { %v3038_v60 = vpop.f32.mrb[41].mxu1 }
 0x14c   : > { %v3039_v62 = vadd.f32 %v3038_v60, %v3037_v55  ;;  %v3040_v0 = vpop.f32.mrb[42].mxu1  ;;  %3333 = vmatmul.mubr.f32.gmra.mrb[34].mxu0 %v1611_v58 }
 0x14d   : > { %v3041_v3 = vpop.f32.mrb[43].mxu1 }
 0x14e   : > { %v1207_v5 = vadd.f32 %v3039_v62, %v4198_v7  ;;  %v3042_v6 = vadd.f32 %v3041_v3, %v3040_v0  ;;  %v1501_v0 = vpop.permute.xlu0 %1500 }
 0x150   : > { %v1210_v10 = vadd.f32 %v3042_v6, %v4200_v11  ;;  %v1612_v59 = vmul.f32 %v1471_v9, %v1207_v5  ;;  %v1506_v5 = vpop.permute.xlu1 %1505 }
 0x152   : > { %v3043_v14 = vpop.f32.mrb[44].mxu1  ;;  %3335 = vmatprep.mubr.f32.mxu0 %v1612_v59  ;;  %v1613_v63 = vmul.f32 %v1476_v12, %v1210_v10 }
 0x153   : > { %v3044_v15 = vpop.f32.mrb[45].mxu1 }
 0x154   : > { %v3045_v17 = vadd.f32 %v3044_v15, %v3043_v14  ;;  %v3046_v18 = vpop.f32.mrb[46].mxu1  ;;  %3336 = vmatmul.mubr.f32.gmra.mrb[36].mxu0 %v1613_v63  ;;  %v1511_v15 = vpop.permute.xlu0 %1510 }
 0x155   : > { %v3047_v20 = vpop.f32.mrb[47].mxu1 }
 0x156   : > { %v1215_v21 = vadd.f32 %v3045_v17, %v4206_v19  ;;  %v3048_v22 = vadd.f32 %v3047_v20, %v3046_v18  ;;  %v1516_v18 = vpop.permute.xlu1 %1515 }
 0x158   : > { %v1218_v7 = vadd.f32 %v3048_v22, %v4208_v23  ;;  %v1614_v27 = vmul.f32 %v1481_v24, %v1215_v21 }
 0x15a   : > { %v3049_v30 = vpop.f32.mrb[48].mxu1  ;;  %3338 = vmatprep.mubr.f32.mxu0 %v1614_v27  ;;  %v1615_v11 = vmul.f32 %v1486_v29, %v1218_v7 }
 0x15b   : > { %v3050_v32 = vpop.f32.mrb[49].mxu1 }
 0x15c   : > { %v3051_v33 = vadd.f32 %v3050_v32, %v3049_v30  ;;  %v3052_v37 = vpop.f32.mrb[50].mxu1  ;;  %3339 = vmatmul.mubr.f32.gmra.mrb[38].mxu0 %v1615_v11  ;;  %v1521_v30 = vpop.permute.xlu0 %1520 }
 0x15d   : > { %v3053_v40 = vpop.f32.mrb[51].mxu1  ;;  %v1526_v32 = vpop.permute.xlu1 %1525 }
 0x15e   : > { %v1223_v42 = vadd.f32 %v3051_v33, %v4214_v31  ;;  %v3054_v47 = vadd.f32 %v3053_v40, %v3052_v37 }
 0x160   : > { %v1226_v19 = vadd.f32 %v3054_v47, %v4216_v36  ;;  %v1616_v46 = vmul.f32 %v1491_v45, %v1223_v42 }
 0x162   : > { %v3055_v49 = vpop.f32.mrb[52].mxu1  ;;  %3341 = vmatprep.mubr.f32.mxu0 %v1616_v46  ;;  %v1617_v23 = vmul.f32 %v1496_v51, %v1226_v19  ;;  %v1531_v46 = vpop.permute.xlu0 %1530 }
 0x163   : > { %v3056_v50 = vpop.f32.mrb[53].mxu1 }
 0x164   : > { %v3057_v52 = vadd.f32 %v3056_v50, %v3055_v49  ;;  %v3058_v55 = vpop.f32.mrb[54].mxu1  ;;  %3342 = vmatmul.mubr.f32.gmra.mrb[40].mxu0 %v1617_v23  ;;  %v1536_v49 = vpop.permute.xlu1 %1535 }
 0x165   : > { %v3059_v58 = vpop.f32.mrb[55].mxu1 }
 0x166   : > { %v1231_v60 = vadd.f32 %v3057_v52, %v4222_v48  ;;  %v3060_v62 = vadd.f32 %v3059_v58, %v3058_v55 }
 0x168   : > { %v1234_v31 = vadd.f32 %v3060_v62, %v4224_v54  ;;  %v1618_v3 = vmul.f32 %v1501_v0, %v1231_v60  ;;  %v1541_v0 = vpop.permute.xlu0 %1540 }
 0x16a   : > { %v3061_v6 = vpop.f32.mrb[56].mxu1  ;;  %3344 = vmatprep.mubr.f32.mxu0 %v1618_v3  ;;  %v1619_v36 = vmul.f32 %v1506_v5, %v1234_v31  ;;  %v1546_v3 = vpop.permute.xlu1 %1545 }
 0x16b   : > { %v3062_v9 = vpop.f32.mrb[57].mxu1 }
 0x16c   : > { %v3063_v10 = vadd.f32 %v3062_v9, %v3061_v6  ;;  %v3064_v59 = vpop.f32.mrb[58].mxu1  ;;  %3345 = vmatmul.mubr.f32.gmra.mrb[42].mxu0 %v1619_v36 }
 0x16d   : > { %v3065_v12 = vpop.f32.mrb[59].mxu1 }
 0x16e   : > { %v1239_v14 = vadd.f32 %v3063_v10, %v4230_v2  ;;  %v3066_v63 = vadd.f32 %v3065_v12, %v3064_v59 }
 0x170   : > { %v1242_v48 = vadd.f32 %v3066_v63, %v4232_v8  ;;  %v1620_v17 = vmul.f32 %v1511_v15, %v1239_v14  ;;  %v1551_v14 = vpop.permute.xlu0 %1550  ;;  %v1556_v15 = vpop.permute.xlu1 %1555 }
 0x172   : > { %v3067_v20 = vpop.f32.mrb[60].mxu1  ;;  %3347 = vmatprep.mubr.f32.mxu0 %v1620_v17  ;;  %v1621_v54 = vmul.f32 %v1516_v18, %v1242_v48 }
 0x173   : > { %v3068_v21 = vpop.f32.mrb[61].mxu1 }
 0x174   : > { %v3069_v22 = vadd.f32 %v3068_v21, %v3067_v20  ;;  %v3070_v24 = vpop.f32.mrb[62].mxu1  ;;  %3348 = vmatmul.mubr.f32.gmra.mrb[44].mxu0 %v1621_v54 }
 0x175   : > { %v3071_v7 = vpop.f32.mrb[63].mxu1 }
 0x176   : > { %v1247_v27 = vadd.f32 %v3069_v22, %v4236_v26  ;;  %v3072_v29 = vadd.f32 %v3071_v7, %v3070_v24  ;;  %v1561_v24 = vpop.permute.xlu0 %1560 }
 0x178   : > { %v1250_v2 = vadd.f32 %v3072_v29, %v4238_v34  ;;  %v1622_v11 = vmul.f32 %v1521_v30, %v1247_v27  ;;  %v1566_v27 = vpop.permute.xlu1 %1565 }
 0x17a   : > { %v3073_v33 = vpop.f32.mrb[64].mxu1  ;;  %3350 = vmatprep.mubr.f32.mxu0 %v1622_v11  ;;  %v1623_v8 = vmul.f32 %v1526_v32, %v1250_v2 }
 0x17b   : > { %v3074_v37 = vpop.f32.mrb[65].mxu1 }
 0x17c   : > { %v3075_v40 = vadd.f32 %v3074_v37, %v3073_v33  ;;  %v3076_v42 = vpop.f32.mrb[66].mxu1  ;;  %3351 = vmatmul.mubr.f32.gmra.mrb[46].mxu0 %v1623_v8  ;;  %v1571_v37 = vpop.permute.xlu0 %1570 }
 0x17d   : > { %v3077_v47 = vpop.f32.mrb[67].mxu1 }
 0x17e   : > { %v1255_v45 = vadd.f32 %v3075_v40, %v4174_v35  ;;  %v3078_v19 = vadd.f32 %v3077_v47, %v3076_v42  ;;  %v1576_v42 = vpop.permute.xlu1 %1575 }
 0x180   : > { %v1258_v26 = vadd.f32 %v3078_v19, %v4176_v38  ;;  %v1624_v51 = vmul.f32 %v1531_v46, %v1255_v45 }
 0x182   : > { %v3079_v23 = vpop.f32.mrb[68].mxu1  ;;  %3353 = vmatprep.mubr.f32.mxu0 %v1624_v51  ;;  %v1625_v34 = vmul.f32 %v1536_v49, %v1258_v26 }
 0x183   : > { %v3080_v50 = vpop.f32.mrb[69].mxu1 }
 0x184   : > { %v3081_v52 = vadd.f32 %v3080_v50, %v3079_v23  ;;  %v3082_v55 = vpop.f32.mrb[70].mxu1  ;;  %3354 = vmatmul.mubr.f32.gmra.mrb[48].mxu0 %v1625_v34  ;;  %v1581_v23 = vpop.permute.xlu0 %1580 }
 0x185   : > { %v3083_v58 = vpop.f32.mrb[71].mxu1  ;;  %v1586_v50 = vpop.permute.xlu1 %1585 }
 0x186   : > { %v1263_v60 = vadd.f32 %v3081_v52, %v4178_v41  ;;  %v3084_v62 = vadd.f32 %v3083_v58, %v3082_v55 }
 0x188   : > { %v1266_v35 = vadd.f32 %v3084_v62, %v4180_v44  ;;  %v1626_v31 = vmul.f32 %v1541_v0, %v1263_v60 }
 0x18a   : > { %v3085_v5 = vpop.f32.mrb[72].mxu1  ;;  %3356 = vmatprep.mubr.f32.mxu0 %v1626_v31  ;;  %v1627_v38 = vmul.f32 %v1546_v3, %v1266_v35  ;;  %v1591_v31 = vpop.permute.xlu0 %1590 }
 0x18b   : > { %v3086_v6 = vpop.f32.mrb[73].mxu1 }
 0x18c   : > { %v3087_v36 = vadd.f32 %v3086_v6, %v3085_v5  ;;  %v3088_v9 = vpop.f32.mrb[74].mxu1  ;;  %3357 = vmatmul.mubr.f32.gmra.mrb[50].mxu0 %v1627_v38  ;;  %v1596_v5 = vpop.permute.xlu1 %1595 }
 0x18d   : > { %v3089_v10 = vpop.f32.mrb[75].mxu1 }
 0x18e   : > { %v1271_v59 = vadd.f32 %v3087_v36, %v4186_v53  ;;  %v3090_v12 = vadd.f32 %v3089_v10, %v3088_v9 }
 0x190   : > { %v1274_v41 = vadd.f32 %v3090_v12, %v4188_v56  ;;  %v1628_v63 = vmul.f32 %v1551_v14, %v1271_v59  ;;  %v1601_v14 = vpop.permute.xlu0 %1600 }
 0x192   : > { %v3091_v48 = vpop.f32.mrb[76].mxu1  ;;  %3359 = vmatprep.mubr.f32.mxu0 %v1628_v63  ;;  %v1629_v44 = vmul.f32 %v1556_v15, %v1274_v41  ;;  %v1606_v63 = vpop.permute.xlu1 %1605  ;;  %v2230_v15 = vlaneseq }
 0x193   : > { %v3092_v17 = vpop.f32.mrb[77].mxu1 }
 0x194   : > { %v3093_v18 = vadd.f32 %v3092_v17, %v3091_v48  ;;  %v3094_v20 = vpop.f32.mrb[78].mxu1  ;;  %3360 = vmatmul.mubr.f32.gmra.mrb[52].mxu0 %v1629_v44  ;;  %v4270_v48 = vand.u32 127, %v2230_v15  ;;  %v4275_v44 = vld [vmem:[%s4682_s4] ss:$0 sm:$0xff] }
 0x195   : > { %v3095_v54 = vpop.f32.mrb[79].mxu1 }
 0x196   : > { %v1279_v21 = vadd.f32 %v3093_v18, %v4194_v1  ;;  %v3096_v22 = vadd.f32 %v3095_v54, %v3094_v20  ;;  %vm2232_vm0 = vcmp.lt.s32.totalorder %v4270_v48, 4 }
 0x198   : > { %v1282_v53 = vadd.f32 %v3096_v22, %v4196_v4  ;;  %v1630_v7 = vmul.f32 %v1561_v24, %v1279_v21 }
 0x19a   : > { %v3097_v29 = vpop.f32.mrb[80].mxu1  ;;  %3362 = vmatprep.mubr.f32.mxu0 %v1630_v7  ;;  %v1631_v56 = vmul.f32 %v1566_v27, %v1282_v53 }
 0x19b   : > { %v3098_v30 = vpop.f32.mrb[81].mxu1 }
 0x19c   : > { %v3099_v2 = vadd.f32 %v3098_v30, %v3097_v29  ;;  %v3100_v11 = vpop.f32.mrb[82].mxu1  ;;  %3363 = vmatmul.mubr.f32.gmra.mrb[54].mxu0 %v1631_v56 }
 0x19d   : > { %v3101_v32 = vpop.f32.mrb[83].mxu1 }
 0x19e   : > { %v1287_v33 = vadd.f32 %v3099_v2, %v4202_v13  ;;  %v3102_v8 = vadd.f32 %v3101_v32, %v3100_v11 }
 0x1a0   : > { %v1290_v1 = vadd.f32 %v3102_v8, %v4204_v16  ;;  %v1632_v40 = vmul.f32 %v1571_v37, %v1287_v33 }
 0x1a2   : > { %v3103_v47 = vpop.f32.mrb[84].mxu1  ;;  %3365 = vmatprep.mubr.f32.mxu0 %v1632_v40  ;;  %v1633_v4 = vmul.f32 %v1576_v42, %v1290_v1 }
 0x1a3   : > { %v3104_v45 = vpop.f32.mrb[85].mxu1 }
 0x1a4   : > { %v3105_v19 = vadd.f32 %v3104_v45, %v3103_v47  ;;  %v3106_v46 = vpop.f32.mrb[86].mxu1  ;;  %3366 = vmatmul.mubr.f32.gmra.mrb[56].mxu0 %v1633_v4 }
 0x1a5   : > { %v3107_v26 = vpop.f32.mrb[87].mxu1 }
 0x1a6   : > { %v1295_v51 = vadd.f32 %v3105_v19, %v4210_v25  ;;  %v3108_v49 = vadd.f32 %v3107_v26, %v3106_v46 }
 0x1a8   : > { %v1298_v13 = vadd.f32 %v3108_v49, %v4212_v28  ;;  %v1634_v34 = vmul.f32 %v1581_v23, %v1295_v51 }
 0x1aa   : > { %v3109_v52 = vpop.f32.mrb[88].mxu1  ;;  %3368 = vmatprep.mubr.f32.mxu0 %v1634_v34  ;;  %v1635_v16 = vmul.f32 %v1586_v50, %v1298_v13 }
 0x1ab   : > { %v3110_v55 = vpop.f32.mrb[89].mxu1 }
 0x1ac   : > { %v3111_v58 = vadd.f32 %v3110_v55, %v3109_v52  ;;  %v3112_v60 = vpop.f32.mrb[90].mxu1  ;;  %3369 = vmatmul.mubr.f32.gmra.mrb[58].mxu0 %v1635_v16 }
 0x1ad   : > { %v3113_v62 = vpop.f32.mrb[91].mxu1 }
 0x1ae   : > { %v1303_v0 = vadd.f32 %v3111_v58, %v4218_v39  ;;  %v3114_v35 = vadd.f32 %v3113_v62, %v3112_v60 }
 0x1b0   : > { %v1306_v25 = vadd.f32 %v3114_v35, %v4220_v43  ;;  %v1636_v3 = vmul.f32 %v1591_v31, %v1303_v0 }
 0x1b2   : > { %v3115_v38 = vpop.f32.mrb[92].mxu1  ;;  %3371 = vmatprep.mubr.f32.mxu0 %v1636_v3  ;;  %v1637_v28 = vmul.f32 %v1596_v5, %v1306_v25 }
 0x1b3   : > { %v3116_v6 = vpop.f32.mrb[93].mxu1 }
 0x1b4   : > { %v3117_v36 = vadd.f32 %v3116_v6, %v3115_v38  ;;  %v3118_v9 = vpop.f32.mrb[94].mxu1  ;;  %3372 = vmatmul.mubr.f32.gmra.mrb[60].mxu0 %v1637_v28 }
 0x1b5   : > { %v3119_v10 = vpop.f32.mrb[95].mxu1 }
 0x1b6   : > { %v1311_v59 = vadd.f32 %v3117_v36, %v4226_v57  ;;  %v3120_v12 = vadd.f32 %v3119_v10, %v3118_v9 }
 0x1b8   : > { %v1314_v39 = vadd.f32 %v3120_v12, %v4228_v61  ;;  %v1638_v41 = vmul.f32 %v1601_v14, %v1311_v59 }
 0x1ba   : > { %3374 = vmatprep.mubr.f32.mxu0 %v1638_v41  ;;  %v1639_v43 = vmul.f32 %v1606_v63, %v1314_v39 }
 0x1bc   : > { %3375 = vmatmul.mubr.f32.gmra.mrb[62].mxu0 %v1639_v43 }
 0x217   : > { %v3331_v17 = vpop.f32.mrb[32].mxu0 }
 0x218   : > { %v2199_v57 = vadd.f32 %v3331_v17, %v4275_v44  ;;  %v2032_v18 = vpop.f32.mrb[33].mxu0 }
 0x219   : > { %v2198_v61 = vadd.f32 %v4275_v44, %v2032_v18 }
 0x21a   : > { %v4282_v20 = vsel %vm2232_vm0, %v2199_v57, -1e+30 }
 0x21b   : > { %2267 = vmax.xlane.f32.xlu1 %v4282_v20  ;;  %v4287_v54 = vsel %vm2232_vm0, %v2198_v61, -1e+30 }
 0x21c   : > { %2265 = vmax.xlane.f32.xlu0 %v4287_v54 }
 0x21f   : > { %v3334_v21 = vpop.f32.mrb[34].mxu0 }
 0x220   : > { %v2201_v22 = vadd.f32 %v3334_v21, %v4275_v44  ;;  %v2042_v24 = vpop.f32.mrb[35].mxu0 }
 0x221   : > { %v2200_v53 = vadd.f32 %v4275_v44, %v2042_v24 }
 0x222   : > { %v4294_v7 = vsel %vm2232_vm0, %v2201_v22, -1e+30 }
 0x223   : > { %2271 = vmax.xlane.f32.xlu0 %v4294_v7  ;;  %v4299_v27 = vsel %vm2232_vm0, %v2200_v53, -1e+30 }
 0x227   : > { %2269 = vmax.xlane.f32.xlu0 %v4299_v27  ;;  %v3337_v29 = vpop.f32.mrb[36].mxu0 }
 0x228   : > { %v2203_v56 = vadd.f32 %v3337_v29, %v4275_v44  ;;  %v2052_v30 = vpop.f32.mrb[37].mxu0 }
 0x229   : > { %v2202_v2 = vadd.f32 %v4275_v44, %v2052_v30 }
 0x22a   : > { %v4306_v11 = vsel %vm2232_vm0, %v2203_v56, -1e+30 }
 0x22b   : > { %2275 = vmax.xlane.f32.xlu0 %v4306_v11  ;;  %v4311_v32 = vsel %vm2232_vm0, %v2202_v2, -1e+30 }
 0x22c   : > { %2273 = vmax.xlane.f32.xlu1 %v4311_v32 }
 0x22f   : > { %v3340_v33 = vpop.f32.mrb[38].mxu0 }
 0x230   : > { %v2205_v8 = vadd.f32 %v3340_v33, %v4275_v44  ;;  %v2062_v37 = vpop.f32.mrb[39].mxu0 }
 0x231   : > { %v2204_v1 = vadd.f32 %v4275_v44, %v2062_v37 }
 0x232   : > { %v4318_v40 = vsel %vm2232_vm0, %v2205_v8, -1e+30 }
 0x233   : > { %2279 = vmax.xlane.f32.xlu0 %v4318_v40  ;;  %v4323_v42 = vsel %vm2232_vm0, %v2204_v1, -1e+30 }
 0x234   : > { %2277 = vmax.xlane.f32.xlu1 %v4323_v42 }
 0x237   : > { %v3343_v47 = vpop.f32.mrb[40].mxu0 }
 0x238   : > { %v2207_v4 = vadd.f32 %v3343_v47, %v4275_v44  ;;  %v2072_v45 = vpop.f32.mrb[41].mxu0 }
 0x239   : > { %v2206_v19 = vadd.f32 %v4275_v44, %v2072_v45 }
 0x23a   : > { %v4330_v46 = vsel %vm2232_vm0, %v2207_v4, -1e+30 }
 0x23b   : > { %2283 = vmax.xlane.f32.xlu0 %v4330_v46  ;;  %v4335_v26 = vsel %vm2232_vm0, %v2206_v19, -1e+30 }
 0x23c   : > { %2281 = vmax.xlane.f32.xlu1 %v4335_v26 }
 0x23f   : > { %v3346_v51 = vpop.f32.mrb[42].mxu0 }
 0x240   : > { %v2209_v49 = vadd.f32 %v3346_v51, %v4275_v44  ;;  %v2082_v23 = vpop.f32.mrb[43].mxu0 }
 0x241   : > { %v2208_v13 = vadd.f32 %v4275_v44, %v2082_v23 }
 0x242   : > { %v4342_v34 = vsel %vm2232_vm0, %v2209_v49, -1e+30 }
 0x243   : > { %2287 = vmax.xlane.f32.xlu0 %v4342_v34  ;;  %v4347_v50 = vsel %vm2232_vm0, %v2208_v13, -1e+30 }
 0x244   : > { %2285 = vmax.xlane.f32.xlu1 %v4347_v50 }
 0x247   : > { %v3349_v52 = vpop.f32.mrb[44].mxu0 }
 0x248   : > { %v2211_v16 = vadd.f32 %v3349_v52, %v4275_v44  ;;  %v2092_v55 = vpop.f32.mrb[45].mxu0 }
 0x249   : > { %v2210_v58 = vadd.f32 %v4275_v44, %v2092_v55 }
 0x24a   : > { %v4354_v60 = vsel %vm2232_vm0, %v2211_v16, -1e+30 }
 0x24b   : > { %2291 = vmax.xlane.f32.xlu0 %v4354_v60  ;;  %v4359_v62 = vsel %vm2232_vm0, %v2210_v58, -1e+30 }
 0x24c   : > { %2289 = vmax.xlane.f32.xlu1 %v4359_v62 }
 0x24f   : > { %v3352_v0 = vpop.f32.mrb[46].mxu0 }
 0x250   : > { %v2213_v35 = vadd.f32 %v3352_v0, %v4275_v44  ;;  %v2102_v31 = vpop.f32.mrb[47].mxu0 }
 0x251   : > { %v2212_v25 = vadd.f32 %v4275_v44, %v2102_v31 }
 0x252   : > { %v4366_v3 = vsel %vm2232_vm0, %v2213_v35, -1e+30 }
 0x253   : > { %2295 = vmax.xlane.f32.xlu0 %v4366_v3  ;;  %v4371_v5 = vsel %vm2232_vm0, %v2212_v25, -1e+30 }
 0x254   : > { %2293 = vmax.xlane.f32.xlu1 %v4371_v5 }
 0x257   : > { %v3355_v38 = vpop.f32.mrb[48].mxu0 }
 0x258   : > { %v2215_v28 = vadd.f32 %v3355_v38, %v4275_v44  ;;  %v2112_v6 = vpop.f32.mrb[49].mxu0 }
 0x259   : > { %v2214_v36 = vadd.f32 %v4275_v44, %v2112_v6 }
 0x25a   : > { %v4378_v9 = vsel %vm2232_vm0, %v2215_v28, -1e+30 }
 0x25b   : > { %2299 = vmax.xlane.f32.xlu0 %v4378_v9  ;;  %v4383_v10 = vsel %vm2232_vm0, %v2214_v36, -1e+30 }
 0x25c   : > { %2297 = vmax.xlane.f32.xlu1 %v4383_v10 }
 0x25f   : > { %v3358_v59 = vpop.f32.mrb[50].mxu0 }
 0x260   : > { %v2217_v12 = vadd.f32 %v3358_v59, %v4275_v44  ;;  %v2122_v14 = vpop.f32.mrb[51].mxu0 }
 0x261   : > { %v2216_v39 = vadd.f32 %v4275_v44, %v2122_v14 }
 0x262   : > { %v4390_v41 = vsel %vm2232_vm0, %v2217_v12, -1e+30 }
 0x263   : > { %2303 = vmax.xlane.f32.xlu0 %v4390_v41  ;;  %v4395_v63 = vsel %vm2232_vm0, %v2216_v39, -1e+30 }
 0x264   : > { %2301 = vmax.xlane.f32.xlu1 %v4395_v63 }
 0x267   : > { %v3361_v43 = vpop.f32.mrb[52].mxu0 }
 0x268   : > { %v2219_v15 = vadd.f32 %v3361_v43, %v4275_v44  ;;  %v2132_v17 = vpop.f32.mrb[53].mxu0 }
 0x269   : > { %v2218_v57 = vadd.f32 %v4275_v44, %v2132_v17 }
 0x26a   : > { %v4402_v18 = vsel %vm2232_vm0, %v2219_v15, -1e+30 }
 0x26b   : > { %2307 = vmax.xlane.f32.xlu0 %v4402_v18  ;;  %v4407_v61 = vsel %vm2232_vm0, %v2218_v57, -1e+30 }
 0x26c   : > { %2305 = vmax.xlane.f32.xlu1 %v4407_v61 }
 0x26f   : > { %v3364_v21 = vpop.f32.mrb[54].mxu0 }
 0x270   : > { %v2221_v22 = vadd.f32 %v3364_v21, %v4275_v44  ;;  %v2142_v24 = vpop.f32.mrb[55].mxu0 }
 0x271   : > { %v2220_v53 = vadd.f32 %v4275_v44, %v2142_v24 }
 0x272   : > { %v4414_v29 = vsel %vm2232_vm0, %v2221_v22, -1e+30 }
 0x273   : > { %2311 = vmax.xlane.f32.xlu0 %v4414_v29  ;;  %v4419_v56 = vsel %vm2232_vm0, %v2220_v53, -1e+30 }
 0x274   : > { %2309 = vmax.xlane.f32.xlu1 %v4419_v56 }
 0x277   : > { %v3367_v30 = vpop.f32.mrb[56].mxu0 }
 0x278   : > { %v2223_v2 = vadd.f32 %v3367_v30, %v4275_v44  ;;  %v2152_v33 = vpop.f32.mrb[57].mxu0 }
 0x279   : > { %v2222_v8 = vadd.f32 %v4275_v44, %v2152_v33 }
 0x27a   : > { %v4426_v37 = vsel %vm2232_vm0, %v2223_v2, -1e+30 }
 0x27b   : > { %2315 = vmax.xlane.f32.xlu0 %v4426_v37  ;;  %v4431_v1 = vsel %vm2232_vm0, %v2222_v8, -1e+30 }
 0x27c   : > { %2313 = vmax.xlane.f32.xlu1 %v4431_v1 }
 0x27f   : > { %v3370_v47 = vpop.f32.mrb[58].mxu0 }
 0x280   : > { %v2225_v4 = vadd.f32 %v3370_v47, %v4275_v44  ;;  %v2162_v45 = vpop.f32.mrb[59].mxu0 }
 0x281   : > { %v2224_v19 = vadd.f32 %v4275_v44, %v2162_v45 }
 0x282   : > { %v4438_v51 = vsel %vm2232_vm0, %v2225_v4, -1e+30 }
 0x283   : > { %2319 = vmax.xlane.f32.xlu0 %v4438_v51  ;;  %v4443_v49 = vsel %vm2232_vm0, %v2224_v19, -1e+30 }
 0x284   : > { %2317 = vmax.xlane.f32.xlu1 %v4443_v49 }
 0x287   : > { %v3373_v23 = vpop.f32.mrb[60].mxu0 }
 0x288   : > { %v2227_v13 = vadd.f32 %v3373_v23, %v4275_v44  ;;  %v2172_v52 = vpop.f32.mrb[61].mxu0 }
 0x289   : > { %v2226_v16 = vadd.f32 %v4275_v44, %v2172_v52 }
 0x28a   : > { %v4450_v55 = vsel %vm2232_vm0, %v2227_v13, -1e+30 }
 0x28b   : > { %2323 = vmax.xlane.f32.xlu0 %v4450_v55  ;;  %v4455_v58 = vsel %vm2232_vm0, %v2226_v16, -1e+30 }
 0x28c   : > { %2321 = vmax.xlane.f32.xlu1 %v4455_v58 }
 0x28f   : > { %v3376_v0 = vpop.f32.mrb[62].mxu0 }
 0x290   : > { %v2229_v35 = vadd.f32 %v3376_v0, %v4275_v44  ;;  %v2182_v31 = vpop.f32.mrb[63].mxu0 }
 0x291   : > { %v2228_v25 = vadd.f32 %v4275_v44, %v2182_v31 }
 0x292   : > { %v4462_v38 = vsel %vm2232_vm0, %v2229_v35, -1e+30 }
 0x293   : > { %2327 = vmax.xlane.f32.xlu0 %v4462_v38  ;;  %v4467_v28 = vsel %vm2232_vm0, %v2228_v25, -1e+30 }
 0x294   : > { %2325 = vmax.xlane.f32.xlu1 %v4467_v28 }
 0x2a8   : > { %v2268_v6 = vpop.xlane.xlu1 %2267 }
 0x2a9   : > { %v4471_v36 = vsub.f32 %v4282_v20, %v2268_v6  ;;  %v2266_v59 = vpop.xlane.xlu0 %2265 }
 0x2aa   : > { %v4474_v12 = vsub.f32 %v4287_v54, %v2266_v59 }
 0x2ab   : > { %v2363_v44 = vmul.f32 1.442695, %v4471_v36 }
 0x2ac   : > { %v2361_v14 = vmul.f32 1.442695, %v4474_v12 }
 0x2ad   : > { %3644 = vpow2.f32 %v2363_v44 }
 0x2ae   : > { %3646 = vpow2.f32 %v2361_v14 }
 0x2b0   : > { %v2272_v39 = vpop.xlane.xlu0 %2271 }
 0x2b1   : > { %v4479_v48 = vsub.f32 %v4294_v7, %v2272_v39 }
 0x2b3   : > { %v2367_v43 = vmul.f32 1.442695, %v4479_v48 }
 0x2b4   : > { %v2270_v15 = vpop.xlane.xlu0 %2269 }
 0x2b5   : > { %3648 = vpow2.f32 %v2367_v43  ;;  %v4483_v20 = vsub.f32 %v4299_v27, %v2270_v15 }
 0x2b7   : > { %v3645_v17 = vpop.eup %3644  ;;  %v2365_v54 = vmul.f32 1.442695, %v4483_v20 }
 0x2b8   : > { %v3647_v57 = vpop.eup %3646  ;;  %v2276_v21 = vpop.xlane.xlu0 %2275  ;;  %2427 = vadd.xlane.f32.xlu0 %v3645_v17 }
 0x2b9   : > { %3650 = vpow2.f32 %v2365_v54  ;;  %v4487_v22 = vsub.f32 %v4306_v11, %v2276_v21  ;;  %v2274_v24 = vpop.xlane.xlu1 %2273  ;;  %2425 = vadd.xlane.f32.xlu1 %v3647_v57 }
 0x2ba   : > { %v4490_v7 = vsub.f32 %v4311_v32, %v2274_v24 }
 0x2bb   : > { %v2371_v53 = vmul.f32 1.442695, %v4487_v22 }
 0x2bc   : > { %v2369_v27 = vmul.f32 1.442695, %v4490_v7 }
 0x2bd   : > { %3652 = vpow2.f32 %v2371_v53 }
 0x2be   : > { %3654 = vpow2.f32 %v2369_v27 }
 0x2bf   : > { %v3649_v30 = vpop.eup %3648 }
 0x2c0   : > { %v2280_v2 = vpop.xlane.xlu0 %2279  ;;  %2431 = vadd.xlane.f32.xlu0 %v3649_v30 }
 0x2c1   : > { %v4495_v33 = vsub.f32 %v4318_v40, %v2280_v2  ;;  %v2278_v8 = vpop.xlane.xlu1 %2277 }
 0x2c2   : > { %v4498_v11 = vsub.f32 %v4323_v42, %v2278_v8 }
 0x2c3   : > { %v3651_v47 = vpop.eup %3650  ;;  %v2375_v32 = vmul.f32 1.442695, %v4495_v33 }
 0x2c4   : > { %v2373_v4 = vmul.f32 1.442695, %v4498_v11  ;;  %2429 = vadd.xlane.f32.xlu1 %v3651_v47 }
 0x2c5   : > { %3656 = vpow2.f32 %v2375_v32 }
 0x2c6   : > { %3658 = vpow2.f32 %v2373_v4 }
 0x2c7   : > { %v3653_v45 = vpop.eup %3652 }
 0x2c8   : > { %v3655_v19 = vpop.eup %3654  ;;  %v2284_v23 = vpop.xlane.xlu0 %2283  ;;  %2435 = vadd.xlane.f32.xlu0 %v3653_v45 }
 0x2c9   : > { %v4503_v13 = vsub.f32 %v4330_v46, %v2284_v23  ;;  %v2282_v40 = vpop.xlane.xlu1 %2281  ;;  %2433 = vadd.xlane.f32.xlu1 %v3655_v19 }
 0x2ca   : > { %v4506_v42 = vsub.f32 %v4335_v26, %v2282_v40 }
 0x2cb   : > { %v2379_v52 = vmul.f32 1.442695, %v4503_v13 }
 0x2cc   : > { %v2377_v16 = vmul.f32 1.442695, %v4506_v42 }
 0x2cd   : > { %3660 = vpow2.f32 %v2379_v52 }
 0x2ce   : > { %3662 = vpow2.f32 %v2377_v16 }
 0x2cf   : > { %v3657_v0 = vpop.eup %3656 }
 0x2d0   : > { %v3659_v35 = vpop.eup %3658  ;;  %v2288_v31 = vpop.xlane.xlu0 %2287  ;;  %2439 = vadd.xlane.f32.xlu0 %v3657_v0 }
 0x2d1   : > { %v4511_v25 = vsub.f32 %v4342_v34, %v2288_v31  ;;  %v2286_v46 = vpop.xlane.xlu1 %2285  ;;  %2437 = vadd.xlane.f32.xlu1 %v3659_v35 }
 0x2d2   : > { %v4514_v6 = vsub.f32 %v4347_v50, %v2286_v46 }
 0x2d3   : > { %v2383_v26 = vmul.f32 1.442695, %v4511_v25 }
 0x2d4   : > { %v2381_v59 = vmul.f32 1.442695, %v4514_v6 }
 0x2d5   : > { %3664 = vpow2.f32 %v2383_v26 }
 0x2d6   : > { %3666 = vpow2.f32 %v2381_v59 }
 0x2d7   : > { %v3661_v44 = vpop.eup %3660 }
 0x2d8   : > { %v3663_v14 = vpop.eup %3662  ;;  %v2292_v39 = vpop.xlane.xlu0 %2291  ;;  %2443 = vadd.xlane.f32.xlu0 %v3661_v44 }
 0x2d9   : > { %v4519_v43 = vsub.f32 %v4354_v60, %v2292_v39  ;;  %v2290_v34 = vpop.xlane.xlu1 %2289  ;;  %2441 = vadd.xlane.f32.xlu1 %v3663_v14 }
 0x2da   : > { %v4522_v15 = vsub.f32 %v4359_v62, %v2290_v34 }
 0x2db   : > { %v2387_v50 = vmul.f32 1.442695, %v4519_v43 }
 0x2dc   : > { %v2385_v17 = vmul.f32 1.442695, %v4522_v15 }
 0x2dd   : > { %3668 = vpow2.f32 %v2387_v50 }
 0x2de   : > { %3670 = vpow2.f32 %v2385_v17 }
 0x2df   : > { %v3665_v54 = vpop.eup %3664 }
 0x2e0   : > { %v3667_v57 = vpop.eup %3666  ;;  %v2296_v21 = vpop.xlane.xlu0 %2295  ;;  %2447 = vadd.xlane.f32.xlu0 %v3665_v54 }
 0x2e1   : > { %v4527_v24 = vsub.f32 %v4366_v3, %v2296_v21  ;;  %v2294_v60 = vpop.xlane.xlu1 %2293  ;;  %2445 = vadd.xlane.f32.xlu1 %v3667_v57 }
 0x2e2   : > { %v4530_v53 = vsub.f32 %v4371_v5, %v2294_v60 }
 0x2e3   : > { %v2391_v62 = vmul.f32 1.442695, %v4527_v24 }
 0x2e4   : > { %v2389_v27 = vmul.f32 1.442695, %v4530_v53 }
 0x2e5   : > { %3672 = vpow2.f32 %v2391_v62 }
 0x2e6   : > { %3674 = vpow2.f32 %v2389_v27 }
 0x2e7   : > { %v3669_v30 = vpop.eup %3668 }
 0x2e8   : > { %v3671_v2 = vpop.eup %3670  ;;  %v2300_v8 = vpop.xlane.xlu0 %2299  ;;  %2451 = vadd.xlane.f32.xlu0 %v3669_v30 }
 0x2e9   : > { %v4535_v47 = vsub.f32 %v4378_v9, %v2300_v8  ;;  %v2298_v3 = vpop.xlane.xlu1 %2297  ;;  %2449 = vadd.xlane.f32.xlu1 %v3671_v2 }
 0x2ea   : > { %v4538_v32 = vsub.f32 %v4383_v10, %v2298_v3 }
 0x2eb   : > { %v2395_v5 = vmul.f32 1.442695, %v4535_v47 }
 0x2ec   : > { %v2393_v4 = vmul.f32 1.442695, %v4538_v32 }
 0x2ed   : > { %3676 = vpow2.f32 %v2395_v5 }
 0x2ee   : > { %3678 = vpow2.f32 %v2393_v4 }
 0x2ef   : > { %v3673_v45 = vpop.eup %3672 }
 0x2f0   : > { %v3675_v19 = vpop.eup %3674  ;;  %v2304_v23 = vpop.xlane.xlu0 %2303  ;;  %2455 = vadd.xlane.f32.xlu0 %v3673_v45 }
 0x2f1   : > { %v4543_v40 = vsub.f32 %v4390_v41, %v2304_v23  ;;  %v2302_v9 = vpop.xlane.xlu1 %2301  ;;  %2453 = vadd.xlane.f32.xlu1 %v3675_v19 }
 0x2f2   : > { %v4546_v52 = vsub.f32 %v4395_v63, %v2302_v9 }
 0x2f3   : > { %v2399_v10 = vmul.f32 1.442695, %v4543_v40 }
 0x2f4   : > { %v2397_v16 = vmul.f32 1.442695, %v4546_v52 }
 0x2f5   : > { %3680 = vpow2.f32 %v2399_v10 }
 0x2f6   : > { %3682 = vpow2.f32 %v2397_v16 }
 0x2f7   : > { %v3677_v0 = vpop.eup %3676 }
 0x2f8   : > { %v3679_v35 = vpop.eup %3678  ;;  %v2308_v31 = vpop.xlane.xlu0 %2307  ;;  %2459 = vadd.xlane.f32.xlu0 %v3677_v0 }
 0x2f9   : > { %v4551_v46 = vsub.f32 %v4402_v18, %v2308_v31  ;;  %v2306_v41 = vpop.xlane.xlu1 %2305  ;;  %2457 = vadd.xlane.f32.xlu1 %v3679_v35 }
 0x2fa   : > { %v4554_v26 = vsub.f32 %v4407_v61, %v2306_v41 }
 0x2fb   : > { %v2403_v63 = vmul.f32 1.442695, %v4551_v46 }
 0x2fc   : > { %v2401_v59 = vmul.f32 1.442695, %v4554_v26 }
 0x2fd   : > { %3684 = vpow2.f32 %v2403_v63 }
 0x2fe   : > { %3686 = vpow2.f32 %v2401_v59 }
 0x2ff   : > { %v3681_v44 = vpop.eup %3680 }
 0x300   : > { %v3683_v14 = vpop.eup %3682  ;;  %v2312_v39 = vpop.xlane.xlu0 %2311  ;;  %2463 = vadd.xlane.f32.xlu0 %v3681_v44 }
 0x301   : > { %v4559_v34 = vsub.f32 %v4414_v29, %v2312_v39  ;;  %v2310_v18 = vpop.xlane.xlu1 %2309  ;;  %2461 = vadd.xlane.f32.xlu1 %v3683_v14 }
 0x302   : > { %v4562_v50 = vsub.f32 %v4419_v56, %v2310_v18 }
 0x303   : > { %v2407_v61 = vmul.f32 1.442695, %v4559_v34 }
 0x304   : > { %v2405_v17 = vmul.f32 1.442695, %v4562_v50 }
 0x305   : > { %3688 = vpow2.f32 %v2407_v61 }
 0x306   : > { %3690 = vpow2.f32 %v2405_v17 }
 0x307   : > { %v3685_v54 = vpop.eup %3684 }
 0x308   : > { %v3687_v57 = vpop.eup %3686  ;;  %v2316_v21 = vpop.xlane.xlu0 %2315  ;;  %2467 = vadd.xlane.f32.xlu0 %v3685_v54 }
 0x309   : > { %v4567_v60 = vsub.f32 %v4426_v37, %v2316_v21  ;;  %v2314_v29 = vpop.xlane.xlu1 %2313  ;;  %2465 = vadd.xlane.f32.xlu1 %v3687_v57 }
 0x30a   : > { %v4570_v62 = vsub.f32 %v4431_v1, %v2314_v29 }
 0x30b   : > { %v2411_v56 = vmul.f32 1.442695, %v4567_v60 }
 0x30c   : > { %v2409_v27 = vmul.f32 1.442695, %v4570_v62 }
 0x30d   : > { %3692 = vpow2.f32 %v2411_v56 }
 0x30e   : > { %3694 = vpow2.f32 %v2409_v27 }
 0x30f   : > { %v3689_v30 = vpop.eup %3688 }
 0x310   : > { %v3691_v2 = vpop.eup %3690  ;;  %v2320_v8 = vpop.xlane.xlu0 %2319  ;;  %2471 = vadd.xlane.f32.xlu0 %v3689_v30 }
 0x311   : > { %v4575_v3 = vsub.f32 %v4438_v51, %v2320_v8  ;;  %v2318_v37 = vpop.xlane.xlu1 %2317  ;;  %2469 = vadd.xlane.f32.xlu1 %v3691_v2 }
 0x312   : > { %v4578_v5 = vsub.f32 %v4443_v49, %v2318_v37 }
 0x313   : > { %v2415_v1 = vmul.f32 1.442695, %v4575_v3 }
 0x314   : > { %v2413_v4 = vmul.f32 1.442695, %v4578_v5 }
 0x315   : > { %3696 = vpow2.f32 %v2415_v1 }
 0x316   : > { %3698 = vpow2.f32 %v2413_v4 }
 0x317   : > { %v3693_v45 = vpop.eup %3692 }
 0x318   : > { %v3695_v19 = vpop.eup %3694  ;;  %v2324_v23 = vpop.xlane.xlu0 %2323  ;;  %2475 = vadd.xlane.f32.xlu0 %v3693_v45 }
 0x319   : > { %v4583_v9 = vsub.f32 %v4450_v55, %v2324_v23  ;;  %v2322_v51 = vpop.xlane.xlu1 %2321  ;;  %2473 = vadd.xlane.f32.xlu1 %v3695_v19 }
 0x31a   : > { %v4586_v10 = vsub.f32 %v4455_v58, %v2322_v51 }
 0x31b   : > { %v2419_v49 = vmul.f32 1.442695, %v4583_v9 }
 0x31c   : > { %v2417_v16 = vmul.f32 1.442695, %v4586_v10 }
 0x31d   : > { %3700 = vpow2.f32 %v2419_v49 }
 0x31e   : > { %3702 = vpow2.f32 %v2417_v16 }
 0x31f   : > { %v3697_v0 = vpop.eup %3696 }
 0x320   : > { %v3699_v35 = vpop.eup %3698  ;;  %2479 = vadd.xlane.f32.xlu0 %v3697_v0  ;;  %v2328_v31 = vpop.xlane.xlu0 %2327 }
 0x321   : > { %v4591_v41 = vsub.f32 %v4462_v38, %v2328_v31  ;;  %2477 = vadd.xlane.f32.xlu1 %v3699_v35  ;;  %v2326_v55 = vpop.xlane.xlu1 %2325 }
 0x322   : > { %v4594_v63 = vsub.f32 %v4467_v28, %v2326_v55 }
 0x323   : > { %v2423_v58 = vmul.f32 1.442695, %v4591_v41 }
 0x324   : > { %v2421_v59 = vmul.f32 1.442695, %v4594_v63 }
 0x325   : > { %3704 = vpow2.f32 %v2423_v58 }
 0x326   : > { %3706 = vpow2.f32 %v2421_v59 }
 0x327   : > { %v3701_v44 = vpop.eup %3700 }
 0x328   : > { %v3703_v14 = vpop.eup %3702  ;;  %2483 = vadd.xlane.f32.xlu0 %v3701_v44 }
 0x329   : > { %2481 = vadd.xlane.f32.xlu1 %v3703_v14 }
 0x32f   : > { %v3705_v39 = vpop.eup %3704 }
 0x330   : > { %v3707_v18 = vpop.eup %3706  ;;  %2487 = vadd.xlane.f32.xlu0 %v3705_v39 }
 0x331   : > { %2485 = vadd.xlane.f32.xlu1 %v3707_v18 }
 0x345   : > { %v2428_v38 = vpop.xlane.xlu0 %2427 }
 0x346   : > { %3708 = vlog2.f32 %v2428_v38  ;;  %v2426_v61 = vpop.xlane.xlu1 %2425 }
 0x347   : > { %3710 = vlog2.f32 %v2426_v61 }
 0x34d   : > { %v2432_v28 = vpop.xlane.xlu0 %2431 }
 0x34e   : > { %3712 = vlog2.f32 %v2432_v28 }
 0x350   : > { %v3709_v17 = vpop.eup %3708 }
 0x351   : > { %v3711_v54 = vpop.eup %3710  ;;  %v2492_v57 = vmul.f32 0.6931472, %v3709_v17  ;;  %v2430_v21 = vpop.xlane.xlu1 %2429 }
 0x352   : > { %v2490_v29 = vmul.f32 0.6931472, %v3711_v54  ;;  %3714 = vlog2.f32 %v2430_v21 }
 0x353   : > { %v2554_v56 = vsub.f32 %v4471_v36, %v2492_v57 }
 0x354   : > { %v2553_v27 = vsub.f32 %v4474_v12, %v2490_v29 }
 0x355   : > { %2586 = vst [vmem:[%s4603_s18 + $0x8] sm:$0xff] %v2554_v56  ;;  %v2436_v30 = vpop.xlane.xlu0 %2435 }
 0x356   : > { %2585 = vst [vmem:[%s4603_s18] sm:$0xff] %v2553_v27  ;;  %3716 = vlog2.f32 %v2436_v30  ;;  %v2434_v2 = vpop.xlane.xlu1 %2433 }
 0x357   : > { %3718 = vlog2.f32 %v2434_v2 }
 0x358   : > { %v3713_v8 = vpop.eup %3712 }
 0x359   : > { %v2496_v37 = vmul.f32 0.6931472, %v3713_v8 }
 0x35b   : > { %v2556_v1 = vsub.f32 %v4479_v48, %v2496_v37 }
 0x35c   : > { %v3715_v4 = vpop.eup %3714 }
 0x35d   : > { %2588 = vst [vmem:[%s4603_s18 + $0x18] sm:$0xff] %v2556_v1  ;;  %v2494_v45 = vmul.f32 0.6931472, %v3715_v4  ;;  %v2440_v19 = vpop.xlane.xlu0 %2439 }
 0x35e   : > { %3720 = vlog2.f32 %v2440_v19  ;;  %v2438_v36 = vpop.xlane.xlu1 %2437 }
 0x35f   : > { %v2555_v12 = vsub.f32 %v4483_v20, %v2494_v45  ;;  %3722 = vlog2.f32 %v2438_v36 }
 0x360   : > { %v3717_v23 = vpop.eup %3716 }
 0x361   : > { %v3719_v51 = vpop.eup %3718  ;;  %2587 = vst [vmem:[%s4603_s18 + $0x10] sm:$0xff] %v2555_v12  ;;  %v2500_v49 = vmul.f32 0.6931472, %v3717_v23 }
 0x362   : > { %v2498_v16 = vmul.f32 0.6931472, %v3719_v51 }
 0x363   : > { %v2558_v0 = vsub.f32 %v4487_v22, %v2500_v49 }
 0x364   : > { %v2557_v48 = vsub.f32 %v4490_v7, %v2498_v16 }
 0x365   : > { %2590 = vst [vmem:[%s4603_s18 + $0x28] sm:$0xff] %v2558_v0  ;;  %v2444_v35 = vpop.xlane.xlu0 %2443 }
 0x366   : > { %2589 = vst [vmem:[%s4603_s18 + $0x20] sm:$0xff] %v2557_v48  ;;  %3724 = vlog2.f32 %v2444_v35  ;;  %v2442_v31 = vpop.xlane.xlu1 %2441 }
 0x367   : > { %3726 = vlog2.f32 %v2442_v31 }
 0x368   : > { %v3721_v55 = vpop.eup %3720 }
 0x369   : > { %v3723_v20 = vpop.eup %3722  ;;  %v2504_v58 = vmul.f32 0.6931472, %v3721_v55 }
 0x36a   : > { %v2502_v59 = vmul.f32 0.6931472, %v3723_v20 }
 0x36b   : > { %v2560_v44 = vsub.f32 %v4495_v33, %v2504_v58 }
 0x36c   : > { %v2559_v14 = vsub.f32 %v4498_v11, %v2502_v59 }
 0x36d   : > { %2592 = vst [vmem:[%s4603_s18 + $0x38] sm:$0xff] %v2560_v44  ;;  %v2448_v22 = vpop.xlane.xlu0 %2447 }
 0x36e   : > { %2591 = vst [vmem:[%s4603_s18 + $0x30] sm:$0xff] %v2559_v14  ;;  %3728 = vlog2.f32 %v2448_v22  ;;  %v2446_v7 = vpop.xlane.xlu1 %2445 }
 0x36f   : > { %3730 = vlog2.f32 %v2446_v7 }
 0x370   : > { %v3725_v39 = vpop.eup %3724 }
 0x371   : > { %v3727_v18 = vpop.eup %3726  ;;  %v2508_v38 = vmul.f32 0.6931472, %v3725_v39 }
 0x372   : > { %v2506_v61 = vmul.f32 0.6931472, %v3727_v18 }
 0x373   : > { %v2562_v28 = vsub.f32 %v4503_v13, %v2508_v38 }
 0x374   : > { %v2561_v17 = vsub.f32 %v4506_v42, %v2506_v61 }
 0x375   : > { %2594 = vst [vmem:[%s4603_s18 + $0x48] sm:$0xff] %v2562_v28  ;;  %v2452_v33 = vpop.xlane.xlu0 %2451 }
 0x376   : > { %2593 = vst [vmem:[%s4603_s18 + $0x40] sm:$0xff] %v2561_v17  ;;  %3732 = vlog2.f32 %v2452_v33  ;;  %v2450_v11 = vpop.xlane.xlu1 %2449 }
 0x377   : > { %3734 = vlog2.f32 %v2450_v11 }
 0x378   : > { %v3729_v54 = vpop.eup %3728 }
 0x379   : > { %v3731_v57 = vpop.eup %3730  ;;  %v2512_v21 = vmul.f32 0.6931472, %v3729_v54 }
 0x37a   : > { %v2510_v29 = vmul.f32 0.6931472, %v3731_v57 }
 0x37b   : > { %v2564_v56 = vsub.f32 %v4511_v25, %v2512_v21 }
 0x37c   : > { %v2563_v27 = vsub.f32 %v4514_v6, %v2510_v29 }
 0x37d   : > { %2596 = vst [vmem:[%s4603_s18 + $0x58] sm:$0xff] %v2564_v56  ;;  %v2456_v13 = vpop.xlane.xlu0 %2455 }
 0x37e   : > { %2595 = vst [vmem:[%s4603_s18 + $0x50] sm:$0xff] %v2563_v27  ;;  %3736 = vlog2.f32 %v2456_v13  ;;  %v2454_v42 = vpop.xlane.xlu1 %2453 }
 0x37f   : > { %3738 = vlog2.f32 %v2454_v42 }
 0x380   : > { %v3733_v30 = vpop.eup %3732 }
 0x381   : > { %v3735_v2 = vpop.eup %3734  ;;  %v2516_v8 = vmul.f32 0.6931472, %v3733_v30 }
 0x382   : > { %v2514_v37 = vmul.f32 0.6931472, %v3735_v2 }
 0x383   : > { %v2566_v1 = vsub.f32 %v4519_v43, %v2516_v8 }
 0x384   : > { %v2565_v4 = vsub.f32 %v4522_v15, %v2514_v37 }
 0x385   : > { %2598 = vst [vmem:[%s4603_s18 + $0x68] sm:$0xff] %v2566_v1  ;;  %v2460_v25 = vpop.xlane.xlu0 %2459 }
 0x386   : > { %2597 = vst [vmem:[%s4603_s18 + $0x60] sm:$0xff] %v2565_v4  ;;  %3740 = vlog2.f32 %v2460_v25  ;;  %v2458_v6 = vpop.xlane.xlu1 %2457 }
 0x387   : > { %3742 = vlog2.f32 %v2458_v6 }
 0x388   : > { %v3737_v45 = vpop.eup %3736 }
 0x389   : > { %v3739_v19 = vpop.eup %3738  ;;  %v2520_v36 = vmul.f32 0.6931472, %v3737_v45 }
 0x38a   : > { %v2518_v12 = vmul.f32 0.6931472, %v3739_v19 }
 0x38b   : > { %v2568_v23 = vsub.f32 %v4527_v24, %v2520_v36 }
 0x38c   : > { %v2567_v51 = vsub.f32 %v4530_v53, %v2518_v12 }
 0x38d   : > { %2600 = vst [vmem:[%s4603_s18 + $0x78] sm:$0xff] %v2568_v23  ;;  %v2464_v43 = vpop.xlane.xlu0 %2463 }
 0x38e   : > { %2599 = vst [vmem:[%s4603_s18 + $0x70] sm:$0xff] %v2567_v51  ;;  %3744 = vlog2.f32 %v2464_v43  ;;  %v2462_v15 = vpop.xlane.xlu1 %2461 }
 0x38f   : > { %3746 = vlog2.f32 %v2462_v15 }
 0x390   : > { %v3741_v49 = vpop.eup %3740 }
 0x391   : > { %v3743_v16 = vpop.eup %3742  ;;  %v2524_v0 = vmul.f32 0.6931472, %v3741_v49 }
 0x392   : > { %v2522_v48 = vmul.f32 0.6931472, %v3743_v16 }
 0x393   : > { %v2570_v35 = vsub.f32 %v4535_v47, %v2524_v0 }
 0x394   : > { %v2569_v31 = vsub.f32 %v4538_v32, %v2522_v48 }
 0x395   : > { %2602 = vst [vmem:[%s4603_s18 + $0x88] sm:$0xff] %v2570_v35  ;;  %v2468_v24 = vpop.xlane.xlu0 %2467 }
 0x396   : > { %2601 = vst [vmem:[%s4603_s18 + $0x80] sm:$0xff] %v2569_v31  ;;  %3748 = vlog2.f32 %v2468_v24  ;;  %v2466_v53 = vpop.xlane.xlu1 %2465 }
 0x397   : > { %3750 = vlog2.f32 %v2466_v53 }
 0x398   : > { %v3745_v55 = vpop.eup %3744 }
 0x399   : > { %v3747_v20 = vpop.eup %3746  ;;  %v2528_v58 = vmul.f32 0.6931472, %v3745_v55 }
 0x39a   : > { %v2526_v59 = vmul.f32 0.6931472, %v3747_v20 }
 0x39b   : > { %v2572_v44 = vsub.f32 %v4543_v40, %v2528_v58 }
 0x39c   : > { %v2571_v14 = vsub.f32 %v4546_v52, %v2526_v59 }
 0x39d   : > { %2604 = vst [vmem:[%s4603_s18 + $0x98] sm:$0xff] %v2572_v44  ;;  %v2472_v47 = vpop.xlane.xlu0 %2471 }
 0x39e   : > { %2603 = vst [vmem:[%s4603_s18 + $0x90] sm:$0xff] %v2571_v14  ;;  %3752 = vlog2.f32 %v2472_v47  ;;  %v2470_v32 = vpop.xlane.xlu1 %2469 }
 0x39f   : > { %3754 = vlog2.f32 %v2470_v32 }
 0x3a0   : > { %v3749_v22 = vpop.eup %3748 }
 0x3a1   : > { %v3751_v7 = vpop.eup %3750  ;;  %v2532_v39 = vmul.f32 0.6931472, %v3749_v22 }
 0x3a2   : > { %v2530_v18 = vmul.f32 0.6931472, %v3751_v7 }
 0x3a3   : > { %v2574_v38 = vsub.f32 %v4551_v46, %v2532_v39 }
 0x3a4   : > { %v2573_v61 = vsub.f32 %v4554_v26, %v2530_v18 }
 0x3a5   : > { %2606 = vst [vmem:[%s4603_s18 + $0xa8] sm:$0xff] %v2574_v38  ;;  %v2476_v40 = vpop.xlane.xlu0 %2475 }
 0x3a6   : > { %2605 = vst [vmem:[%s4603_s18 + $0xa0] sm:$0xff] %v2573_v61  ;;  %3756 = vlog2.f32 %v2476_v40  ;;  %v2474_v52 = vpop.xlane.xlu1 %2473 }
 0x3a7   : > { %3758 = vlog2.f32 %v2474_v52 }
 0x3a8   : > { %v3753_v28 = vpop.eup %3752 }
 0x3a9   : > { %v3755_v17 = vpop.eup %3754  ;;  %v2536_v33 = vmul.f32 0.6931472, %v3753_v28 }
 0x3aa   : > { %v2534_v11 = vmul.f32 0.6931472, %v3755_v17 }
 0x3ab   : > { %v2576_v54 = vsub.f32 %v4559_v34, %v2536_v33 }
 0x3ac   : > { %v2575_v57 = vsub.f32 %v4562_v50, %v2534_v11 }
 0x3ad   : > { %2608 = vst [vmem:[%s4603_s18 + $0xb8] sm:$0xff] %v2576_v54  ;;  %v2480_v46 = vpop.xlane.xlu0 %2479 }
 0x3ae   : > { %2607 = vst [vmem:[%s4603_s18 + $0xb0] sm:$0xff] %v2575_v57  ;;  %3760 = vlog2.f32 %v2480_v46  ;;  %v2478_v26 = vpop.xlane.xlu1 %2477 }
 0x3af   : > { %3762 = vlog2.f32 %v2478_v26 }
 0x3b0   : > { %v3757_v21 = vpop.eup %3756 }
 0x3b1   : > { %v3759_v29 = vpop.eup %3758  ;;  %v2540_v56 = vmul.f32 0.6931472, %v3757_v21 }
 0x3b2   : > { %v2538_v27 = vmul.f32 0.6931472, %v3759_v29 }
 0x3b3   : > { %v2578_v13 = vsub.f32 %v4567_v60, %v2540_v56 }
 0x3b4   : > { %v2577_v42 = vsub.f32 %v4570_v62, %v2538_v27 }
 0x3b5   : > { %2610 = vst [vmem:[%s4603_s18 + $0xc8] sm:$0xff] %v2578_v13  ;;  %v2484_v34 = vpop.xlane.xlu0 %2483 }
 0x3b6   : > { %2609 = vst [vmem:[%s4603_s18 + $0xc0] sm:$0xff] %v2577_v42  ;;  %3764 = vlog2.f32 %v2484_v34  ;;  %v2482_v50 = vpop.xlane.xlu1 %2481 }
 0x3b7   : > { %3766 = vlog2.f32 %v2482_v50 }
 0x3b8   : > { %v3761_v30 = vpop.eup %3760 }
 0x3b9   : > { %v3763_v2 = vpop.eup %3762  ;;  %v2544_v8 = vmul.f32 0.6931472, %v3761_v30 }
 0x3ba   : > { %v2542_v37 = vmul.f32 0.6931472, %v3763_v2 }
 0x3bb   : > { %v2580_v1 = vsub.f32 %v4575_v3, %v2544_v8 }
 0x3bc   : > { %v2579_v4 = vsub.f32 %v4578_v5, %v2542_v37 }
 0x3bd   : > { %2612 = vst [vmem:[%s4603_s18 + $0xd8] sm:$0xff] %v2580_v1  ;;  %v2488_v60 = vpop.xlane.xlu0 %2487 }
 0x3be   : > { %2611 = vst [vmem:[%s4603_s18 + $0xd0] sm:$0xff] %v2579_v4  ;;  %3768 = vlog2.f32 %v2488_v60  ;;  %v2486_v62 = vpop.xlane.xlu1 %2485 }
 0x3bf   : > { %3770 = vlog2.f32 %v2486_v62 }
 0x3c0   : > { %v3765_v25 = vpop.eup %3764 }
 0x3c1   : > { %v3767_v6 = vpop.eup %3766  ;;  %v2548_v45 = vmul.f32 0.6931472, %v3765_v25 }
 0x3c2   : > { %v2546_v19 = vmul.f32 0.6931472, %v3767_v6 }
 0x3c3   : > { %v2582_v36 = vsub.f32 %v4583_v9, %v2548_v45 }
 0x3c4   : > { %v2581_v12 = vsub.f32 %v4586_v10, %v2546_v19 }
 0x3c5   : > { %2614 = vst [vmem:[%s4603_s18 + $0xe8] sm:$0xff] %v2582_v36 }
 0x3c6   : > { %2613 = vst [vmem:[%s4603_s18 + $0xe0] sm:$0xff] %v2581_v12 }
 0x3c8   : > { %v3769_v3 = vpop.eup %3768 }
 0x3c9   : > { %v3771_v5 = vpop.eup %3770  ;;  %v2552_v23 = vmul.f32 0.6931472, %v3769_v3 }
 0x3ca   : > { %v2550_v51 = vmul.f32 0.6931472, %v3771_v5 }
 0x3cb   : > { %v2584_v43 = vsub.f32 %v4591_v41, %v2552_v23 }
 0x3cc   : > { %v2583_v15 = vsub.f32 %v4594_v63, %v2550_v51 }
 0x3cd   : > { %2616 = vst [vmem:[%s4603_s18 + $0xf8] sm:$0xff] %v2584_v43 }
 0x3ce   : > { %2615 = vst [vmem:[%s4603_s18 + $0xf0] sm:$0xff] %v2583_v15 }
 0x3cf PF: > { %s15_s20 = sadd.s32 1, %s3794_s20   ;;  %s4684_s18 = smov %s3790_s19 }
 0x3d0   : > { %p12_p5 = scmp.ge.s32.totalorder %s15_s20, 4   ;;  %s4685_s19 = smov %s4687_s21 }
 0x3d2   :  { %14 = sbr.rel (!%p12_p5) target bundleno = 2 (0x2), region = 83 }

</bundles_post_ra>
